<compile_context>
chip_gen: v7x
topology: tpu7x:2x2x1
jax: 0.10.0
libtpu: 0.0.40
codegen_flags: <defaults>
</compile_context>

<pallas_src>
import jax
import jax.numpy as jnp
from jax import lax
from jax.experimental import pallas as pl
from jax.experimental.pallas import tpu as pltpu

_EPS = 1e-5
_CP = 128                      # padded channel width = one full vreg lane dim


# ----------------------------------------------------------------------------
# Pallas kernels
# ----------------------------------------------------------------------------
def _make_block_kernel(H, W, cp):
    """Fused residual block kernel. One grid step processes one image.

    Activations are (H*W, cp) lane-dense bf16 matrices.  conv3x3 computes
      out[h,w] = sum_{dy,dx} act[h+dy, w+dx] @ Wtap[dy+1, dx+1]
    where the dx shift comes from a 0/1 shift-matrix matmul and the dy shift
    is an aligned slice from a zero-halo scratch buffer.
    """
    HW = H * W

    def kernel(x_ref, pm_ref, pp_ref, wsc_ref, bsc_ref,
               w1_ref, b1_ref, w2_ref, b2_ref, w3_ref, b3_ref,
               o_ref, sm_ref, s0_ref, sp_ref, sc_ref):
        # Zero the halo rows (h = -1 and h = H) of the three shift buffers.
        halo = jnp.zeros((W, cp), jnp.bfloat16)
        for s_ref in (sm_ref, s0_ref, sp_ref):
            s_ref[pl.ds(0, W), :] = halo
            s_ref[pl.ds(W + HW, W), :] = halo

        x_bf = x_ref[...]                                   # (HW, cp) bf16

        # Shortcut: 1x1 conv + folded BN, no ReLU.  Kept resident in VMEM.
        sc_ref[...] = (jnp.dot(x_bf, wsc_ref[...],
                               preferred_element_type=jnp.float32)
                       + bsc_ref[...])

        def conv3x3(a_bf, w_ref, b_ref):
            # Column-shifted copies via the MXU (shift matrices are 0/1 -> exact).
            a_m1 = jnp.dot(pm_ref[...], a_bf,
                           preferred_element_type=jnp.float32).astype(jnp.bfloat16)
            a_p1 = jnp.dot(pp_ref[...], a_bf,
                           preferred_element_type=jnp.float32).astype(jnp.bfloat16)
            sm_ref[pl.ds(W, HW), :] = a_m1                  # value at (h, w-1)
            s0_ref[pl.ds(W, HW), :] = a_bf                  # value at (h, w  )
            sp_ref[pl.ds(W, HW), :] = a_p1                  # value at (h, w+1)
            srcs = (sm_ref, s0_ref, sp_ref)
            acc = b_ref[...] + jnp.zeros((HW, cp), jnp.float32)
            for di in range(3):                             # dy = di - 1
                for dj in range(3):                         # dx = dj - 1
                    shifted = srcs[dj][pl.ds(di * W, HW), :]   # aligned slice
                    acc = acc + jnp.dot(shifted, w_ref[di * 3 + dj],
                                        preferred_element_type=jnp.float32)
            return acc

        a1 = jnp.maximum(conv3x3(x_bf, w1_ref, b1_ref), 0.0).astype(jnp.bfloat16)
        a2 = jnp.maximum(conv3x3(a1, w2_ref, b2_ref), 0.0).astype(jnp.bfloat16)
        a3 = conv3x3(a2, w3_ref, b3_ref) + sc_ref[...]      # residual add
        o_ref[...] = jnp.maximum(a3, 0.0).astype(o_ref.dtype)

    return kernel


def residual_block(y, pm, pp, blk, N, H, W, cp):
    """y: (N*H*W, cp) bf16 -> (N*H*W, cp) bf16 (one fused pallas_call)."""
    HW = H * W
    assert HW % 8 == 0 and W % 16 == 0, "row-shift alignment assumes W % 16 == 0"
    (w1, b1), (w2, b2), (w3, b3) = blk["convs"]
    const2 = lambda n: (0, 0)
    const3 = lambda n: (0, 0, 0)
    return pl.pallas_call(
        _make_block_kernel(H, W, cp),
        out_shape=jax.ShapeDtypeStruct((N * HW, cp), jnp.bfloat16),
        grid=(N,),
        in_specs=[
            pl.BlockSpec((HW, cp), lambda n: (n, 0)),       # x (one image)
            pl.BlockSpec((HW, HW), const2),                 # col shift (w-1)
            pl.BlockSpec((HW, HW), const2),                 # col shift (w+1)
            pl.BlockSpec((cp, cp), const2),                 # shortcut weight
            pl.BlockSpec((1, cp), const2),                  # shortcut bias
            pl.BlockSpec((9, cp, cp), const3),              # conv1 taps
            pl.BlockSpec((1, cp), const2),                  # conv1 bias
            pl.BlockSpec((9, cp, cp), const3),              # conv2 taps
            pl.BlockSpec((1, cp), const2),                  # conv2 bias
            pl.BlockSpec((9, cp, cp), const3),              # conv3 taps
            pl.BlockSpec((1, cp), const2),                  # conv3 bias
        ],
        out_specs=pl.BlockSpec((HW, cp), lambda n: (n, 0)),
        scratch_shapes=[
            pltpu.VMEM((HW + 2 * W, cp), jnp.bfloat16),     # (h, w-1) + halo
            pltpu.VMEM((HW + 2 * W, cp), jnp.bfloat16),     # (h, w  ) + halo
            pltpu.VMEM((HW + 2 * W, cp), jnp.bfloat16),     # (h, w+1) + halo
            pltpu.VMEM((HW, cp), jnp.float32),              # shortcut (f32)
        ],
        compiler_params=pltpu.CompilerParams(
            dimension_semantics=("parallel",)),
    )(y, pm, pp, blk["wsc"], blk["bsc"], w1, b1, w2, b2, w3, b3)


def _head_kernel(x_ref, lw_ref, lb_ref, logit_ref, feat_ref):
    inv_hw = 1.0 / x_ref.shape[1]
    pooled = jnp.sum(x_ref[...].astype(jnp.float32), axis=1) * inv_hw  # (N, cp)
    feat_ref[...] = pooled
    logit_ref[...] = (jnp.dot(pooled, lw_ref[...],
                              preferred_element_type=jnp.float32)
                      + lb_ref[...])


def head(y, lin_w_p, lin_b_p, N, HW, cp):
    """Global average pool + Linear, lane-dense (padded to 128) outputs."""
    nc = lin_w_p.shape[1]
    x = y.reshape(N, HW, cp)
    return pl.pallas_call(
        _head_kernel,
        out_shape=(jax.ShapeDtypeStruct((N, nc), jnp.float32),
                   jax.ShapeDtypeStruct((N, cp), jnp.float32)),
        grid=(1,),
        in_specs=[
            pl.BlockSpec((N, HW, cp), lambda i: (0, 0, 0)),
            pl.BlockSpec((cp, nc), lambda i: (0, 0)),
            pl.BlockSpec((1, nc), lambda i: (0, 0)),
        ],
        out_specs=(
            pl.BlockSpec((N, nc), lambda i: (0, 0)),
            pl.BlockSpec((N, cp), lambda i: (0, 0)),
        ),
    )(x, lin_w_p, lin_b_p)


# ----------------------------------------------------------------------------
# One-time parameter prep: BN fold, channel padding, bf16 cast, shift matrices
# ----------------------------------------------------------------------------
def _fold_conv_bn(p):
    """Fold eval-mode BN into the conv weight/bias (exact at running stats)."""
    scale = p["gamma"] / jnp.sqrt(p["var"] + _EPS)           # (cout,)
    w = p["w"] * scale                                       # (k,k,cin,cout)
    bias = (p["b"] - p["mean"]) * scale + p["beta"]          # (cout,)
    return w, bias


def _pad_bias(b, cp):
    return jnp.zeros((1, cp), jnp.float32).at[0, :b.shape[0]].set(b)


def _pad_conv_taps(w, cp):
    k, _, cin, cout = w.shape
    wp = jnp.zeros((k, k, cp, cp), jnp.float32).at[:, :, :cin, :cout].set(w)
    return wp.reshape(k * k, cp, cp).astype(jnp.bfloat16)


def _make_col_shift_mats(H, W):
    """0/1 matrices P with (P @ a)[h*W+w] = a[h*W + (w -/+ 1)], 0 past edges."""
    HW = H * W
    m = jnp.arange(HW)
    w = m % W
    off = lambda d: (m[:, None] + d) == m[None, :]
    p_m1 = (off(-1) & (w[:, None] != 0)).astype(jnp.bfloat16)        # (h, w-1)
    p_p1 = (off(+1) & (w[:, None] != W - 1)).astype(jnp.bfloat16)    # (h, w+1)
    return p_m1, p_p1


def prepare_params(params, H, W, cp=_CP):
    """Hoisted out of the forward path: fold BN, pad to `cp`, cast to bf16."""
    blocks = []
    for blk in params["blocks"]:
        assert blk["sc"]["w"].shape[0] == 1
        wsc, bsc = _fold_conv_bn(blk["sc"])                  # (1,1,cin,cout)
        cin, cout = wsc.shape[2], wsc.shape[3]
        wsc_p = (jnp.zeros((cp, cp), jnp.float32)
                 .at[:cin, :cout].set(wsc[0, 0]).astype(jnp.bfloat16))
        convs = []
        for cpar in blk["convs"]:
            # TODO(synk): only 3x3 convs supported by the fused block kernel.
            assert cpar["w"].shape[0] == 3 and cpar["w"].shape[1] == 3
            w, b = _fold_conv_bn(cpar)
            convs.append((_pad_conv_taps(w, cp), _pad_bias(b, cp)))
        blocks.append(dict(wsc=wsc_p, bsc=_pad_bias(bsc, cp), convs=convs))

    final_c, num_class = params["lin_w"].shape
    lw = jnp.zeros((cp, cp), jnp.float32).at[:final_c, :num_class].set(
        params["lin_w"])
    lb = jnp.zeros((1, cp), jnp.float32).at[0, :num_class].set(params["lin_b"])
    pm, pp = _make_col_shift_mats(H, W)
    return dict(cp=cp, num_class=num_class, final_c=final_c,
                pm=pm, pp=pp, blocks=blocks, lin_w=lw, lin_b=lb)


# ----------------------------------------------------------------------------
# Forward passes
# ----------------------------------------------------------------------------
def resnet_forward_pallas(x_nhwc, prep):
    N, H, W, cin = x_nhwc.shape
    HW, cp = H * W, prep["cp"]
    y = (jnp.zeros((N, H, W, cp), jnp.bfloat16)
         .at[..., :cin].set(x_nhwc.astype(jnp.bfloat16))
         .reshape(N * HW, cp))
    for blk in prep["blocks"]:
        y = residual_block(y, prep["pm"], prep["pp"], blk, N, H, W, cp)
    logits_p, feat_p = head(y, prep["lin_w"], prep["lin_b"], N, HW, cp)
    return logits_p[:, :prep["num_class"]], feat_p[:, :prep["final_c"]]


def _conv_bn_ref(x, p):
    pad = p["k"] // 2
    y = lax.conv_general_dilated(
        x, p["w"], (1, 1), [(pad, pad), (pad, pad)],
        dimension_numbers=("NHWC", "HWIO", "NHWC"))
    y = y + p["b"]
    return (y - p["mean"]) / jnp.sqrt(p["var"] + _EPS) * p["gamma"] + p["beta"]


def resnet_forward_ref(x_nhwc, params):
    """Independent pure-JAX f32 reference (eval-mode BN, same semantics)."""
    y = x_nhwc
    for blk in params["blocks"]:
        shortcut = _conv_bn_ref(y, blk["sc"])
        z = y
        for j, cpar in enumerate(blk["convs"]):
            z = _conv_bn_ref(z, cpar)
            if j < len(blk["convs"]) - 1:
                z = jnp.maximum(z, 0.0)
        y = jnp.maximum(z + shortcut, 0.0)
    feat = jnp.mean(y, axis=(1, 2))
    logits = feat @ params["lin_w"] + params["lin_b"]
    return logits, feat


def make_conv_bn_params(key, k, cin, cout):
    k1, k2, k3, k4, k5, k6 = jax.random.split(key, 6)
    return dict(
        k=k,
        w=jax.random.normal(k1, (k, k, cin, cout), jnp.float32) * 0.1,   # HWIO
        b=jax.random.normal(k2, (cout,), jnp.float32) * 0.1,
        gamma=jax.random.uniform(k3, (cout,), jnp.float32, 0.5, 1.5),
        beta=jax.random.normal(k4, (cout,), jnp.float32) * 0.1,
        mean=jax.random.normal(k5, (cout,), jnp.float32) * 0.1,
        var=jax.random.uniform(k6, (cout,), jnp.float32, 0.5, 1.5),
    )


# ----------------------------------------------------------------------------
if __name__ == "__main__":
    # Module hyper-parameters (small, consistent with the PyTorch __init__).
    net_layers, cross_layer = 6, 3                 # block_num = 2
    block_num = net_layers // cross_layer
    ks1 = ks2 = ks3 = 3
    feature_channel_num = 8
    num_class = 4
    N, H, W = 2, 16, 16

    key = jax.random.PRNGKey(0)
    keys = iter(jax.random.split(key, 64))

    blocks = []
    for i in range(block_num):
        if i == 0:
            in_size, in_fc, out_fc = 1, feature_channel_num, feature_channel_num
        elif i == 1:
            in_size = feature_channel_num
            in_fc = out_fc = feature_channel_num * 2
        else:
            in_size = feature_channel_num * 2
            in_fc = out_fc = feature_channel_num * 2
        blocks.append(dict(
            sc=make_conv_bn_params(next(keys), 1, in_size, out_fc),
            convs=[
                make_conv_bn_params(next(keys), ks1, in_size, out_fc),
                make_conv_bn_params(next(keys), ks2, in_fc, out_fc),
                make_conv_bn_params(next(keys), ks3, in_fc, out_fc),
            ],
        ))
    final_c = feature_channel_num * 2 if block_num > 1 else feature_channel_num
    params = dict(
        blocks=blocks,
        lin_w=jax.random.normal(next(keys), (final_c, num_class), jnp.float32) * 0.1,
        lin_b=jax.random.normal(next(keys), (num_class,), jnp.float32) * 0.1,
    )

    # Input: PyTorch layout is NCHW (N, 1, H, W); transpose to NHWC internally.
    x_nchw = jax.random.normal(next(keys), (N, 1, H, W), jnp.float32)
    x_nhwc = jnp.transpose(x_nchw, (0, 2, 3, 1))

    # One-time prep (BN fold + padding + bf16) outside the forward path.
    prep = prepare_params(params, H, W)
    fwd = jax.jit(lambda x: resnet_forward_pallas(x, prep))

    logits, feat = fwd(x_nhwc)
    jax.block_until_ready((logits, feat))

    # Cross-check against the pure-JAX f32 reference (bf16 kernel -> loose tol).
    logits_ref, feat_ref = resnet_forward_ref(x_nhwc, params)
    assert logits.shape == (N, num_class) and feat.shape == (N, final_c)
    assert jnp.allclose(logits, logits_ref, atol=5e-2, rtol=5e-2), \
        float(jnp.max(jnp.abs(logits - logits_ref)))
    assert jnp.allclose(feat, feat_ref, atol=5e-2, rtol=5e-2), \
        float(jnp.max(jnp.abs(feat - feat_ref)))

    print("KERNEL_OK")
</pallas_src>

<mosaic_0001>
module attributes {stable_mosaic.version = 11 : i64} {
  func.func @_head_kernel(%arg0: i32, %arg1: memref<2x256x128xbf16, #tpu.memory_space<vmem>>, %arg2: memref<128x128xf32, #tpu.memory_space<vmem>>, %arg3: memref<1x128xf32, #tpu.memory_space<vmem>>, %arg4: memref<2x128xf32, #tpu.memory_space<vmem>>, %arg5: memref<2x128xf32, #tpu.memory_space<vmem>>) attributes {dimension_semantics = [#tpu.dimension_semantics<arbitrary>], iteration_bounds = array<i64: 1>, scalar_prefetch = 0 : i64, scratch_operands = 0 : i64, tpu.core_type = #tpu.core_type<tc>, window_params = [{pipeline_mode = #tpu.pipeline_mode<synchronous>, transform_indices = @transform_0, window_bounds = array<i64: 2, 256, 128>}, {pipeline_mode = #tpu.pipeline_mode<synchronous>, transform_indices = @transform_1, window_bounds = array<i64: 128, 128>}, {pipeline_mode = #tpu.pipeline_mode<synchronous>, transform_indices = @transform_2, window_bounds = array<i64: 1, 128>}, {pipeline_mode = #tpu.pipeline_mode<synchronous>, transform_indices = @transform_3, window_bounds = array<i64: 2, 128>}, {pipeline_mode = #tpu.pipeline_mode<synchronous>, transform_indices = @transform_4, window_bounds = array<i64: 2, 128>}]} {
    %c0 = arith.constant 0 : index
    %c0_0 = arith.constant 0 : index
    %c0_1 = arith.constant 0 : index
    %0 = vector.load %arg1[%c0, %c0_0, %c0_1] : memref<2x256x128xbf16, #tpu.memory_space<vmem>>, vector<2x256x128xbf16>
    %1 = arith.extf %0 : vector<2x256x128xbf16> to vector<2x256x128xf32>
    %cst = arith.constant dense<0.000000e+00> : vector<2x128xf32>
    %2 = vector.multi_reduction <add>, %1, %cst [1] : vector<2x256x128xf32> to vector<2x128xf32>
    %cst_2 = arith.constant 3.906250e-03 : f32
    %3 = vector.broadcast %cst_2 : f32 to vector<2x128xf32>
    %4 = arith.mulf %2, %3 : vector<2x128xf32>
    %c0_3 = arith.constant 0 : index
    %c0_4 = arith.constant 0 : index
    %5 = vector.load %arg5[%c0_3, %c0_4] : memref<2x128xf32, #tpu.memory_space<vmem>>, vector<2x128xf32>
    tpu.vector_store %arg5[%c0_3, %c0_4], %4 {strides = array<i32>} : memref<2x128xf32, #tpu.memory_space<vmem>>, vector<2x128xf32>,
    %c0_5 = arith.constant 0 : index
    %c0_6 = arith.constant 0 : index
    %6 = vector.load %arg2[%c0_5, %c0_6] : memref<128x128xf32, #tpu.memory_space<vmem>>, vector<128x128xf32>
    %cst_7 = arith.constant dense<0.000000e+00> : vector<2x128xf32>
    %7 = tpu.matmul %4, %6, %cst_7 {dimension_numbers = #tpu.dot_dimension_numbers<[1], [0], [0], [1], [0, 0, 1, 1], [], []>} : vector<2x128xf32>, vector<128x128xf32>, vector<2x128xf32> -> vector<2x128xf32>
    %c0_8 = arith.constant 0 : index
    %c0_9 = arith.constant 0 : index
    %8 = vector.load %arg3[%c0_8, %c0_9] : memref<1x128xf32, #tpu.memory_space<vmem>>, vector<1x128xf32>
    %9 = vector.broadcast %8 : vector<1x128xf32> to vector<2x128xf32>
    %10 = arith.addf %7, %9 : vector<2x128xf32>
    %c0_10 = arith.constant 0 : index
    %c0_11 = arith.constant 0 : index
    %11 = vector.load %arg4[%c0_10, %c0_11] : memref<2x128xf32, #tpu.memory_space<vmem>>, vector<2x128xf32>
    tpu.vector_store %arg4[%c0_10, %c0_11], %10 {strides = array<i32>} : memref<2x128xf32, #tpu.memory_space<vmem>>, vector<2x128xf32>,
    return
  }
  func.func @transform_0(%arg0: i32) -> (i32, i32, i32) {
    %c0_i32 = arith.constant 0 : i32
    %c0_i32_0 = arith.constant 0 : i32
    %c0_i32_1 = arith.constant 0 : i32
    %c0_i32_2 = arith.constant 0 : i32
    return %c0_i32, %c0_i32_0, %c0_i32_1 : i32, i32, i32
  }
  func.func @transform_1(%arg0: i32) -> (i32, i32) {
    %c0_i32 = arith.constant 0 : i32
    %c0_i32_0 = arith.constant 0 : i32
    %c0_i32_1 = arith.constant 0 : i32
    return %c0_i32, %c0_i32_0 : i32, i32
  }
  func.func @transform_2(%arg0: i32) -> (i32, i32) {
    %c0_i32 = arith.constant 0 : i32
    %c0_i32_0 = arith.constant 0 : i32
    %c0_i32_1 = arith.constant 0 : i32
    return %c0_i32, %c0_i32_0 : i32, i32
  }
  func.func @transform_3(%arg0: i32) -> (i32, i32) {
    %c0_i32 = arith.constant 0 : i32
    %c0_i32_0 = arith.constant 0 : i32
    %c0_i32_1 = arith.constant 0 : i32
    return %c0_i32, %c0_i32_0 : i32, i32
  }
  func.func @transform_4(%arg0: i32) -> (i32, i32) {
    %c0_i32 = arith.constant 0 : i32
    %c0_i32_0 = arith.constant 0 : i32
    %c0_i32_1 = arith.constant 0 : i32
    return %c0_i32, %c0_i32_0 : i32, i32
  }
}

module attributes {stable_mosaic.version = 11 : i64} {
  func.func @kernel(%arg0: i32, %arg1: memref<256x128xbf16, #tpu.memory_space<vmem>>, %arg2: memref<256x256xbf16, #tpu.memory_space<vmem>>, %arg3: memref<256x256xbf16, #tpu.memory_space<vmem>>, %arg4: memref<128x128xbf16, #tpu.memory_space<vmem>>, %arg5: memref<1x128xf32, #tpu.memory_space<vmem>>, %arg6: memref<9x128x128xbf16, #tpu.memory_space<vmem>>, %arg7: memref<1x128xf32, #tpu.memory_space<vmem>>, %arg8: memref<9x128x128xbf16, #tpu.memory_space<vmem>>, %arg9: memref<1x128xf32, #tpu.memory_space<vmem>>, %arg10: memref<9x128x128xbf16, #tpu.memory_space<vmem>>, %arg11: memref<1x128xf32, #tpu.memory_space<vmem>>, %arg12: memref<256x128xbf16, #tpu.memory_space<vmem>>, %arg13: memref<288x128xbf16, #tpu.memory_space<vmem>>, %arg14: memref<288x128xbf16, #tpu.memory_space<vmem>>, %arg15: memref<288x128xbf16, #tpu.memory_space<vmem>>, %arg16: memref<256x128xf32, #tpu.memory_space<vmem>>) attributes {dimension_semantics = [#tpu.dimension_semantics<parallel>], iteration_bounds = array<i64: 2>, scalar_prefetch = 0 : i64, scratch_operands = 4 : i64, tpu.core_type = #tpu.core_type<tc>, window_params = [{transform_indices = @transform_0, window_bounds = array<i64: 256, 128>}, {pipeline_mode = #tpu.pipeline_mode<synchronous>, transform_indices = @transform_1, window_bounds = array<i64: 256, 256>}, {pipeline_mode = #tpu.pipeline_mode<synchronous>, transform_indices = @transform_2, window_bounds = array<i64: 256, 256>}, {pipeline_mode = #tpu.pipeline_mode<synchronous>, transform_indices = @transform_3, window_bounds = array<i64: 128, 128>}, {pipeline_mode = #tpu.pipeline_mode<synchronous>, transform_indices = @transform_4, window_bounds = array<i64: 1, 128>}, {pipeline_mode = #tpu.pipeline_mode<synchronous>, transform_indices = @transform_5, window_bounds = array<i64: 9, 128, 128>}, {pipeline_mode = #tpu.pipeline_mode<synchronous>, transform_indices = @transform_6, window_bounds = array<i64: 1, 128>}, {pipeline_mode = #tpu.pipeline_mode<synchronous>, transform_indices = @transform_7, window_bounds = array<i64: 9, 128, 128>}, {pipeline_mode = #tpu.pipeline_mode<synchronous>, transform_indices = @transform_8, window_bounds = array<i64: 1, 128>}, {pipeline_mode = #tpu.pipeline_mode<synchronous>, transform_indices = @transform_9, window_bounds = array<i64: 9, 128, 128>}, {pipeline_mode = #tpu.pipeline_mode<synchronous>, transform_indices = @transform_10, window_bounds = array<i64: 1, 128>}, {transform_indices = @transform_11, window_bounds = array<i64: 256, 128>}]} {
    %cst = arith.constant 0.000000e+00 : bf16
    %0 = vector.broadcast %cst : bf16 to vector<16x128xbf16>
    %c0 = arith.constant 0 : index
    %c0_0 = arith.constant 0 : index
    %1 = vector.load %arg13[%c0, %c0_0] : memref<288x128xbf16, #tpu.memory_space<vmem>>, vector<16x128xbf16>
    tpu.vector_store %arg13[%c0, %c0_0], %0 {strides = array<i32>} : memref<288x128xbf16, #tpu.memory_space<vmem>>, vector<16x128xbf16>,
    %c272 = arith.constant 272 : index
    %c0_1 = arith.constant 0 : index
    %2 = vector.load %arg13[%c272, %c0_1] : memref<288x128xbf16, #tpu.memory_space<vmem>>, vector<16x128xbf16>
    tpu.vector_store %arg13[%c272, %c0_1], %0 {strides = array<i32>} : memref<288x128xbf16, #tpu.memory_space<vmem>>, vector<16x128xbf16>,
    %c0_2 = arith.constant 0 : index
    %c0_3 = arith.constant 0 : index
    %3 = vector.load %arg14[%c0_2, %c0_3] : memref<288x128xbf16, #tpu.memory_space<vmem>>, vector<16x128xbf16>
    tpu.vector_store %arg14[%c0_2, %c0_3], %0 {strides = array<i32>} : memref<288x128xbf16, #tpu.memory_space<vmem>>, vector<16x128xbf16>,
    %c272_4 = arith.constant 272 : index
    %c0_5 = arith.constant 0 : index
    %4 = vector.load %arg14[%c272_4, %c0_5] : memref<288x128xbf16, #tpu.memory_space<vmem>>, vector<16x128xbf16>
    tpu.vector_store %arg14[%c272_4, %c0_5], %0 {strides = array<i32>} : memref<288x128xbf16, #tpu.memory_space<vmem>>, vector<16x128xbf16>,
    %c0_6 = arith.constant 0 : index
    %c0_7 = arith.constant 0 : index
    %5 = vector.load %arg15[%c0_6, %c0_7] : memref<288x128xbf16, #tpu.memory_space<vmem>>, vector<16x128xbf16>
    tpu.vector_store %arg15[%c0_6, %c0_7], %0 {strides = array<i32>} : memref<288x128xbf16, #tpu.memory_space<vmem>>, vector<16x128xbf16>,
    %c272_8 = arith.constant 272 : index
    %c0_9 = arith.constant 0 : index
    %6 = vector.load %arg15[%c272_8, %c0_9] : memref<288x128xbf16, #tpu.memory_space<vmem>>, vector<16x128xbf16>
    tpu.vector_store %arg15[%c272_8, %c0_9], %0 {strides = array<i32>} : memref<288x128xbf16, #tpu.memory_space<vmem>>, vector<16x128xbf16>,
    %c0_10 = arith.constant 0 : index
    %c0_11 = arith.constant 0 : index
    %7 = vector.load %arg1[%c0_10, %c0_11] : memref<256x128xbf16, #tpu.memory_space<vmem>>, vector<256x128xbf16>
    %c0_12 = arith.constant 0 : index
    %c0_13 = arith.constant 0 : index
    %8 = vector.load %arg4[%c0_12, %c0_13] : memref<128x128xbf16, #tpu.memory_space<vmem>>, vector<128x128xbf16>
    %cst_14 = arith.constant dense<0.000000e+00> : vector<256x128xf32>
    %9 = tpu.matmul %7, %8, %cst_14 {dimension_numbers = #tpu.dot_dimension_numbers<[1], [0], [0], [1], [0, 0, 1, 1], [], []>} : vector<256x128xbf16>, vector<128x128xbf16>, vector<256x128xf32> -> vector<256x128xf32>
    %c0_15 = arith.constant 0 : index
    %c0_16 = arith.constant 0 : index
    %10 = vector.load %arg5[%c0_15, %c0_16] : memref<1x128xf32, #tpu.memory_space<vmem>>, vector<1x128xf32>
    %11 = vector.broadcast %10 : vector<1x128xf32> to vector<256x128xf32>
    %12 = arith.addf %9, %11 : vector<256x128xf32>
    %c0_17 = arith.constant 0 : index
    %c0_18 = arith.constant 0 : index
    %13 = vector.load %arg16[%c0_17, %c0_18] : memref<256x128xf32, #tpu.memory_space<vmem>>, vector<256x128xf32>
    tpu.vector_store %arg16[%c0_17, %c0_18], %12 {strides = array<i32>} : memref<256x128xf32, #tpu.memory_space<vmem>>, vector<256x128xf32>,
    %c0_19 = arith.constant 0 : index
    %c0_20 = arith.constant 0 : index
    %14 = vector.load %arg2[%c0_19, %c0_20] : memref<256x256xbf16, #tpu.memory_space<vmem>>, vector<256x256xbf16>
    %cst_21 = arith.constant dense<0.000000e+00> : vector<256x128xf32>
    %15 = tpu.matmul %14, %7, %cst_21 {dimension_numbers = #tpu.dot_dimension_numbers<[1], [0], [0], [1], [0, 0, 1, 1], [], []>} : vector<256x256xbf16>, vector<256x128xbf16>, vector<256x128xf32> -> vector<256x128xf32>
    %16 = arith.truncf %15 : vector<256x128xf32> to vector<256x128xbf16>
    %c0_22 = arith.constant 0 : index
    %c0_23 = arith.constant 0 : index
    %17 = vector.load %arg3[%c0_22, %c0_23] : memref<256x256xbf16, #tpu.memory_space<vmem>>, vector<256x256xbf16>
    %cst_24 = arith.constant dense<0.000000e+00> : vector<256x128xf32>
    %18 = tpu.matmul %17, %7, %cst_24 {dimension_numbers = #tpu.dot_dimension_numbers<[1], [0], [0], [1], [0, 0, 1, 1], [], []>} : vector<256x256xbf16>, vector<256x128xbf16>, vector<256x128xf32> -> vector<256x128xf32>
    %19 = arith.truncf %18 : vector<256x128xf32> to vector<256x128xbf16>
    %c16 = arith.constant 16 : index
    %c0_25 = arith.constant 0 : index
    %20 = vector.load %arg13[%c16, %c0_25] : memref<288x128xbf16, #tpu.memory_space<vmem>>, vector<256x128xbf16>
    tpu.vector_store %arg13[%c16, %c0_25], %16 {strides = array<i32>} : memref<288x128xbf16, #tpu.memory_space<vmem>>, vector<256x128xbf16>,
    %c16_26 = arith.constant 16 : index
    %c0_27 = arith.constant 0 : index
    %21 = vector.load %arg14[%c16_26, %c0_27] : memref<288x128xbf16, #tpu.memory_space<vmem>>, vector<256x128xbf16>
    tpu.vector_store %arg14[%c16_26, %c0_27], %7 {strides = array<i32>} : memref<288x128xbf16, #tpu.memory_space<vmem>>, vector<256x128xbf16>,
    %c16_28 = arith.constant 16 : index
    %c0_29 = arith.constant 0 : index
    %22 = vector.load %arg15[%c16_28, %c0_29] : memref<288x128xbf16, #tpu.memory_space<vmem>>, vector<256x128xbf16>
    tpu.vector_store %arg15[%c16_28, %c0_29], %19 {strides = array<i32>} : memref<288x128xbf16, #tpu.memory_space<vmem>>, vector<256x128xbf16>,
    %c0_30 = arith.constant 0 : index
    %c0_31 = arith.constant 0 : index
    %23 = vector.load %arg7[%c0_30, %c0_31] : memref<1x128xf32, #tpu.memory_space<vmem>>, vector<1x128xf32>
    %cst_32 = arith.constant 0.000000e+00 : f32
    %24 = vector.broadcast %cst_32 : f32 to vector<256x128xf32>
    %25 = vector.broadcast %23 : vector<1x128xf32> to vector<256x128xf32>
    %26 = arith.addf %25, %24 : vector<256x128xf32>
    %c0_33 = arith.constant 0 : index
    %c0_34 = arith.constant 0 : index
    %27 = vector.load %arg13[%c0_33, %c0_34] : memref<288x128xbf16, #tpu.memory_space<vmem>>, vector<256x128xbf16>
    %c0_35 = arith.constant 0 : index
    %c0_36 = arith.constant 0 : index
    %c0_37 = arith.constant 0 : index
    %28 = vector.load %arg6[%c0_35, %c0_36, %c0_37] : memref<9x128x128xbf16, #tpu.memory_space<vmem>>, vector<1x128x128xbf16>
    %29 = vector.shape_cast %28 : vector<1x128x128xbf16> to vector<128x128xbf16>
    %cst_38 = arith.constant dense<0.000000e+00> : vector<256x128xf32>
    %30 = tpu.matmul %27, %29, %cst_38 {dimension_numbers = #tpu.dot_dimension_numbers<[1], [0], [0], [1], [0, 0, 1, 1], [], []>} : vector<256x128xbf16>, vector<128x128xbf16>, vector<256x128xf32> -> vector<256x128xf32>
    %31 = arith.addf %26, %30 : vector<256x128xf32>
    %c0_39 = arith.constant 0 : index
    %c0_40 = arith.constant 0 : index
    %32 = vector.load %arg14[%c0_39, %c0_40] : memref<288x128xbf16, #tpu.memory_space<vmem>>, vector<256x128xbf16>
    %c1 = arith.constant 1 : index
    %c0_41 = arith.constant 0 : index
    %c0_42 = arith.constant 0 : index
    %33 = vector.load %arg6[%c1, %c0_41, %c0_42] : memref<9x128x128xbf16, #tpu.memory_space<vmem>>, vector<1x128x128xbf16>
    %34 = vector.shape_cast %33 : vector<1x128x128xbf16> to vector<128x128xbf16>
    %cst_43 = arith.constant dense<0.000000e+00> : vector<256x128xf32>
    %35 = tpu.matmul %32, %34, %cst_43 {dimension_numbers = #tpu.dot_dimension_numbers<[1], [0], [0], [1], [0, 0, 1, 1], [], []>} : vector<256x128xbf16>, vector<128x128xbf16>, vector<256x128xf32> -> vector<256x128xf32>
    %36 = arith.addf %31, %35 : vector<256x128xf32>
    %c0_44 = arith.constant 0 : index
    %c0_45 = arith.constant 0 : index
    %37 = vector.load %arg15[%c0_44, %c0_45] : memref<288x128xbf16, #tpu.memory_space<vmem>>, vector<256x128xbf16>
    %c2 = arith.constant 2 : index
    %c0_46 = arith.constant 0 : index
    %c0_47 = arith.constant 0 : index
    %38 = vector.load %arg6[%c2, %c0_46, %c0_47] : memref<9x128x128xbf16, #tpu.memory_space<vmem>>, vector<1x128x128xbf16>
    %39 = vector.shape_cast %38 : vector<1x128x128xbf16> to vector<128x128xbf16>
    %cst_48 = arith.constant dense<0.000000e+00> : vector<256x128xf32>
    %40 = tpu.matmul %37, %39, %cst_48 {dimension_numbers = #tpu.dot_dimension_numbers<[1], [0], [0], [1], [0, 0, 1, 1], [], []>} : vector<256x128xbf16>, vector<128x128xbf16>, vector<256x128xf32> -> vector<256x128xf32>
    %41 = arith.addf %36, %40 : vector<256x128xf32>
    %c16_49 = arith.constant 16 : index
    %c0_50 = arith.constant 0 : index
    %42 = vector.load %arg13[%c16_49, %c0_50] : memref<288x128xbf16, #tpu.memory_space<vmem>>, vector<256x128xbf16>
    %c3 = arith.constant 3 : index
    %c0_51 = arith.constant 0 : index
    %c0_52 = arith.constant 0 : index
    %43 = vector.load %arg6[%c3, %c0_51, %c0_52] : memref<9x128x128xbf16, #tpu.memory_space<vmem>>, vector<1x128x128xbf16>
    %44 = vector.shape_cast %43 : vector<1x128x128xbf16> to vector<128x128xbf16>
    %cst_53 = arith.constant dense<0.000000e+00> : vector<256x128xf32>
    %45 = tpu.matmul %42, %44, %cst_53 {dimension_numbers = #tpu.dot_dimension_numbers<[1], [0], [0], [1], [0, 0, 1, 1], [], []>} : vector<256x128xbf16>, vector<128x128xbf16>, vector<256x128xf32> -> vector<256x128xf32>
    %46 = arith.addf %41, %45 : vector<256x128xf32>
    %c16_54 = arith.constant 16 : index
    %c0_55 = arith.constant 0 : index
    %47 = vector.load %arg14[%c16_54, %c0_55] : memref<288x128xbf16, #tpu.memory_space<vmem>>, vector<256x128xbf16>
    %c4 = arith.constant 4 : index
    %c0_56 = arith.constant 0 : index
    %c0_57 = arith.constant 0 : index
    %48 = vector.load %arg6[%c4, %c0_56, %c0_57] : memref<9x128x128xbf16, #tpu.memory_space<vmem>>, vector<1x128x128xbf16>
    %49 = vector.shape_cast %48 : vector<1x128x128xbf16> to vector<128x128xbf16>
    %cst_58 = arith.constant dense<0.000000e+00> : vector<256x128xf32>
    %50 = tpu.matmul %47, %49, %cst_58 {dimension_numbers = #tpu.dot_dimension_numbers<[1], [0], [0], [1], [0, 0, 1, 1], [], []>} : vector<256x128xbf16>, vector<128x128xbf16>, vector<256x128xf32> -> vector<256x128xf32>
    %51 = arith.addf %46, %50 : vector<256x128xf32>
    %c16_59 = arith.constant 16 : index
    %c0_60 = arith.constant 0 : index
    %52 = vector.load %arg15[%c16_59, %c0_60] : memref<288x128xbf16, #tpu.memory_space<vmem>>, vector<256x128xbf16>
    %c5 = arith.constant 5 : index
    %c0_61 = arith.constant 0 : index
    %c0_62 = arith.constant 0 : index
    %53 = vector.load %arg6[%c5, %c0_61, %c0_62] : memref<9x128x128xbf16, #tpu.memory_space<vmem>>, vector<1x128x128xbf16>
    %54 = vector.shape_cast %53 : vector<1x128x128xbf16> to vector<128x128xbf16>
    %cst_63 = arith.constant dense<0.000000e+00> : vector<256x128xf32>
    %55 = tpu.matmul %52, %54, %cst_63 {dimension_numbers = #tpu.dot_dimension_numbers<[1], [0], [0], [1], [0, 0, 1, 1], [], []>} : vector<256x128xbf16>, vector<128x128xbf16>, vector<256x128xf32> -> vector<256x128xf32>
    %56 = arith.addf %51, %55 : vector<256x128xf32>
    %c32 = arith.constant 32 : index
    %c0_64 = arith.constant 0 : index
    %57 = vector.load %arg13[%c32, %c0_64] : memref<288x128xbf16, #tpu.memory_space<vmem>>, vector<256x128xbf16>
    %c6 = arith.constant 6 : index
    %c0_65 = arith.constant 0 : index
    %c0_66 = arith.constant 0 : index
    %58 = vector.load %arg6[%c6, %c0_65, %c0_66] : memref<9x128x128xbf16, #tpu.memory_space<vmem>>, vector<1x128x128xbf16>
    %59 = vector.shape_cast %58 : vector<1x128x128xbf16> to vector<128x128xbf16>
    %cst_67 = arith.constant dense<0.000000e+00> : vector<256x128xf32>
    %60 = tpu.matmul %57, %59, %cst_67 {dimension_numbers = #tpu.dot_dimension_numbers<[1], [0], [0], [1], [0, 0, 1, 1], [], []>} : vector<256x128xbf16>, vector<128x128xbf16>, vector<256x128xf32> -> vector<256x128xf32>
    %61 = arith.addf %56, %60 : vector<256x128xf32>
    %c32_68 = arith.constant 32 : index
    %c0_69 = arith.constant 0 : index
    %62 = vector.load %arg14[%c32_68, %c0_69] : memref<288x128xbf16, #tpu.memory_space<vmem>>, vector<256x128xbf16>
    %c7 = arith.constant 7 : index
    %c0_70 = arith.constant 0 : index
    %c0_71 = arith.constant 0 : index
    %63 = vector.load %arg6[%c7, %c0_70, %c0_71] : memref<9x128x128xbf16, #tpu.memory_space<vmem>>, vector<1x128x128xbf16>
    %64 = vector.shape_cast %63 : vector<1x128x128xbf16> to vector<128x128xbf16>
    %cst_72 = arith.constant dense<0.000000e+00> : vector<256x128xf32>
    %65 = tpu.matmul %62, %64, %cst_72 {dimension_numbers = #tpu.dot_dimension_numbers<[1], [0], [0], [1], [0, 0, 1, 1], [], []>} : vector<256x128xbf16>, vector<128x128xbf16>, vector<256x128xf32> -> vector<256x128xf32>
    %66 = arith.addf %61, %65 : vector<256x128xf32>
    %c32_73 = arith.constant 32 : index
    %c0_74 = arith.constant 0 : index
    %67 = vector.load %arg15[%c32_73, %c0_74] : memref<288x128xbf16, #tpu.memory_space<vmem>>, vector<256x128xbf16>
    %c8 = arith.constant 8 : index
    %c0_75 = arith.constant 0 : index
    %c0_76 = arith.constant 0 : index
    %68 = vector.load %arg6[%c8, %c0_75, %c0_76] : memref<9x128x128xbf16, #tpu.memory_space<vmem>>, vector<1x128x128xbf16>
    %69 = vector.shape_cast %68 : vector<1x128x128xbf16> to vector<128x128xbf16>
    %cst_77 = arith.constant dense<0.000000e+00> : vector<256x128xf32>
    %70 = tpu.matmul %67, %69, %cst_77 {dimension_numbers = #tpu.dot_dimension_numbers<[1], [0], [0], [1], [0, 0, 1, 1], [], []>} : vector<256x128xbf16>, vector<128x128xbf16>, vector<256x128xf32> -> vector<256x128xf32>
    %71 = arith.addf %66, %70 : vector<256x128xf32>
    %cst_78 = arith.constant 0.000000e+00 : f32
    %72 = vector.broadcast %cst_78 : f32 to vector<256x128xf32>
    %73 = arith.maximumf %71, %72 : vector<256x128xf32>
    %74 = arith.truncf %73 : vector<256x128xf32> to vector<256x128xbf16>
    %c0_79 = arith.constant 0 : index
    %c0_80 = arith.constant 0 : index
    %75 = vector.load %arg2[%c0_79, %c0_80] : memref<256x256xbf16, #tpu.memory_space<vmem>>, vector<256x256xbf16>
    %cst_81 = arith.constant dense<0.000000e+00> : vector<256x128xf32>
    %76 = tpu.matmul %75, %74, %cst_81 {dimension_numbers = #tpu.dot_dimension_numbers<[1], [0], [0], [1], [0, 0, 1, 1], [], []>} : vector<256x256xbf16>, vector<256x128xbf16>, vector<256x128xf32> -> vector<256x128xf32>
    %77 = arith.truncf %76 : vector<256x128xf32> to vector<256x128xbf16>
    %c0_82 = arith.constant 0 : index
    %c0_83 = arith.constant 0 : index
    %78 = vector.load %arg3[%c0_82, %c0_83] : memref<256x256xbf16, #tpu.memory_space<vmem>>, vector<256x256xbf16>
    %cst_84 = arith.constant dense<0.000000e+00> : vector<256x128xf32>
    %79 = tpu.matmul %78, %74, %cst_84 {dimension_numbers = #tpu.dot_dimension_numbers<[1], [0], [0], [1], [0, 0, 1, 1], [], []>} : vector<256x256xbf16>, vector<256x128xbf16>, vector<256x128xf32> -> vector<256x128xf32>
    %80 = arith.truncf %79 : vector<256x128xf32> to vector<256x128xbf16>
    %c16_85 = arith.constant 16 : index
    %c0_86 = arith.constant 0 : index
    %81 = vector.load %arg13[%c16_85, %c0_86] : memref<288x128xbf16, #tpu.memory_space<vmem>>, vector<256x128xbf16>
    tpu.vector_store %arg13[%c16_85, %c0_86], %77 {strides = array<i32>} : memref<288x128xbf16, #tpu.memory_space<vmem>>, vector<256x128xbf16>,
    %c16_87 = arith.constant 16 : index
    %c0_88 = arith.constant 0 : index
    %82 = vector.load %arg14[%c16_87, %c0_88] : memref<288x128xbf16, #tpu.memory_space<vmem>>, vector<256x128xbf16>
    tpu.vector_store %arg14[%c16_87, %c0_88], %74 {strides = array<i32>} : memref<288x128xbf16, #tpu.memory_space<vmem>>, vector<256x128xbf16>,
    %c16_89 = arith.constant 16 : index
    %c0_90 = arith.constant 0 : index
    %83 = vector.load %arg15[%c16_89, %c0_90] : memref<288x128xbf16, #tpu.memory_space<vmem>>, vector<256x128xbf16>
    tpu.vector_store %arg15[%c16_89, %c0_90], %80 {strides = array<i32>} : memref<288x128xbf16, #tpu.memory_space<vmem>>, vector<256x128xbf16>,
    %c0_91 = arith.constant 0 : index
    %c0_92 = arith.constant 0 : index
    %84 = vector.load %arg9[%c0_91, %c0_92] : memref<1x128xf32, #tpu.memory_space<vmem>>, vector<1x128xf32>
    %cst_93 = arith.constant 0.000000e+00 : f32
    %85 = vector.broadcast %cst_93 : f32 to vector<256x128xf32>
    %86 = vector.broadcast %84 : vector<1x128xf32> to vector<256x128xf32>
    %87 = arith.addf %86, %85 : vector<256x128xf32>
    %c0_94 = arith.constant 0 : index
    %c0_95 = arith.constant 0 : index
    %88 = vector.load %arg13[%c0_94, %c0_95] : memref<288x128xbf16, #tpu.memory_space<vmem>>, vector<256x128xbf16>
    %c0_96 = arith.constant 0 : index
    %c0_97 = arith.constant 0 : index
    %c0_98 = arith.constant 0 : index
    %89 = vector.load %arg8[%c0_96, %c0_97, %c0_98] : memref<9x128x128xbf16, #tpu.memory_space<vmem>>, vector<1x128x128xbf16>
    %90 = vector.shape_cast %89 : vector<1x128x128xbf16> to vector<128x128xbf16>
    %cst_99 = arith.constant dense<0.000000e+00> : vector<256x128xf32>
    %91 = tpu.matmul %88, %90, %cst_99 {dimension_numbers = #tpu.dot_dimension_numbers<[1], [0], [0], [1], [0, 0, 1, 1], [], []>} : vector<256x128xbf16>, vector<128x128xbf16>, vector<256x128xf32> -> vector<256x128xf32>
    %92 = arith.addf %87, %91 : vector<256x128xf32>
    %c0_100 = arith.constant 0 : index
    %c0_101 = arith.constant 0 : index
    %93 = vector.load %arg14[%c0_100, %c0_101] : memref<288x128xbf16, #tpu.memory_space<vmem>>, vector<256x128xbf16>
    %c1_102 = arith.constant 1 : index
    %c0_103 = arith.constant 0 : index
    %c0_104 = arith.constant 0 : index
    %94 = vector.load %arg8[%c1_102, %c0_103, %c0_104] : memref<9x128x128xbf16, #tpu.memory_space<vmem>>, vector<1x128x128xbf16>
    %95 = vector.shape_cast %94 : vector<1x128x128xbf16> to vector<128x128xbf16>
    %cst_105 = arith.constant dense<0.000000e+00> : vector<256x128xf32>
    %96 = tpu.matmul %93, %95, %cst_105 {dimension_numbers = #tpu.dot_dimension_numbers<[1], [0], [0], [1], [0, 0, 1, 1], [], []>} : vector<256x128xbf16>, vector<128x128xbf16>, vector<256x128xf32> -> vector<256x128xf32>
    %97 = arith.addf %92, %96 : vector<256x128xf32>
    %c0_106 = arith.constant 0 : index
    %c0_107 = arith.constant 0 : index
    %98 = vector.load %arg15[%c0_106, %c0_107] : memref<288x128xbf16, #tpu.memory_space<vmem>>, vector<256x128xbf16>
    %c2_108 = arith.constant 2 : index
    %c0_109 = arith.constant 0 : index
    %c0_110 = arith.constant 0 : index
    %99 = vector.load %arg8[%c2_108, %c0_109, %c0_110] : memref<9x128x128xbf16, #tpu.memory_space<vmem>>, vector<1x128x128xbf16>
    %100 = vector.shape_cast %99 : vector<1x128x128xbf16> to vector<128x128xbf16>
    %cst_111 = arith.constant dense<0.000000e+00> : vector<256x128xf32>
    %101 = tpu.matmul %98, %100, %cst_111 {dimension_numbers = #tpu.dot_dimension_numbers<[1], [0], [0], [1], [0, 0, 1, 1], [], []>} : vector<256x128xbf16>, vector<128x128xbf16>, vector<256x128xf32> -> vector<256x128xf32>
    %102 = arith.addf %97, %101 : vector<256x128xf32>
    %c16_112 = arith.constant 16 : index
    %c0_113 = arith.constant 0 : index
    %103 = vector.load %arg13[%c16_112, %c0_113] : memref<288x128xbf16, #tpu.memory_space<vmem>>, vector<256x128xbf16>
    %c3_114 = arith.constant 3 : index
    %c0_115 = arith.constant 0 : index
    %c0_116 = arith.constant 0 : index
    %104 = vector.load %arg8[%c3_114, %c0_115, %c0_116] : memref<9x128x128xbf16, #tpu.memory_space<vmem>>, vector<1x128x128xbf16>
    %105 = vector.shape_cast %104 : vector<1x128x128xbf16> to vector<128x128xbf16>
    %cst_117 = arith.constant dense<0.000000e+00> : vector<256x128xf32>
    %106 = tpu.matmul %103, %105, %cst_117 {dimension_numbers = #tpu.dot_dimension_numbers<[1], [0], [0], [1], [0, 0, 1, 1], [], []>} : vector<256x128xbf16>, vector<128x128xbf16>, vector<256x128xf32> -> vector<256x128xf32>
    %107 = arith.addf %102, %106 : vector<256x128xf32>
    %c16_118 = arith.constant 16 : index
    %c0_119 = arith.constant 0 : index
    %108 = vector.load %arg14[%c16_118, %c0_119] : memref<288x128xbf16, #tpu.memory_space<vmem>>, vector<256x128xbf16>
    %c4_120 = arith.constant 4 : index
    %c0_121 = arith.constant 0 : index
    %c0_122 = arith.constant 0 : index
    %109 = vector.load %arg8[%c4_120, %c0_121, %c0_122] : memref<9x128x128xbf16, #tpu.memory_space<vmem>>, vector<1x128x128xbf16>
    %110 = vector.shape_cast %109 : vector<1x128x128xbf16> to vector<128x128xbf16>
    %cst_123 = arith.constant dense<0.000000e+00> : vector<256x128xf32>
    %111 = tpu.matmul %108, %110, %cst_123 {dimension_numbers = #tpu.dot_dimension_numbers<[1], [0], [0], [1], [0, 0, 1, 1], [], []>} : vector<256x128xbf16>, vector<128x128xbf16>, vector<256x128xf32> -> vector<256x128xf32>
    %112 = arith.addf %107, %111 : vector<256x128xf32>
    %c16_124 = arith.constant 16 : index
    %c0_125 = arith.constant 0 : index
    %113 = vector.load %arg15[%c16_124, %c0_125] : memref<288x128xbf16, #tpu.memory_space<vmem>>, vector<256x128xbf16>
    %c5_126 = arith.constant 5 : index
    %c0_127 = arith.constant 0 : index
    %c0_128 = arith.constant 0 : index
    %114 = vector.load %arg8[%c5_126, %c0_127, %c0_128] : memref<9x128x128xbf16, #tpu.memory_space<vmem>>, vector<1x128x128xbf16>
    %115 = vector.shape_cast %114 : vector<1x128x128xbf16> to vector<128x128xbf16>
    %cst_129 = arith.constant dense<0.000000e+00> : vector<256x128xf32>
    %116 = tpu.matmul %113, %115, %cst_129 {dimension_numbers = #tpu.dot_dimension_numbers<[1], [0], [0], [1], [0, 0, 1, 1], [], []>} : vector<256x128xbf16>, vector<128x128xbf16>, vector<256x128xf32> -> vector<256x128xf32>
    %117 = arith.addf %112, %116 : vector<256x128xf32>
    %c32_130 = arith.constant 32 : index
    %c0_131 = arith.constant 0 : index
    %118 = vector.load %arg13[%c32_130, %c0_131] : memref<288x128xbf16, #tpu.memory_space<vmem>>, vector<256x128xbf16>
    %c6_132 = arith.constant 6 : index
    %c0_133 = arith.constant 0 : index
    %c0_134 = arith.constant 0 : index
    %119 = vector.load %arg8[%c6_132, %c0_133, %c0_134] : memref<9x128x128xbf16, #tpu.memory_space<vmem>>, vector<1x128x128xbf16>
    %120 = vector.shape_cast %119 : vector<1x128x128xbf16> to vector<128x128xbf16>
    %cst_135 = arith.constant dense<0.000000e+00> : vector<256x128xf32>
    %121 = tpu.matmul %118, %120, %cst_135 {dimension_numbers = #tpu.dot_dimension_numbers<[1], [0], [0], [1], [0, 0, 1, 1], [], []>} : vector<256x128xbf16>, vector<128x128xbf16>, vector<256x128xf32> -> vector<256x128xf32>
    %122 = arith.addf %117, %121 : vector<256x128xf32>
    %c32_136 = arith.constant 32 : index
    %c0_137 = arith.constant 0 : index
    %123 = vector.load %arg14[%c32_136, %c0_137] : memref<288x128xbf16, #tpu.memory_space<vmem>>, vector<256x128xbf16>
    %c7_138 = arith.constant 7 : index
    %c0_139 = arith.constant 0 : index
    %c0_140 = arith.constant 0 : index
    %124 = vector.load %arg8[%c7_138, %c0_139, %c0_140] : memref<9x128x128xbf16, #tpu.memory_space<vmem>>, vector<1x128x128xbf16>
    %125 = vector.shape_cast %124 : vector<1x128x128xbf16> to vector<128x128xbf16>
    %cst_141 = arith.constant dense<0.000000e+00> : vector<256x128xf32>
    %126 = tpu.matmul %123, %125, %cst_141 {dimension_numbers = #tpu.dot_dimension_numbers<[1], [0], [0], [1], [0, 0, 1, 1], [], []>} : vector<256x128xbf16>, vector<128x128xbf16>, vector<256x128xf32> -> vector<256x128xf32>
    %127 = arith.addf %122, %126 : vector<256x128xf32>
    %c32_142 = arith.constant 32 : index
    %c0_143 = arith.constant 0 : index
    %128 = vector.load %arg15[%c32_142, %c0_143] : memref<288x128xbf16, #tpu.memory_space<vmem>>, vector<256x128xbf16>
    %c8_144 = arith.constant 8 : index
    %c0_145 = arith.constant 0 : index
    %c0_146 = arith.constant 0 : index
    %129 = vector.load %arg8[%c8_144, %c0_145, %c0_146] : memref<9x128x128xbf16, #tpu.memory_space<vmem>>, vector<1x128x128xbf16>
    %130 = vector.shape_cast %129 : vector<1x128x128xbf16> to vector<128x128xbf16>
    %cst_147 = arith.constant dense<0.000000e+00> : vector<256x128xf32>
    %131 = tpu.matmul %128, %130, %cst_147 {dimension_numbers = #tpu.dot_dimension_numbers<[1], [0], [0], [1], [0, 0, 1, 1], [], []>} : vector<256x128xbf16>, vector<128x128xbf16>, vector<256x128xf32> -> vector<256x128xf32>
    %132 = arith.addf %127, %131 : vector<256x128xf32>
    %cst_148 = arith.constant 0.000000e+00 : f32
    %133 = vector.broadcast %cst_148 : f32 to vector<256x128xf32>
    %134 = arith.maximumf %132, %133 : vector<256x128xf32>
    %135 = arith.truncf %134 : vector<256x128xf32> to vector<256x128xbf16>
    %c0_149 = arith.constant 0 : index
    %c0_150 = arith.constant 0 : index
    %136 = vector.load %arg2[%c0_149, %c0_150] : memref<256x256xbf16, #tpu.memory_space<vmem>>, vector<256x256xbf16>
    %cst_151 = arith.constant dense<0.000000e+00> : vector<256x128xf32>
    %137 = tpu.matmul %136, %135, %cst_151 {dimension_numbers = #tpu.dot_dimension_numbers<[1], [0], [0], [1], [0, 0, 1, 1], [], []>} : vector<256x256xbf16>, vector<256x128xbf16>, vector<256x128xf32> -> vector<256x128xf32>
    %138 = arith.truncf %137 : vector<256x128xf32> to vector<256x128xbf16>
    %c0_152 = arith.constant 0 : index
    %c0_153 = arith.constant 0 : index
    %139 = vector.load %arg3[%c0_152, %c0_153] : memref<256x256xbf16, #tpu.memory_space<vmem>>, vector<256x256xbf16>
    %cst_154 = arith.constant dense<0.000000e+00> : vector<256x128xf32>
    %140 = tpu.matmul %139, %135, %cst_154 {dimension_numbers = #tpu.dot_dimension_numbers<[1], [0], [0], [1], [0, 0, 1, 1], [], []>} : vector<256x256xbf16>, vector<256x128xbf16>, vector<256x128xf32> -> vector<256x128xf32>
    %141 = arith.truncf %140 : vector<256x128xf32> to vector<256x128xbf16>
    %c16_155 = arith.constant 16 : index
    %c0_156 = arith.constant 0 : index
    %142 = vector.load %arg13[%c16_155, %c0_156] : memref<288x128xbf16, #tpu.memory_space<vmem>>, vector<256x128xbf16>
    tpu.vector_store %arg13[%c16_155, %c0_156], %138 {strides = array<i32>} : memref<288x128xbf16, #tpu.memory_space<vmem>>, vector<256x128xbf16>,
    %c16_157 = arith.constant 16 : index
    %c0_158 = arith.constant 0 : index
    %143 = vector.load %arg14[%c16_157, %c0_158] : memref<288x128xbf16, #tpu.memory_space<vmem>>, vector<256x128xbf16>
    tpu.vector_store %arg14[%c16_157, %c0_158], %135 {strides = array<i32>} : memref<288x128xbf16, #tpu.memory_space<vmem>>, vector<256x128xbf16>,
    %c16_159 = arith.constant 16 : index
    %c0_160 = arith.constant 0 : index
    %144 = vector.load %arg15[%c16_159, %c0_160] : memref<288x128xbf16, #tpu.memory_space<vmem>>, vector<256x128xbf16>
    tpu.vector_store %arg15[%c16_159, %c0_160], %141 {strides = array<i32>} : memref<288x128xbf16, #tpu.memory_space<vmem>>, vector<256x128xbf16>,
    %c0_161 = arith.constant 0 : index
    %c0_162 = arith.constant 0 : index
    %145 = vector.load %arg11[%c0_161, %c0_162] : memref<1x128xf32, #tpu.memory_space<vmem>>, vector<1x128xf32>
    %cst_163 = arith.constant 0.000000e+00 : f32
    %146 = vector.broadcast %cst_163 : f32 to vector<256x128xf32>
    %147 = vector.broadcast %145 : vector<1x128xf32> to vector<256x128xf32>
    %148 = arith.addf %147, %146 : vector<256x128xf32>
    %c0_164 = arith.constant 0 : index
    %c0_165 = arith.constant 0 : index
    %149 = vector.load %arg13[%c0_164, %c0_165] : memref<288x128xbf16, #tpu.memory_space<vmem>>, vector<256x128xbf16>
    %c0_166 = arith.constant 0 : index
    %c0_167 = arith.constant 0 : index
    %c0_168 = arith.constant 0 : index
    %150 = vector.load %arg10[%c0_166, %c0_167, %c0_168] : memref<9x128x128xbf16, #tpu.memory_space<vmem>>, vector<1x128x128xbf16>
    %151 = vector.shape_cast %150 : vector<1x128x128xbf16> to vector<128x128xbf16>
    %cst_169 = arith.constant dense<0.000000e+00> : vector<256x128xf32>
    %152 = tpu.matmul %149, %151, %cst_169 {dimension_numbers = #tpu.dot_dimension_numbers<[1], [0], [0], [1], [0, 0, 1, 1], [], []>} : vector<256x128xbf16>, vector<128x128xbf16>, vector<256x128xf32> -> vector<256x128xf32>
    %153 = arith.addf %148, %152 : vector<256x128xf32>
    %c0_170 = arith.constant 0 : index
    %c0_171 = arith.constant 0 : index
    %154 = vector.load %arg14[%c0_170, %c0_171] : memref<288x128xbf16, #tpu.memory_space<vmem>>, vector<256x128xbf16>
    %c1_172 = arith.constant 1 : index
    %c0_173 = arith.constant 0 : index
    %c0_174 = arith.constant 0 : index
    %155 = vector.load %arg10[%c1_172, %c0_173, %c0_174] : memref<9x128x128xbf16, #tpu.memory_space<vmem>>, vector<1x128x128xbf16>
    %156 = vector.shape_cast %155 : vector<1x128x128xbf16> to vector<128x128xbf16>
    %cst_175 = arith.constant dense<0.000000e+00> : vector<256x128xf32>
    %157 = tpu.matmul %154, %156, %cst_175 {dimension_numbers = #tpu.dot_dimension_numbers<[1], [0], [0], [1], [0, 0, 1, 1], [], []>} : vector<256x128xbf16>, vector<128x128xbf16>, vector<256x128xf32> -> vector<256x128xf32>
    %158 = arith.addf %153, %157 : vector<256x128xf32>
    %c0_176 = arith.constant 0 : index
    %c0_177 = arith.constant 0 : index
    %159 = vector.load %arg15[%c0_176, %c0_177] : memref<288x128xbf16, #tpu.memory_space<vmem>>, vector<256x128xbf16>
    %c2_178 = arith.constant 2 : index
    %c0_179 = arith.constant 0 : index
    %c0_180 = arith.constant 0 : index
    %160 = vector.load %arg10[%c2_178, %c0_179, %c0_180] : memref<9x128x128xbf16, #tpu.memory_space<vmem>>, vector<1x128x128xbf16>
    %161 = vector.shape_cast %160 : vector<1x128x128xbf16> to vector<128x128xbf16>
    %cst_181 = arith.constant dense<0.000000e+00> : vector<256x128xf32>
    %162 = tpu.matmul %159, %161, %cst_181 {dimension_numbers = #tpu.dot_dimension_numbers<[1], [0], [0], [1], [0, 0, 1, 1], [], []>} : vector<256x128xbf16>, vector<128x128xbf16>, vector<256x128xf32> -> vector<256x128xf32>
    %163 = arith.addf %158, %162 : vector<256x128xf32>
    %c16_182 = arith.constant 16 : index
    %c0_183 = arith.constant 0 : index
    %164 = vector.load %arg13[%c16_182, %c0_183] : memref<288x128xbf16, #tpu.memory_space<vmem>>, vector<256x128xbf16>
    %c3_184 = arith.constant 3 : index
    %c0_185 = arith.constant 0 : index
    %c0_186 = arith.constant 0 : index
    %165 = vector.load %arg10[%c3_184, %c0_185, %c0_186] : memref<9x128x128xbf16, #tpu.memory_space<vmem>>, vector<1x128x128xbf16>
    %166 = vector.shape_cast %165 : vector<1x128x128xbf16> to vector<128x128xbf16>
    %cst_187 = arith.constant dense<0.000000e+00> : vector<256x128xf32>
    %167 = tpu.matmul %164, %166, %cst_187 {dimension_numbers = #tpu.dot_dimension_numbers<[1], [0], [0], [1], [0, 0, 1, 1], [], []>} : vector<256x128xbf16>, vector<128x128xbf16>, vector<256x128xf32> -> vector<256x128xf32>
    %168 = arith.addf %163, %167 : vector<256x128xf32>
    %c16_188 = arith.constant 16 : index
    %c0_189 = arith.constant 0 : index
    %169 = vector.load %arg14[%c16_188, %c0_189] : memref<288x128xbf16, #tpu.memory_space<vmem>>, vector<256x128xbf16>
    %c4_190 = arith.constant 4 : index
    %c0_191 = arith.constant 0 : index
    %c0_192 = arith.constant 0 : index
    %170 = vector.load %arg10[%c4_190, %c0_191, %c0_192] : memref<9x128x128xbf16, #tpu.memory_space<vmem>>, vector<1x128x128xbf16>
    %171 = vector.shape_cast %170 : vector<1x128x128xbf16> to vector<128x128xbf16>
    %cst_193 = arith.constant dense<0.000000e+00> : vector<256x128xf32>
    %172 = tpu.matmul %169, %171, %cst_193 {dimension_numbers = #tpu.dot_dimension_numbers<[1], [0], [0], [1], [0, 0, 1, 1], [], []>} : vector<256x128xbf16>, vector<128x128xbf16>, vector<256x128xf32> -> vector<256x128xf32>
    %173 = arith.addf %168, %172 : vector<256x128xf32>
    %c16_194 = arith.constant 16 : index
    %c0_195 = arith.constant 0 : index
    %174 = vector.load %arg15[%c16_194, %c0_195] : memref<288x128xbf16, #tpu.memory_space<vmem>>, vector<256x128xbf16>
    %c5_196 = arith.constant 5 : index
    %c0_197 = arith.constant 0 : index
    %c0_198 = arith.constant 0 : index
    %175 = vector.load %arg10[%c5_196, %c0_197, %c0_198] : memref<9x128x128xbf16, #tpu.memory_space<vmem>>, vector<1x128x128xbf16>
    %176 = vector.shape_cast %175 : vector<1x128x128xbf16> to vector<128x128xbf16>
    %cst_199 = arith.constant dense<0.000000e+00> : vector<256x128xf32>
    %177 = tpu.matmul %174, %176, %cst_199 {dimension_numbers = #tpu.dot_dimension_numbers<[1], [0], [0], [1], [0, 0, 1, 1], [], []>} : vector<256x128xbf16>, vector<128x128xbf16>, vector<256x128xf32> -> vector<256x128xf32>
    %178 = arith.addf %173, %177 : vector<256x128xf32>
    %c32_200 = arith.constant 32 : index
    %c0_201 = arith.constant 0 : index
    %179 = vector.load %arg13[%c32_200, %c0_201] : memref<288x128xbf16, #tpu.memory_space<vmem>>, vector<256x128xbf16>
    %c6_202 = arith.constant 6 : index
    %c0_203 = arith.constant 0 : index
    %c0_204 = arith.constant 0 : index
    %180 = vector.load %arg10[%c6_202, %c0_203, %c0_204] : memref<9x128x128xbf16, #tpu.memory_space<vmem>>, vector<1x128x128xbf16>
    %181 = vector.shape_cast %180 : vector<1x128x128xbf16> to vector<128x128xbf16>
    %cst_205 = arith.constant dense<0.000000e+00> : vector<256x128xf32>
    %182 = tpu.matmul %179, %181, %cst_205 {dimension_numbers = #tpu.dot_dimension_numbers<[1], [0], [0], [1], [0, 0, 1, 1], [], []>} : vector<256x128xbf16>, vector<128x128xbf16>, vector<256x128xf32> -> vector<256x128xf32>
    %183 = arith.addf %178, %182 : vector<256x128xf32>
    %c32_206 = arith.constant 32 : index
    %c0_207 = arith.constant 0 : index
    %184 = vector.load %arg14[%c32_206, %c0_207] : memref<288x128xbf16, #tpu.memory_space<vmem>>, vector<256x128xbf16>
    %c7_208 = arith.constant 7 : index
    %c0_209 = arith.constant 0 : index
    %c0_210 = arith.constant 0 : index
    %185 = vector.load %arg10[%c7_208, %c0_209, %c0_210] : memref<9x128x128xbf16, #tpu.memory_space<vmem>>, vector<1x128x128xbf16>
    %186 = vector.shape_cast %185 : vector<1x128x128xbf16> to vector<128x128xbf16>
    %cst_211 = arith.constant dense<0.000000e+00> : vector<256x128xf32>
    %187 = tpu.matmul %184, %186, %cst_211 {dimension_numbers = #tpu.dot_dimension_numbers<[1], [0], [0], [1], [0, 0, 1, 1], [], []>} : vector<256x128xbf16>, vector<128x128xbf16>, vector<256x128xf32> -> vector<256x128xf32>
    %188 = arith.addf %183, %187 : vector<256x128xf32>
    %c32_212 = arith.constant 32 : index
    %c0_213 = arith.constant 0 : index
    %189 = vector.load %arg15[%c32_212, %c0_213] : memref<288x128xbf16, #tpu.memory_space<vmem>>, vector<256x128xbf16>
    %c8_214 = arith.constant 8 : index
    %c0_215 = arith.constant 0 : index
    %c0_216 = arith.constant 0 : index
    %190 = vector.load %arg10[%c8_214, %c0_215, %c0_216] : memref<9x128x128xbf16, #tpu.memory_space<vmem>>, vector<1x128x128xbf16>
    %191 = vector.shape_cast %190 : vector<1x128x128xbf16> to vector<128x128xbf16>
    %cst_217 = arith.constant dense<0.000000e+00> : vector<256x128xf32>
    %192 = tpu.matmul %189, %191, %cst_217 {dimension_numbers = #tpu.dot_dimension_numbers<[1], [0], [0], [1], [0, 0, 1, 1], [], []>} : vector<256x128xbf16>, vector<128x128xbf16>, vector<256x128xf32> -> vector<256x128xf32>
    %193 = arith.addf %188, %192 : vector<256x128xf32>
    %c0_218 = arith.constant 0 : index
    %c0_219 = arith.constant 0 : index
    %194 = vector.load %arg16[%c0_218, %c0_219] : memref<256x128xf32, #tpu.memory_space<vmem>>, vector<256x128xf32>
    %195 = arith.addf %193, %194 : vector<256x128xf32>
    %cst_220 = arith.constant 0.000000e+00 : f32
    %196 = vector.broadcast %cst_220 : f32 to vector<256x128xf32>
    %197 = arith.maximumf %195, %196 : vector<256x128xf32>
    %198 = arith.truncf %197 : vector<256x128xf32> to vector<256x128xbf16>
    %c0_221 = arith.constant 0 : index
    %c0_222 = arith.constant 0 : index
    %199 = vector.load %arg12[%c0_221, %c0_222] : memref<256x128xbf16, #tpu.memory_space<vmem>>, vector<256x128xbf16>
    tpu.vector_store %arg12[%c0_221, %c0_222], %198 {strides = array<i32>} : memref<256x128xbf16, #tpu.memory_space<vmem>>, vector<256x128xbf16>,
    return
  }
  func.func @transform_0(%arg0: i32) -> (i32, i32) {
    %c0_i32 = arith.constant 0 : i32
    %c0_i32_0 = arith.constant 0 : i32
    return %arg0, %c0_i32 : i32, i32
  }
  func.func @transform_1(%arg0: i32) -> (i32, i32) {
    %c0_i32 = arith.constant 0 : i32
    %c0_i32_0 = arith.constant 0 : i32
    %c0_i32_1 = arith.constant 0 : i32
    return %c0_i32, %c0_i32_0 : i32, i32
  }
  func.func @transform_2(%arg0: i32) -> (i32, i32) {
    %c0_i32 = arith.constant 0 : i32
    %c0_i32_0 = arith.constant 0 : i32
    %c0_i32_1 = arith.constant 0 : i32
    return %c0_i32, %c0_i32_0 : i32, i32
  }
  func.func @transform_3(%arg0: i32) -> (i32, i32) {
    %c0_i32 = arith.constant 0 : i32
    %c0_i32_0 = arith.constant 0 : i32
    %c0_i32_1 = arith.constant 0 : i32
    return %c0_i32, %c0_i32_0 : i32, i32
  }
  func.func @transform_4(%arg0: i32) -> (i32, i32) {
    %c0_i32 = arith.constant 0 : i32
    %c0_i32_0 = arith.constant 0 : i32
    %c0_i32_1 = arith.constant 0 : i32
    return %c0_i32, %c0_i32_0 : i32, i32
  }
  func.func @transform_5(%arg0: i32) -> (i32, i32, i32) {
    %c0_i32 = arith.constant 0 : i32
    %c0_i32_0 = arith.constant 0 : i32
    %c0_i32_1 = arith.constant 0 : i32
    %c0_i32_2 = arith.constant 0 : i32
    return %c0_i32, %c0_i32_0, %c0_i32_1 : i32, i32, i32
  }
  func.func @transform_6(%arg0: i32) -> (i32, i32) {
    %c0_i32 = arith.constant 0 : i32
    %c0_i32_0 = arith.constant 0 : i32
    %c0_i32_1 = arith.constant 0 : i32
    return %c0_i32, %c0_i32_0 : i32, i32
  }
  func.func @transform_7(%arg0: i32) -> (i32, i32, i32) {
    %c0_i32 = arith.constant 0 : i32
    %c0_i32_0 = arith.constant 0 : i32
    %c0_i32_1 = arith.constant 0 : i32
    %c0_i32_2 = arith.constant 0 : i32
    return %c0_i32, %c0_i32_0, %c0_i32_1 : i32, i32, i32
  }
  func.func @transform_8(%arg0: i32) -> (i32, i32) {
    %c0_i32 = arith.constant 0 : i32
    %c0_i32_0 = arith.constant 0 : i32
    %c0_i32_1 = arith.constant 0 : i32
    return %c0_i32, %c0_i32_0 : i32, i32
  }
  func.func @transform_9(%arg0: i32) -> (i32, i32, i32) {
    %c0_i32 = arith.constant 0 : i32
    %c0_i32_0 = arith.constant 0 : i32
    %c0_i32_1 = arith.constant 0 : i32
    %c0_i32_2 = arith.constant 0 : i32
    return %c0_i32, %c0_i32_0, %c0_i32_1 : i32, i32, i32
  }
  func.func @transform_10(%arg0: i32) -> (i32, i32) {
    %c0_i32 = arith.constant 0 : i32
    %c0_i32_0 = arith.constant 0 : i32
    %c0_i32_1 = arith.constant 0 : i32
    return %c0_i32, %c0_i32_0 : i32, i32
  }
  func.func @transform_11(%arg0: i32) -> (i32, i32) {
    %c0_i32 = arith.constant 0 : i32
    %c0_i32_0 = arith.constant 0 : i32
    return %arg0, %c0_i32 : i32, i32
  }
}

</mosaic_0001>

<bundles_post_ra>
// kernel: _lambda_.5
= control target key start
LH: loop header
LB: loop body
LE: loop exit
PB: predicated region body
PF: predicated region fallthrough
CT: control target
= control target key end

     0   :  { %10 = vsyncpa [#allocation3], 0  ;;  %v639_v3 = vmov 0.0|0.0   ;;  %vm640_vm0 = vmmov 0   ;;  %v641_v6 = vmov 0.0   ;;  %s848_s0 = inlined_call_operand.vmem [shape: bf16[2,256,128], index: 0, kind: input, shape index: {}]   ;;  %s849_s1 = inlined_call_operand.vmem [shape: f32[128,128], index: 1, kind: input, shape index: {}]   ;;  %s850_s2 = inlined_call_operand.vmem [shape: f32[1,128], index: 2, kind: input, shape index: {}]   ;;  %s851_s3 = inlined_call_operand.hbm [shape: f32[2,128], index: 3, kind: output, shape index: {0}]   ;;  %s852_s4 = inlined_call_operand.hbm [shape: f32[2,128], index: 4, kind: output, shape index: {1}]  }
   0x1   :  { %v228_v0 = vld [vmem:[%s849_s1] sm:$0xff]  ;;  %v229_v1 = vld [vmem:[%s849_s1 + $0x8] sm:$0xff]  ;;  %v230_v2 = vld [vmem:[%s849_s1 + $0x10] sm:$0xff]  ;;  %562 = vmatprep.subr.bf16.mxu0 %v639_v3  ;;  %559 = vmatprep.mubr.msk.f32.mxu0 %vm640_vm0, %v641_v6 }
   0x2   :  { %v563_v4 = vpack.c.bf16 %v229_v1, %v228_v0  ;;  %v231_v5 = vld [vmem:[%s849_s1 + $0x18] sm:$0xff]  ;;  %v232_v8 = vld [vmem:[%s849_s1 + $0x20] sm:$0xff]  ;;  %v233_v9 = vld [vmem:[%s849_s1 + $0x28] sm:$0xff] }
   0x3   :  { %v566_v7 = vpack.c.bf16 %v231_v5, %v230_v2  ;;  %v569_v10 = vpack.c.bf16 %v233_v9, %v232_v8  ;;  %v234_v11 = vld [vmem:[%s849_s1 + $0x30] sm:$0xff]  ;;  %v235_v12 = vld [vmem:[%s849_s1 + $0x38] sm:$0xff]  ;;  %v236_v14 = vld [vmem:[%s849_s1 + $0x40] sm:$0xff] }
   0x4   :  { %564 = vmatpush3.bf16.msra.mxu0 %v563_v4  ;;  %v572_v13 = vpack.c.bf16 %v235_v12, %v234_v11  ;;  %v237_v15 = vld [vmem:[%s849_s1 + $0x48] sm:$0xff]  ;;  %v352_v17 = vld [vmem:[%s848_s0] sm:$0xff]   ;;  %v238_v19 = vld [vmem:[%s849_s1 + $0x50] sm:$0xff] }
   0x5   :  { %565 = vmatprep.subr.bf16.mxu0 %v639_v3  ;;  %v575_v16 = vpack.c.bf16 %v237_v15, %v236_v14  ;;  %v494_v18 = vld [vmem:[%s848_s0 + $0x80] sm:$0xff]   ;;  %v239_v20 = vld [vmem:[%s849_s1 + $0x58] sm:$0xff] }
   0x8   :  { %567 = vmatpush3.bf16.msra.mxu0 %v566_v7 }
   0x9   :  { %568 = vmatprep.subr.bf16.mxu0 %v639_v3 }
   0xc   :  { %570 = vmatpush3.bf16.msra.mxu0 %v569_v10 }
   0xd   :  { %571 = vmatprep.subr.bf16.mxu0 %v639_v3 }
  0x10   :  { %573 = vmatpush3.bf16.msra.mxu0 %v572_v13 }
  0x11   :  { %574 = vmatprep.subr.bf16.mxu0 %v639_v3 }
  0x12   :  { %11 = vsyncpa [#allocation5], 0  ;;  %v479_v21 = vld [vmem:[%s848_s0 + $0x8] sm:$0xff]   ;;  %v353_v23 = vunpack.c.l.bf16 %v352_v17  ;;  %v354_v24 = vunpack.c.h.bf16 %v352_v17  ;;  %v417_v25 = vunpack.c.l.bf16 %v494_v18  ;;  %v418_v26 = vunpack.c.h.bf16 %v494_v18  ;;  %v240_v28 = vld [vmem:[%s849_s1 + $0x60] sm:$0xff] }
  0x13   :  { %v495_v22 = vld [vmem:[%s848_s0 + $0x88] sm:$0xff]   ;;  %v578_v27 = vpack.c.bf16 %v239_v20, %v238_v19  ;;  %v357_v30 = vunpack.c.l.bf16 %v479_v21  ;;  %v480_v32 = vld [vmem:[%s848_s0 + $0x10] sm:$0xff]   ;;  %v358_v34 = vunpack.c.h.bf16 %v479_v21  ;;  %v243_v40 = vld [vmem:[%s849_s1 + $0x78] sm:$0xff]  ;;  %vm224_vm1 = vcmask 1041409  }
  0x14   :  { %576 = vmatpush3.bf16.msra.mxu0 %v575_v16  ;;  %v241_v29 = vld [vmem:[%s849_s1 + $0x68] sm:$0xff]  ;;  %v421_v31 = vunpack.c.l.bf16 %v495_v22  ;;  %v496_v33 = vld [vmem:[%s848_s0 + $0x90] sm:$0xff]   ;;  %v422_v35 = vunpack.c.h.bf16 %v495_v22  ;;  %v146_v36 = vadd.f32 %v354_v24, %v353_v23  ;;  %v183_v37 = vadd.f32 %v418_v26, %v417_v25  ;;  %v481_v45 = vld [vmem:[%s848_s0 + $0x18] sm:$0xff]  }
  0x15   :  { %577 = vmatprep.subr.bf16.mxu0 %v639_v3  ;;  %v581_v38 = vpack.c.bf16 %v241_v29, %v240_v28  ;;  %v242_v39 = vld [vmem:[%s849_s1 + $0x70] sm:$0xff]  ;;  %v361_v41 = vunpack.c.l.bf16 %v480_v32  ;;  %v425_v42 = vunpack.c.l.bf16 %v496_v33  ;;  %v497_v46 = vld [vmem:[%s848_s0 + $0x98] sm:$0xff]   ;;  %v362_v47 = vunpack.c.h.bf16 %v480_v32  ;;  %v482_v56 = vld [vmem:[%s848_s0 + $0x20] sm:$0xff]  }
  0x16   :  { %v147_v43 = vadd.f32 %v357_v30, %v146_v36  ;;  %v184_v44 = vadd.f32 %v421_v31, %v183_v37  ;;  %v426_v48 = vunpack.c.h.bf16 %v496_v33  ;;  %v584_v51 = vpack.c.bf16 %v243_v40, %v242_v39  ;;  %v498_v57 = vld [vmem:[%s848_s0 + $0xa0] sm:$0xff]   ;;  %v483_v2 = vld [vmem:[%s848_s0 + $0x28] sm:$0xff]   ;;  %v484_v12 = vld [vmem:[%s848_s0 + $0x30] sm:$0xff]  }
  0x17   :  { %v365_v52 = vunpack.c.l.bf16 %v481_v45  ;;  %v429_v53 = vunpack.c.l.bf16 %v497_v46  ;;  %v366_v58 = vunpack.c.h.bf16 %v481_v45  ;;  %v430_v59 = vunpack.c.h.bf16 %v497_v46  ;;  %v500_v13 = vld [vmem:[%s848_s0 + $0xb0] sm:$0xff]   ;;  %v485_v22 = vld [vmem:[%s848_s0 + $0x38] sm:$0xff]   ;;  %v486_v32 = vld [vmem:[%s848_s0 + $0x40] sm:$0xff]  }
  0x18   :  { %579 = vmatpush3.bf16.msra.mxu0 %v578_v27  ;;  %v148_v49 = vadd.f32 %v358_v34, %v147_v43  ;;  %v185_v50 = vadd.f32 %v422_v35, %v184_v44  ;;  %v369_v62 = vunpack.c.l.bf16 %v482_v56  ;;  %v433_v63 = vunpack.c.l.bf16 %v498_v57  ;;  %v501_v23 = vld [vmem:[%s848_s0 + $0xb8] sm:$0xff]   ;;  %v502_v33 = vld [vmem:[%s848_s0 + $0xc0] sm:$0xff]   ;;  %v503_v43 = vld [vmem:[%s848_s0 + $0xc8] sm:$0xff]  }
  0x19   :  { %580 = vmatprep.subr.bf16.mxu0 %v639_v3  ;;  %v370_v4 = vunpack.c.h.bf16 %v482_v56  ;;  %v434_v5 = vunpack.c.h.bf16 %v498_v57  ;;  %v373_v8 = vunpack.c.l.bf16 %v483_v2  ;;  %v374_v14 = vunpack.c.h.bf16 %v483_v2 }
  0x1a   :  { %v149_v54 = vadd.f32 %v361_v41, %v148_v49  ;;  %v186_v55 = vadd.f32 %v425_v42, %v185_v50  ;;  %v377_v18 = vunpack.c.l.bf16 %v484_v12  ;;  %v441_v19 = vunpack.c.l.bf16 %v500_v13  ;;  %v487_v42 = vld [vmem:[%s848_s0 + $0x48] sm:$0xff]  }
  0x1b   :  { %v378_v24 = vunpack.c.h.bf16 %v484_v12  ;;  %v442_v25 = vunpack.c.h.bf16 %v500_v13  ;;  %v381_v28 = vunpack.c.l.bf16 %v485_v22  ;;  %v445_v29 = vunpack.c.l.bf16 %v501_v23 }
  0x1c   :  { %582 = vmatpush3.bf16.msra.mxu0 %v581_v38  ;;  %v150_v60 = vadd.f32 %v362_v47, %v149_v54  ;;  %v187_v61 = vadd.f32 %v426_v48, %v186_v55  ;;  %v382_v34 = vunpack.c.h.bf16 %v485_v22  ;;  %v446_v35 = vunpack.c.h.bf16 %v501_v23 }
  0x1d   :  { %583 = vmatprep.subr.bf16.mxu0 %v639_v3  ;;  %v499_v3 = vld [vmem:[%s848_s0 + $0xa8] sm:$0xff]   ;;  %v385_v38 = vunpack.c.l.bf16 %v486_v32  ;;  %v449_v39 = vunpack.c.l.bf16 %v502_v33  ;;  %v386_v44 = vunpack.c.h.bf16 %v486_v32  ;;  %v450_v45 = vunpack.c.h.bf16 %v502_v33 }
  0x1e   :  { %v151_v0 = vadd.f32 %v365_v52, %v150_v60  ;;  %v188_v1 = vadd.f32 %v429_v53, %v187_v61  ;;  %v437_v9 = vunpack.c.l.bf16 %v499_v3  ;;  %v438_v15 = vunpack.c.h.bf16 %v499_v3  ;;  %v488_v52 = vld [vmem:[%s848_s0 + $0x50] sm:$0xff]  }
  0x1f   :  { %v389_v48 = vunpack.c.l.bf16 %v487_v42  ;;  %v453_v49 = vunpack.c.l.bf16 %v503_v43  ;;  %v504_v53 = vld [vmem:[%s848_s0 + $0xd0] sm:$0xff]   ;;  %v390_v54 = vunpack.c.h.bf16 %v487_v42  ;;  %v454_v55 = vunpack.c.h.bf16 %v503_v43 }
  0x20   :  { %585 = vmatpush3.bf16.msra.mxu0 %v584_v51  ;;  %v152_v6 = vadd.f32 %v366_v58, %v151_v0  ;;  %v189_v7 = vadd.f32 %v430_v59, %v188_v1  ;;  %v393_v58 = vunpack.c.l.bf16 %v488_v52  ;;  %v457_v59 = vunpack.c.l.bf16 %v504_v53 }
  0x21   :  { %v394_v0 = vunpack.c.h.bf16 %v488_v52  ;;  %v458_v1 = vunpack.c.h.bf16 %v504_v53 }
  0x22   :  { %v153_v10 = vadd.f32 %v369_v62, %v152_v6  ;;  %v190_v11 = vadd.f32 %v433_v63, %v189_v7  ;;  %v489_v62 = vld [vmem:[%s848_s0 + $0x58] sm:$0xff]  }
  0x23   :  { %v505_v63 = vld [vmem:[%s848_s0 + $0xd8] sm:$0xff]  }
  0x24   :  { %v154_v16 = vadd.f32 %v370_v4, %v153_v10  ;;  %v191_v17 = vadd.f32 %v434_v5, %v190_v11  ;;  %v397_v4 = vunpack.c.l.bf16 %v489_v62  ;;  %v461_v5 = vunpack.c.l.bf16 %v505_v63 }
  0x25   :  { %v398_v10 = vunpack.c.h.bf16 %v489_v62  ;;  %v462_v11 = vunpack.c.h.bf16 %v505_v63 }
  0x26   :  { %v155_v20 = vadd.f32 %v373_v8, %v154_v16  ;;  %v192_v21 = vadd.f32 %v437_v9, %v191_v17  ;;  %v490_v8 = vld [vmem:[%s848_s0 + $0x60] sm:$0xff]  }
  0x27   :  { %v506_v9 = vld [vmem:[%s848_s0 + $0xe0] sm:$0xff]  }
  0x28   :  { %v156_v26 = vadd.f32 %v374_v14, %v155_v20  ;;  %v193_v27 = vadd.f32 %v438_v15, %v192_v21  ;;  %v401_v14 = vunpack.c.l.bf16 %v490_v8  ;;  %v465_v15 = vunpack.c.l.bf16 %v506_v9 }
  0x29   :  { %v402_v20 = vunpack.c.h.bf16 %v490_v8  ;;  %v466_v21 = vunpack.c.h.bf16 %v506_v9 }
  0x2a   :  { %v157_v30 = vadd.f32 %v377_v18, %v156_v26  ;;  %v194_v31 = vadd.f32 %v441_v19, %v193_v27  ;;  %v491_v18 = vld [vmem:[%s848_s0 + $0x68] sm:$0xff]  }
  0x2b   :  { %v507_v19 = vld [vmem:[%s848_s0 + $0xe8] sm:$0xff]  }
  0x2c   :  { %v158_v36 = vadd.f32 %v378_v24, %v157_v30  ;;  %v195_v37 = vadd.f32 %v442_v25, %v194_v31  ;;  %v405_v24 = vunpack.c.l.bf16 %v491_v18  ;;  %v469_v25 = vunpack.c.l.bf16 %v507_v19 }
  0x2d   :  { %v406_v30 = vunpack.c.h.bf16 %v491_v18  ;;  %v470_v31 = vunpack.c.h.bf16 %v507_v19 }
  0x2e   :  { %v159_v40 = vadd.f32 %v381_v28, %v158_v36  ;;  %v196_v41 = vadd.f32 %v445_v29, %v195_v37  ;;  %v492_v28 = vld [vmem:[%s848_s0 + $0x70] sm:$0xff]  }
  0x2f   :  { %v508_v29 = vld [vmem:[%s848_s0 + $0xf0] sm:$0xff]  }
  0x30   :  { %v160_v46 = vadd.f32 %v382_v34, %v159_v40  ;;  %v197_v47 = vadd.f32 %v446_v35, %v196_v41  ;;  %v409_v34 = vunpack.c.l.bf16 %v492_v28  ;;  %v473_v35 = vunpack.c.l.bf16 %v508_v29 }
  0x31   :  { %v410_v40 = vunpack.c.h.bf16 %v492_v28  ;;  %v474_v41 = vunpack.c.h.bf16 %v508_v29 }
  0x32   :  { %v161_v50 = vadd.f32 %v385_v38, %v160_v46  ;;  %v198_v51 = vadd.f32 %v449_v39, %v197_v47  ;;  %v493_v38 = vld [vmem:[%s848_s0 + $0x78] sm:$0xff]  }
  0x33   :  { %v509_v39 = vld [vmem:[%s848_s0 + $0xf8] sm:$0xff]   ;;  %s642_s0 = smov [#allocation4]  }
  0x34   :  { %v162_v56 = vadd.f32 %v386_v44, %v161_v50  ;;  %v199_v57 = vadd.f32 %v450_v45, %v198_v51  ;;  %v413_v44 = vunpack.c.l.bf16 %v493_v38  ;;  %v477_v45 = vunpack.c.l.bf16 %v509_v39  ;;  %s338_s5 = sshll.u32 %s642_s0, 4  ;;  %s339_s5 = int_to_ptr.vmem [resolvable:$true] %s338_s5 }
  0x35   :  { %s591_s6 = scalar_lea.vmem %s339_s5, 32  ;;  %p596_p1 = scmp.lt.s32.totalorder %s339_s5, %s339_s5 }
  0x36   :  { %v163_v60 = vadd.f32 %v389_v48, %v162_v56  ;;  %v200_v61 = vadd.f32 %v453_v49, %v199_v57  ;;  %v414_v48 = vunpack.c.h.bf16 %v493_v38  ;;  %v478_v49 = vunpack.c.h.bf16 %v509_v39  ;;  %p592_p0 = scmp.ne.s32.totalorder %s339_s5, %s591_s6  ;;  %p597_p2 = scmp.lt.s32.totalorder %s591_s6, %s591_s6 }
  0x38   :  { %v164_v2 = vadd.f32 %v390_v54, %v163_v60  ;;  %v201_v3 = vadd.f32 %v454_v55, %v200_v61  ;;  %p598_p3 = por %p597_p2, %p596_p1 }
  0x3a   :  { %v165_v6 = vadd.f32 %v393_v58, %v164_v2  ;;  %v202_v7 = vadd.f32 %v457_v59, %v201_v3  ;;  %p599_p4 = pnand %p598_p3, %p592_p0 }
  0x3c   :  { %v166_v12 = vadd.f32 %v394_v0, %v165_v6  ;;  %v203_v13 = vadd.f32 %v458_v1, %v202_v7 }
  0x3e   :  { %v167_v16 = vadd.f32 %v397_v4, %v166_v12  ;;  %v204_v17 = vadd.f32 %v461_v5, %v203_v13 }
  0x40   :  { %v168_v22 = vadd.f32 %v398_v10, %v167_v16  ;;  %v205_v23 = vadd.f32 %v462_v11, %v204_v17 }
  0x42   :  { %v169_v26 = vadd.f32 %v401_v14, %v168_v22  ;;  %v206_v27 = vadd.f32 %v465_v15, %v205_v23 }
  0x44   :  { %v170_v32 = vadd.f32 %v402_v20, %v169_v26  ;;  %v207_v33 = vadd.f32 %v466_v21, %v206_v27 }
  0x46   :  { %v171_v36 = vadd.f32 %v405_v24, %v170_v32  ;;  %v208_v37 = vadd.f32 %v469_v25, %v207_v33 }
  0x48   :  { %v172_v42 = vadd.f32 %v406_v30, %v171_v36  ;;  %v209_v43 = vadd.f32 %v470_v31, %v208_v37 }
  0x4a   :  { %v173_v46 = vadd.f32 %v409_v34, %v172_v42  ;;  %v210_v47 = vadd.f32 %v473_v35, %v209_v43 }
  0x4c   :  { %v174_v50 = vadd.f32 %v410_v40, %v173_v46  ;;  %v211_v51 = vadd.f32 %v474_v41, %v210_v47 }
  0x4e   :  { %v175_v52 = vadd.f32 %v413_v44, %v174_v50  ;;  %v212_v53 = vadd.f32 %v477_v45, %v211_v51 }
  0x50   :  { %v176_v54 = vadd.f32 %v414_v48, %v175_v52  ;;  %v213_v55 = vadd.f32 %v478_v49, %v212_v53 }
  0x52   :  { %v177_v56 = vrot.slane %v176_v54, 4  ;;  %v214_v57 = vrot.slane %v213_v55, 4 }
  0x54   :  { %v178_v58 = vadd.f32 %v177_v56, %v176_v54  ;;  %v215_v59 = vadd.f32 %v214_v57, %v213_v55 }
  0x56   :  { %v179_v60 = vrot.slane %v178_v58, 2  ;;  %v216_v61 = vrot.slane %v215_v59, 2 }
  0x58   :  { %v180_v62 = vadd.f32 %v179_v60, %v178_v58  ;;  %v217_v63 = vadd.f32 %v216_v61, %v215_v59 }
  0x5a   :  { %v181_v0 = vrot.slane %v180_v62, 1  ;;  %v218_v1 = vrot.slane %v217_v63, 1 }
  0x5c   :  { %v182_v2 = vadd.f32 %v181_v0, %v180_v62  ;;  %v219_v3 = vadd.f32 %v218_v1, %v217_v63 }
  0x5e   :  { %v220_v4 = vmul.f32 0.00390625, %v182_v2  ;;  %v221_v5 = vmul.f32 0.00390625, %v219_v3 }
  0x60   :  { %v225_v6 = vsel %vm224_vm1, %v221_v5, %v220_v4 }
  0x61   :  { %560 = vmatmul.mubr.f32.vlgmr.msra.gmra.mrb[0].mxu0 %v225_v6  ;;  %227 = vst [vmem:[#allocation4] sm:$0x3] %v225_v6 }
  0x62   :  { %602 = shalt.err (!%p599_p4)
}
  0x63   :  { %s603_s9 = scalar_lea.hbm %s852_s4, 32 }
  0x64   :  { %p604_p5 = scmp.ne.s32.totalorder %s852_s4, %s603_s9  ;;  %p607_p6 = scmp.lt.u32.totalorder %s603_s9, %s852_s4 }
  0x66   :  { %p609_p7 = pnand %p607_p6, %p604_p5 }
  0x68   :  { %612 = shalt.err (!%p609_p7)
}
  0x69   :  { %341 = dma.vmem_to_hbm [thread:$0]  %s339_s5, 32, %s852_s4, [#allocation5]   ;;  %v350_v7 = vld [vmem:[%s850_s2] ss:$0 sm:$0xff] }
  0x6a   :  { %s643_s17 = smov [#allocation2]  }
  0x6b   :  { %s328_s18 = sshll.u32 %s643_s17, 4  ;;  %s329_s18 = int_to_ptr.vmem [resolvable:$true] %s328_s18 }
  0x6c   :  { %s613_s19 = scalar_lea.vmem %s329_s18, 32  ;;  %p618_p9 = scmp.lt.s32.totalorder %s329_s18, %s329_s18 }
  0x6d   :  { %p614_p8 = scmp.ne.s32.totalorder %s329_s18, %s613_s19  ;;  %p619_p10 = scmp.lt.s32.totalorder %s613_s19, %s613_s19 }
  0x6f   :  { %p620_p11 = por %p619_p10, %p618_p9 }
  0x71   :  { %p621_p12 = pnand %p620_p11, %p614_p8 }
 0x134   :  { %v317_v8 = vpop.f32.mrb[0].mxu0 }
 0x135   :  { %v318_v9 = vadd.f32 %v350_v7, %v317_v8  ;;  %v561_v10 = vpop.f32.mrb[1].mxu0 }
 0x137   :  { %321 = vst [vmem:[#allocation2] sm:$0x3] %v318_v9 }
 0x138   :  { %624 = shalt.err (!%p621_p12)
}
 0x139   :  { %s625_s21 = scalar_lea.hbm %s851_s3, 32 }
 0x13a   :  { %p626_p13 = scmp.ne.s32.totalorder %s851_s3, %s625_s21  ;;  %p629_p0 = scmp.lt.u32.totalorder %s625_s21, %s851_s3 }
 0x13c   :  { %p631_p1 = pnand %p629_p0, %p626_p13 }
 0x13e   :  { %634 = shalt.err (!%p631_p1)
}
 0x13f   :  { %331 = dma.vmem_to_hbm [thread:$0]  %s329_s18, 32, %s851_s3, [#allocation3]  }
 0x140   :  { %635 = dma.done.wait [#allocation3], 32  }
 0x141   :  { %636 = vsyncadd [#allocation3], 4294967264 }
 0x142   :  { %637 = dma.done.wait [#allocation5], 32  }
 0x143   :  { %638 = vsyncadd [#allocation5], 4294967264 }
 0x144   :  { %348 = vsyncpa [#allocation3], 1 }
 0x145   :  { %349 = vsyncpa [#allocation5], 1 }

// kernel: _lambda_.3
= control target key start
LH: loop header
LB: loop body
LE: loop exit
PB: predicated region body
PF: predicated region fallthrough
CT: control target
= control target key end

     0   :  { %s16202_s17 = smov 0   ;;  %s18575_s0 = inlined_call_operand.vmem [shape: bf16[512,128], index: 0, kind: input, shape index: {}]   ;;  %s18576_s1 = inlined_call_operand.vmem [shape: bf16[256,256], index: 1, kind: input, shape index: {}]   ;;  %s18577_s2 = inlined_call_operand.vmem [shape: bf16[256,256], index: 2, kind: input, shape index: {}]   ;;  %s18578_s3 = inlined_call_operand.vmem [shape: bf16[128,128], index: 3, kind: input, shape index: {}]   ;;  %s18579_s4 = inlined_call_operand.vmem [shape: f32[1,128], index: 4, kind: input, shape index: {}]   ;;  %s18580_s5 = inlined_call_operand.vmem [shape: bf16[9,128,128], index: 5, kind: input, shape index: {}]   ;;  %s18581_s6 = inlined_call_operand.vmem [shape: f32[1,128], index: 6, kind: input, shape index: {}]   ;;  %s18582_s7 = inlined_call_operand.vmem [shape: bf16[9,128,128], index: 7, kind: input, shape index: {}]   ;;  %s18583_s8 = inlined_call_operand.vmem [shape: f32[1,128], index: 8, kind: input, shape index: {}]   ;;  %s18584_s9 = inlined_call_operand.vmem [shape: bf16[9,128,128], index: 9, kind: input, shape index: {}]   ;;  %s18585_s10 = inlined_call_operand.vmem [shape: f32[1,128], index: 10, kind: input, shape index: {}]   ;;  %s18586_s11 = inlined_call_operand.vmem [shape: bf16[512,128], index: 11, kind: output, shape index: {}]  }
   0x1 LB: > { %s10974_s18 = sadd.s32 4294967295, %s16139_s17   ;;  %p10978_p0 = scmp.ge.s32.totalorder %s16139_s17, 1  ;;  %s16139_s17 = sphi %s16202_s17, %s21_s17  }
   0x2   : > { %p338_p1 = scmp.lt.s32.totalorder %s16139_s17, 3 }
   0x4   : > { %p339_p2 = pnand %p10978_p0, %p338_p1 }
   0x6   : > { %342 = sbr.rel (%p339_p2) target bundleno = 3319 (0xcf7), region = 64 }
   0xd   : > { %v15589_v0 = vld [vmem:[%s18578_s3] sm:$0xff]   ;;  %s10979_s21 = sshll.u32 %s10974_s18, 5  ;;  %v15590_v1 = vld [vmem:[%s18578_s3 + $0x8] sm:$0xff]   ;;  %v15591_v2 = vld [vmem:[%s18578_s3 + $0x10] sm:$0xff]  }
   0xe   : > { %p379_p3 = scmp.lt.s32.totalorder %s10979_s21, 63  ;;  %13308 = vmatprep.subr.bf16.mxu1 %v15589_v0  ;;  %v15592_v3 = vld [vmem:[%s18578_s3 + $0x18] sm:$0xff]   ;;  %v15593_v5 = vld [vmem:[%s18578_s3 + $0x20] sm:$0xff]   ;;  %v15594_v6 = vld [vmem:[%s18578_s3 + $0x28] sm:$0xff]  }
   0xf   : > { %13309 = vmatpush3.bf16.msra.mxu1 %v15589_v0  ;;  %v15595_v7 = vld [vmem:[%s18578_s3 + $0x30] sm:$0xff]   ;;  %v15596_v8 = vld [vmem:[%s18578_s3 + $0x38] sm:$0xff]   ;;  %v15615_v24 = vld [vmem:[%s18576_s1 + $0x4] ss:$8 sps:$4 sm:$0xff]  }
  0x10   : > { %s18663_s21 = smov (!%p379_p3, %s10979_s21), 63  ;;  %13310 = vmatprep.subr.bf16.mxu1 %v15590_v1  ;;  %v15613_v25 = vld [vmem:[%s18576_s1] ss:$8 sps:$4 sm:$0xff]   ;;  %v15616_v26 = vld [vmem:[%s18576_s1 + $0x14] ss:$8 sps:$4 sm:$0xff]  }
  0x11   : > { %s10980_s26 = sshll.u32 %s18663_s21, 2  ;;  %v15618_v27 = vld [vmem:[%s18576_s1 + $0x10] ss:$8 sps:$4 sm:$0xff]   ;;  %v15619_v28 = vld [vmem:[%s18576_s1 + $0x24] ss:$8 sps:$4 sm:$0xff]  }
  0x12   : > { %s16227_s29 = scalar_lea.vmem %s18575_s0, %s10980_s26  ;;  %v15621_v29 = vld [vmem:[%s18576_s1 + $0x20] ss:$8 sps:$4 sm:$0xff]   ;;  %v15622_v30 = vld [vmem:[%s18576_s1 + $0x34] ss:$8 sps:$4 sm:$0xff]   ;;  %v15624_v31 = vld [vmem:[%s18576_s1 + $0x30] ss:$8 sps:$4 sm:$0xff]   ;;  %s18478_s14 = scalar_lea.vmem %s18586_s11, %s10980_s26 }
  0x13   : > { %13311 = vmatpush3.bf16.msra.mxu1 %v15590_v1  ;;  %v16233_v4 = vld [vmem:[%s16227_s29] sm:$0xff]   ;;  %v15598_v10 = vld [vmem:[%s16227_s29 + $0x8] sm:$0xff]   ;;  %v15599_v11 = vld [vmem:[%s16227_s29 + $0x10] sm:$0xff]  }
  0x14   : > { %13312 = vmatprep.subr.bf16.mxu1 %v15591_v2  ;;  %13324 = vmatprep.mubr.bf16.mxu1 %v16233_v4  ;;  %v15605_v9 = vld [vmem:[%s16227_s29 + $0x40] sm:$0xff]   ;;  %v15606_v12 = vld [vmem:[%s16227_s29 + $0x48] sm:$0xff]   ;;  %v15600_v13 = vld [vmem:[%s16227_s29 + $0x18] sm:$0xff]  }
  0x15   : > { %v15607_v14 = vld [vmem:[%s16227_s29 + $0x50] sm:$0xff]   ;;  %v15601_v15 = vld [vmem:[%s16227_s29 + $0x20] sm:$0xff]   ;;  %v15608_v16 = vld [vmem:[%s16227_s29 + $0x58] sm:$0xff]  }
  0x16   : > { %v15609_v17 = vld [vmem:[%s16227_s29 + $0x60] sm:$0xff]   ;;  %v15602_v18 = vld [vmem:[%s16227_s29 + $0x28] sm:$0xff]   ;;  %v15603_v19 = vld [vmem:[%s16227_s29 + $0x30] sm:$0xff]  }
  0x17   : > { %13313 = vmatpush3.bf16.msra.mxu1 %v15591_v2  ;;  %v15610_v20 = vld [vmem:[%s16227_s29 + $0x68] sm:$0xff]   ;;  %v15611_v21 = vld [vmem:[%s16227_s29 + $0x70] sm:$0xff]   ;;  %v15604_v22 = vld [vmem:[%s16227_s29 + $0x38] sm:$0xff]  }
  0x18   : > { %13314 = vmatprep.subr.bf16.mxu1 %v15592_v3  ;;  %v15612_v23 = vld [vmem:[%s16227_s29 + $0x78] sm:$0xff]   ;;  %v15625_v32 = vld [vmem:[%s18576_s1 + $0x44] ss:$8 sps:$4 sm:$0xff]   ;;  %v15627_v33 = vld [vmem:[%s18576_s1 + $0x40] ss:$8 sps:$4 sm:$0xff]  }
  0x19   : > { %v15628_v34 = vld [vmem:[%s18576_s1 + $0x54] ss:$8 sps:$4 sm:$0xff]   ;;  %v15630_v35 = vld [vmem:[%s18576_s1 + $0x50] ss:$8 sps:$4 sm:$0xff]   ;;  %v15631_v36 = vld [vmem:[%s18576_s1 + $0x64] ss:$8 sps:$4 sm:$0xff]  }
  0x1a   : > { %v15633_v37 = vld [vmem:[%s18576_s1 + $0x60] ss:$8 sps:$4 sm:$0xff]   ;;  %v15634_v38 = vld [vmem:[%s18576_s1 + $0x74] ss:$8 sps:$4 sm:$0xff]   ;;  %v15636_v39 = vld [vmem:[%s18576_s1 + $0x70] ss:$8 sps:$4 sm:$0xff]  }
  0x1b   : > { %13315 = vmatpush3.bf16.msra.mxu1 %v15592_v3  ;;  %v15637_v40 = vld [vmem:[%s18576_s1 + $0x84] ss:$8 sps:$4 sm:$0xff]   ;;  %v15639_v41 = vld [vmem:[%s18576_s1 + $0x80] ss:$8 sps:$4 sm:$0xff]   ;;  %v15640_v42 = vld [vmem:[%s18576_s1 + $0x94] ss:$8 sps:$4 sm:$0xff]  }
  0x1c   : > { %13316 = vmatprep.subr.bf16.mxu1 %v15593_v5  ;;  %v15642_v43 = vld [vmem:[%s18576_s1 + $0x90] ss:$8 sps:$4 sm:$0xff]   ;;  %v15643_v44 = vld [vmem:[%s18576_s1 + $0xa4] ss:$8 sps:$4 sm:$0xff]   ;;  %v15645_v45 = vld [vmem:[%s18576_s1 + $0xa0] ss:$8 sps:$4 sm:$0xff]  }
  0x1d   : > { %v15646_v46 = vld [vmem:[%s18576_s1 + $0xb4] ss:$8 sps:$4 sm:$0xff]   ;;  %v15648_v47 = vld [vmem:[%s18576_s1 + $0xb0] ss:$8 sps:$4 sm:$0xff]   ;;  %v15649_v48 = vld [vmem:[%s18576_s1 + $0xc4] ss:$8 sps:$4 sm:$0xff]  }
  0x1e   : > { %v15651_v49 = vld [vmem:[%s18576_s1 + $0xc0] ss:$8 sps:$4 sm:$0xff]   ;;  %v15652_v50 = vld [vmem:[%s18576_s1 + $0xd4] ss:$8 sps:$4 sm:$0xff]   ;;  %v15654_v52 = vld [vmem:[%s18576_s1 + $0xd0] ss:$8 sps:$4 sm:$0xff]  }
  0x1f   : > { %13317 = vmatpush3.bf16.msra.mxu1 %v15593_v5  ;;  %v15700_v51 = vld [vmem:[%s18580_s5] sm:$0xff]   ;;  %v15658_v55 = vld [vmem:[%s18576_s1 + $0xf4] ss:$8 sps:$4 sm:$0xff]   ;;  %v15660_v56 = vld [vmem:[%s18576_s1 + $0xf0] ss:$8 sps:$4 sm:$0xff]  }
  0x20   : > { %13318 = vmatprep.subr.bf16.mxu1 %v15594_v6  ;;  %v15655_v53 = vld [vmem:[%s18576_s1 + $0xe4] ss:$8 sps:$4 sm:$0xff]   ;;  %v15657_v54 = vld [vmem:[%s18576_s1 + $0xe0] ss:$8 sps:$4 sm:$0xff]   ;;  %v15664_v59 = vld [vmem:[%s18577_s2 + $0x14] ss:$8 sps:$4 sm:$0xff]  }
  0x21   : > { %v15663_v57 = vld [vmem:[%s18577_s2 + $0x4] ss:$8 sps:$4 sm:$0xff]   ;;  %v15661_v58 = vld [vmem:[%s18577_s2] ss:$8 sps:$4 sm:$0xff]   ;;  %v15705_v61 = vld [vmem:[%s18580_s5 + $0x10] sm:$0xff]  }
  0x22   : > { %v15701_v60 = vld [vmem:[%s18580_s5 + $0x8] sm:$0xff]   ;;  %v15666_v62 = vld [vmem:[%s18577_s2 + $0x10] ss:$8 sps:$4 sm:$0xff]   ;;  %v15710_v1 = vld [vmem:[%s18580_s5 + $0x20] sm:$0xff]  }
  0x23   : > { %13319 = vmatpush3.bf16.msra.mxu1 %v15594_v6  ;;  %v15667_v63 = vld [vmem:[%s18577_s2 + $0x24] ss:$8 sps:$4 sm:$0xff]   ;;  %v15706_v0 = vld [vmem:[%s18580_s5 + $0x18] sm:$0xff]   ;;  %v15669_v2 = vld [vmem:[%s18577_s2 + $0x20] ss:$8 sps:$4 sm:$0xff]  }
  0x24   : > { %13320 = vmatprep.subr.bf16.mxu1 %v15595_v7  ;;  %v15670_v3 = vld [vmem:[%s18577_s2 + $0x34] ss:$8 sps:$4 sm:$0xff]   ;;  %v15672_v6 = vld [vmem:[%s18577_s2 + $0x30] ss:$8 sps:$4 sm:$0xff]  }
  0x25   : > { %v15715_v5 = vld [vmem:[%s18580_s5 + $0x30] sm:$0xff]  }
  0x27   : > { %13321 = vmatpush3.bf16.msra.mxu1 %v15595_v7 }
  0x28   : > { %13322 = vmatprep.subr.bf16.mxu1 %v15596_v8 }
  0x2b   : > { %13323 = vmatpush3.bf16.msra.mxu1 %v15596_v8  ;;  %v15673_v8 = vld [vmem:[%s18577_s2 + $0x44] ss:$8 sps:$4 sm:$0xff]  }
  0x2c   : > { %11988 = vmatprep.subr.bf16.mxu1 %v15605_v9 }
  0x2e   : > { %13325 = vmatmul.mubr.bf16.vlgmr.msra.gmra.mrb[0].mxu1 %v15598_v10 }
  0x2f   : > { %13328 = vmatprep.mubr.bf16.mxu1 %v15599_v11  ;;  %11989 = vmatpush3.bf16.msra.mxu1 %v16233_v4 }
  0x30   : > { %11990 = vmatprep.subr.bf16.mxu1 %v15606_v12 }
  0x33   : > { %11991 = vmatpush3.bf16.msra.mxu1 %v15598_v10 }
  0x34   : > { %11992 = vmatprep.subr.bf16.mxu1 %v15607_v14 }
  0x36   : > { %13329 = vmatmul.mubr.bf16.gmra.mrb[4].mxu1 %v15600_v13 }
  0x37   : > { %13332 = vmatprep.mubr.bf16.mxu1 %v15601_v15  ;;  %11993 = vmatpush3.bf16.msra.mxu1 %v15599_v11 }
  0x38   : > { %11994 = vmatprep.subr.bf16.mxu1 %v15608_v16 }
  0x3b   : > { %11995 = vmatpush3.bf16.msra.mxu1 %v15600_v13 }
  0x3c   : > { %11996 = vmatprep.subr.bf16.mxu1 %v15609_v17 }
  0x3e   : > { %13333 = vmatmul.mubr.bf16.gmra.mrb[8].mxu1 %v15602_v18 }
  0x3f   : > { %13336 = vmatprep.mubr.bf16.mxu1 %v15603_v19  ;;  %11997 = vmatpush3.bf16.msra.mxu1 %v15601_v15 }
  0x40   : > { %11998 = vmatprep.subr.bf16.mxu1 %v15610_v20 }
  0x43   : > { %11999 = vmatpush3.bf16.msra.mxu1 %v15602_v18 }
  0x44   : > { %12000 = vmatprep.subr.bf16.mxu1 %v15611_v21 }
  0x46   : > { %13337 = vmatmul.mubr.bf16.gmra.mrb[12].mxu1 %v15604_v22 }
  0x47   : > { %13340 = vmatprep.mubr.bf16.mxu1 %v15605_v9  ;;  %12001 = vmatpush3.bf16.msra.mxu1 %v15603_v19 }
  0x48   : > { %12002 = vmatprep.subr.bf16.mxu1 %v15612_v23 }
  0x4b   : > { %12003 = vmatpush3.bf16.msra.mxu1 %v15604_v22 }
  0x4c   : > { %12100 = vmatprep.subr.bf16.mxu1 %v15605_v9 }
  0x4e   : > { %13341 = vmatmul.mubr.bf16.gmra.mrb[16].mxu1 %v15606_v12 }
  0x4f   : > { %13344 = vmatprep.mubr.bf16.mxu1 %v15607_v14 }
  0x56   : > { %13345 = vmatmul.mubr.bf16.gmra.mrb[20].mxu1 %v15608_v16 }
  0x57   : > { %13348 = vmatprep.mubr.bf16.mxu1 %v15609_v17 }
  0x5e   : > { %13349 = vmatmul.mubr.bf16.gmra.mrb[24].mxu1 %v15610_v20 }
  0x5f   : > { %13352 = vmatprep.mubr.bf16.mxu1 %v15611_v21 }
  0x66   : > { %13353 = vmatmul.mubr.bf16.gmra.mrb[28].mxu1 %v15612_v23 }
  0x67   : > { %1013 = vmatprep.mubr.bf16.mxu1 %v15615_v24 }
  0x6e   : > { %1014 = vmatmul.mubr.bf16.vlgmr.msra.gmra.mrb[32].mxu1 %v15613_v25 }
  0x6f   : > { %1021 = vmatprep.mubr.bf16.mxu1 %v15616_v26  ;;  %12101 = vmatpush3.bf16.msra.mxu1 %v16233_v4  ;;  %v15711_v4 = vld [vmem:[%s18580_s5 + $0x28] sm:$0xff]  }
  0x70   : > { %12102 = vmatprep.subr.bf16.mxu1 %v15606_v12  ;;  %v15716_v12 = vld [vmem:[%s18580_s5 + $0x38] sm:$0xff]  }
  0x73   : > { %12103 = vmatpush3.bf16.msra.mxu1 %v15598_v10 }
  0x74   : > { %12104 = vmatprep.subr.bf16.mxu1 %v15607_v14 }
  0x76   : > { %1022 = vmatmul.mubr.bf16.gmra.mrb[36].mxu1 %v15618_v27  ;;  %v15681_v27 = vld [vmem:[%s18577_s2 + $0x60] ss:$8 sps:$4 sm:$0xff]  }
  0x77   : > { %1029 = vmatprep.mubr.bf16.mxu1 %v15619_v28  ;;  %12105 = vmatpush3.bf16.msra.mxu1 %v15599_v11 }
  0x78   : > { %12106 = vmatprep.subr.bf16.mxu1 %v15608_v16 }
  0x7b   : > { %12107 = vmatpush3.bf16.msra.mxu1 %v15600_v13  ;;  %v15675_v13 = vld [vmem:[%s18577_s2 + $0x40] ss:$8 sps:$4 sm:$0xff]  }
  0x7c   : > { %12108 = vmatprep.subr.bf16.mxu1 %v15609_v17 }
  0x7e   : > { %1030 = vmatmul.mubr.bf16.gmra.mrb[40].mxu1 %v15621_v29  ;;  %v15682_v29 = vld [vmem:[%s18577_s2 + $0x74] ss:$8 sps:$4 sm:$0xff]  }
  0x7f   : > { %1037 = vmatprep.mubr.bf16.mxu1 %v15622_v30  ;;  %12109 = vmatpush3.bf16.msra.mxu1 %v15601_v15  ;;  %v15676_v15 = vld [vmem:[%s18577_s2 + $0x54] ss:$8 sps:$4 sm:$0xff]  }
  0x80   : > { %12110 = vmatprep.subr.bf16.mxu1 %v15610_v20 }
  0x83   : > { %12111 = vmatpush3.bf16.msra.mxu1 %v15602_v18 }
  0x84   : > { %12112 = vmatprep.subr.bf16.mxu1 %v15611_v21  ;;  %v15678_v21 = vld [vmem:[%s18577_s2 + $0x50] ss:$8 sps:$4 sm:$0xff]  }
  0x86   : > { %1038 = vmatmul.mubr.bf16.gmra.mrb[44].mxu1 %v15624_v31  ;;  %v16465_v31 = vld [vmem:[%s18580_s5 + $0x40] sm:$0xff]  }
  0x87   : > { %1045 = vmatprep.mubr.bf16.mxu1 %v15625_v32  ;;  %12113 = vmatpush3.bf16.msra.mxu1 %v15603_v19 }
  0x88   : > { %12114 = vmatprep.subr.bf16.mxu1 %v15612_v23  ;;  %v15679_v23 = vld [vmem:[%s18577_s2 + $0x64] ss:$8 sps:$4 sm:$0xff]  }
  0x8b   : > { %12115 = vmatpush3.bf16.msra.mxu1 %v15604_v22 }
  0x8c   : > { %13356 = vmatprep.subr.bf16.mxu1 %v15700_v51 }
  0x8e   : > { %1046 = vmatmul.mubr.bf16.gmra.mrb[48].mxu1 %v15627_v33 }
  0x8f   : > { %1053 = vmatprep.mubr.bf16.mxu1 %v15628_v34  ;;  %v15684_v34 = vld [vmem:[%s18577_s2 + $0x70] ss:$8 sps:$4 sm:$0xff]  }
  0x96   : > { %1054 = vmatmul.mubr.bf16.gmra.mrb[52].mxu1 %v15630_v35 }
  0x97   : > { %1061 = vmatprep.mubr.bf16.mxu1 %v15631_v36  ;;  %v15685_v36 = vld [vmem:[%s18577_s2 + $0x84] ss:$8 sps:$4 sm:$0xff]  }
  0x9e   : > { %1062 = vmatmul.mubr.bf16.gmra.mrb[56].mxu1 %v15633_v37 }
  0x9f   : > { %1069 = vmatprep.mubr.bf16.mxu1 %v15634_v38 }
  0xa6   : > { %1070 = vmatmul.mubr.bf16.gmra.mrb[60].mxu1 %v15636_v39 }
  0xa7   : > { %1077 = vmatprep.mubr.bf16.mxu1 %v15637_v40  ;;  %v15687_v40 = vld [vmem:[%s18577_s2 + $0x80] ss:$8 sps:$4 sm:$0xff]  }
  0xae   : > { %1078 = vmatmul.mubr.bf16.gmra.mrb[64].mxu1 %v15639_v41 }
  0xaf   : > { %1085 = vmatprep.mubr.bf16.mxu1 %v15640_v42  ;;  %v15688_v42 = vld [vmem:[%s18577_s2 + $0x94] ss:$8 sps:$4 sm:$0xff]  }
  0xb6   : > { %1086 = vmatmul.mubr.bf16.gmra.mrb[68].mxu1 %v15642_v43 }
  0xb7   : > { %1093 = vmatprep.mubr.bf16.mxu1 %v15643_v44 }
  0xbe   : > { %1094 = vmatmul.mubr.bf16.gmra.mrb[72].mxu1 %v15645_v45 }
  0xbf   : > { %1101 = vmatprep.mubr.bf16.mxu1 %v15646_v46  ;;  %v15690_v46 = vld [vmem:[%s18577_s2 + $0x90] ss:$8 sps:$4 sm:$0xff]  }
  0xc6   : > { %1102 = vmatmul.mubr.bf16.gmra.mrb[76].mxu1 %v15648_v47 }
  0xc7   : > { %1109 = vmatprep.mubr.bf16.mxu1 %v15649_v48  ;;  %v15691_v48 = vld [vmem:[%s18577_s2 + $0xa4] ss:$8 sps:$4 sm:$0xff]  }
  0xce   : > { %1110 = vmatmul.mubr.bf16.gmra.mrb[80].mxu1 %v15651_v49 }
  0xcf   : > { %1117 = vmatprep.mubr.bf16.mxu1 %v15652_v50 }
  0xd6   : > { %1118 = vmatmul.mubr.bf16.gmra.mrb[84].mxu1 %v15654_v52  ;;  %v15693_v52 = vld [vmem:[%s18577_s2 + $0xa0] ss:$8 sps:$4 sm:$0xff]  }
  0xd7   : > { %1125 = vmatprep.mubr.bf16.mxu1 %v15655_v53 }
  0xde   : > { %1126 = vmatmul.mubr.bf16.gmra.mrb[88].mxu1 %v15657_v54  ;;  %v15694_v54 = vld [vmem:[%s18577_s2 + $0xb4] ss:$8 sps:$4 sm:$0xff]  }
  0xdf   : > { %1133 = vmatprep.mubr.bf16.mxu1 %v15658_v55 }
  0xe6   : > { %1134 = vmatmul.mubr.bf16.gmra.mrb[92].mxu1 %v15660_v56 }
  0xe7   : > { %1382 = vmatprep.mubr.bf16.mxu1 %v15663_v57 }
  0xee   : > { %1383 = vmatmul.mubr.bf16.vlgmr.msra.gmra.mrb[96].mxu1 %v15661_v58  ;;  %v15696_v58 = vld [vmem:[%s18577_s2 + $0xb0] ss:$8 sps:$4 sm:$0xff]  }
  0xef   : > { %1390 = vmatprep.mubr.bf16.mxu1 %v15664_v59  ;;  %13357 = vmatpush3.bf16.msra.mxu1 %v15700_v51 }
  0xf0   : > { %13358 = vmatprep.subr.bf16.mxu1 %v15701_v60 }
  0xf3   : > { %13359 = vmatpush3.bf16.msra.mxu1 %v15701_v60 }
  0xf4   : > { %13360 = vmatprep.subr.bf16.mxu1 %v15705_v61 }
  0xf6   : > { %1391 = vmatmul.mubr.bf16.gmra.mrb[100].mxu1 %v15666_v62 }
  0xf7   : > { %1398 = vmatprep.mubr.bf16.mxu1 %v15667_v63  ;;  %13361 = vmatpush3.bf16.msra.mxu1 %v15705_v61  ;;  %v15697_v61 = vld [vmem:[%s18577_s2 + $0xc4] ss:$8 sps:$4 sm:$0xff]  }
  0xf8   : > { %13362 = vmatprep.subr.bf16.mxu1 %v15706_v0 }
  0xfb   : > { %13363 = vmatpush3.bf16.msra.mxu1 %v15706_v0 }
  0xfc   : > { %13364 = vmatprep.subr.bf16.mxu1 %v15710_v1 }
  0xfe   : > { %1399 = vmatmul.mubr.bf16.gmra.mrb[104].mxu1 %v15669_v2 }
  0xff   : > { %1406 = vmatprep.mubr.bf16.mxu1 %v15670_v3  ;;  %13365 = vmatpush3.bf16.msra.mxu1 %v15710_v1  ;;  %v15699_v3 = vld [vmem:[%s18577_s2 + $0xc0] ss:$8 sps:$4 sm:$0xff]  }
 0x100   : > { %13366 = vmatprep.subr.bf16.mxu1 %v15711_v4 }
 0x101   : > { %v16406_v7 = vpop.f32.mrb[0].mxu1 }
 0x102   : > { %18593 = vst [vmem:[#allocation6_spill] sm:$0xff] %v16406_v7  ;;  %v16411_v9 = vpop.f32.mrb[1].mxu1 }
 0x103   : > { %18594 = vst [vmem:[#allocation7_spill] sm:$0xff] %v16411_v9  ;;  %v16413_v10 = vpop.f32.mrb[2].mxu1  ;;  %13367 = vmatpush3.bf16.msra.mxu1 %v15711_v4 }
 0x104   : > { %18595 = vst [vmem:[#allocation8_spill] sm:$0xff] %v16413_v10  ;;  %v16415_v11 = vpop.f32.mrb[3].mxu1  ;;  %13368 = vmatprep.subr.bf16.mxu1 %v15715_v5 }
 0x105   : > { %18596 = vst [vmem:[#allocation9_spill] sm:$0xff] %v16415_v11  ;;  %v15742_v11 = vld [vmem:[%s18580_s5 + $0x108] sm:$0xff]  }
 0x106   : > { %1407 = vmatmul.mubr.bf16.gmra.mrb[108].mxu1 %v15672_v6  ;;  %v15702_v6 = vld [vmem:[%s18577_s2 + $0xd4] ss:$8 sps:$4 sm:$0xff]  }
 0x107   : > { %1414 = vmatprep.mubr.bf16.mxu1 %v15673_v8  ;;  %13369 = vmatpush3.bf16.msra.mxu1 %v15715_v5 }
 0x108   : > { %13370 = vmatprep.subr.bf16.mxu1 %v15716_v12 }
 0x109   : > { %v16423_v14 = vpop.f32.mrb[4].mxu1 }
 0x10a   : > { %18597 = vst [vmem:[#allocation10_spill] sm:$0xff] %v16423_v14  ;;  %v16428_v16 = vpop.f32.mrb[5].mxu1 }
 0x10b   : > { %18598 = vst [vmem:[#allocation11_spill] sm:$0xff] %v16428_v16  ;;  %v16430_v17 = vpop.f32.mrb[6].mxu1  ;;  %13371 = vmatpush3.bf16.msra.mxu1 %v15716_v12 }
 0x10c   : > { %18599 = vst [vmem:[#allocation12_spill] sm:$0xff] %v16430_v17  ;;  %v16432_v18 = vpop.f32.mrb[7].mxu1  ;;  %13404 = vmatprep.subr.bf16.mxu1 %v16465_v31 }
 0x10d   : > { %18600 = vst [vmem:[#allocation13_spill] sm:$0xff] %v16432_v18 }
 0x10e   : > { %1415 = vmatmul.mubr.bf16.gmra.mrb[112].mxu1 %v15675_v13 }
 0x10f   : > { %1422 = vmatprep.mubr.bf16.mxu1 %v15676_v15 }
 0x111   : > { %v16434_v19 = vpop.f32.mrb[8].mxu1 }
 0x112   : > { %18601 = vst [vmem:[#allocation14_spill] sm:$0xff] %v16434_v19  ;;  %v16436_v20 = vpop.f32.mrb[9].mxu1 }
 0x113   : > { %18602 = vst [vmem:[#allocation15_spill] sm:$0xff] %v16436_v20  ;;  %v16441_v22 = vpop.f32.mrb[10].mxu1 }
 0x114   : > { %18603 = vst [vmem:[#allocation16_spill] sm:$0xff] %v16441_v22  ;;  %v16446_v24 = vpop.f32.mrb[11].mxu1 }
 0x115   : > { %18604 = vst [vmem:[#allocation17_spill] sm:$0xff] %v16446_v24 }
 0x116   : > { %1423 = vmatmul.mubr.bf16.gmra.mrb[116].mxu1 %v15678_v21 }
 0x117   : > { %1430 = vmatprep.mubr.bf16.mxu1 %v15679_v23  ;;  %v15704_v23 = vld [vmem:[%s18577_s2 + $0xd0] ss:$8 sps:$4 sm:$0xff]  }
 0x119   : > { %v16448_v25 = vpop.f32.mrb[12].mxu1 }
 0x11a   : > { %18605 = vst [vmem:[#allocation18_spill] sm:$0xff] %v16448_v25  ;;  %v16450_v26 = vpop.f32.mrb[13].mxu1 }
 0x11b   : > { %18606 = vst [vmem:[#allocation19_spill] sm:$0xff] %v16450_v26  ;;  %v16455_v28 = vpop.f32.mrb[14].mxu1 }
 0x11c   : > { %18607 = vst [vmem:[#allocation20_spill] sm:$0xff] %v16455_v28  ;;  %v16460_v30 = vpop.f32.mrb[15].mxu1 }
 0x11d   : > { %18608 = vst [vmem:[#allocation21_spill] sm:$0xff] %v16460_v30 }
 0x11e   : > { %1431 = vmatmul.mubr.bf16.gmra.mrb[120].mxu1 %v15681_v27 }
 0x11f   : > { %1438 = vmatprep.mubr.bf16.mxu1 %v15682_v29 }
 0x121   : > { %v16467_v32 = vpop.f32.mrb[16].mxu1 }
 0x122   : > { %18609 = vst [vmem:[#allocation22_spill] sm:$0xff] %v16467_v32  ;;  %v16470_v33 = vpop.f32.mrb[17].mxu1 }
 0x123   : > { %18610 = vst [vmem:[#allocation23_spill] sm:$0xff] %v16470_v33  ;;  %v16475_v35 = vpop.f32.mrb[18].mxu1 }
 0x124   : > { %18611 = vst [vmem:[#allocation24_spill] sm:$0xff] %v16475_v35  ;;  %v16480_v37 = vpop.f32.mrb[19].mxu1 }
 0x125   : > { %18612 = vst [vmem:[#allocation25_spill] sm:$0xff] %v16480_v37 }
 0x126   : > { %1439 = vmatmul.mubr.bf16.gmra.mrb[124].mxu1 %v15684_v34  ;;  %v15707_v34 = vld [vmem:[%s18577_s2 + $0xe4] ss:$8 sps:$4 sm:$0xff]  }
 0x127   : > { %1446 = vmatprep.mubr.bf16.mxu1 %v15685_v36 }
 0x129   : > { %v16482_v38 = vpop.f32.mrb[20].mxu1 }
 0x12a   : > { %18613 = vst [vmem:[#allocation26_spill] sm:$0xff] %v16482_v38  ;;  %v16484_v39 = vpop.f32.mrb[21].mxu1 }
 0x12b   : > { %18614 = vst [vmem:[#allocation27_spill] sm:$0xff] %v16484_v39  ;;  %v16489_v41 = vpop.f32.mrb[22].mxu1 }
 0x12c   : > { %18615 = vst [vmem:[#allocation28_spill] sm:$0xff] %v16489_v41  ;;  %v16494_v43 = vpop.f32.mrb[23].mxu1  ;;  %v16708_v41 = vld [vmem:[%s16227_s29 + $0x58] sm:$0xff]  }
 0x12d   : > { %18616 = vst [vmem:[#allocation29_spill] sm:$0xff] %v16494_v43 }
 0x12e   : > { %1447 = vmatmul.mubr.bf16.gmra.mrb[128].mxu1 %v15687_v40 }
 0x12f   : > { %1454 = vmatprep.mubr.bf16.mxu1 %v15688_v42 }
 0x131   : > { %v16496_v44 = vpop.f32.mrb[24].mxu1 }
 0x132   : > { %18617 = vst [vmem:[#allocation30_spill] sm:$0xff] %v16496_v44  ;;  %v16498_v45 = vpop.f32.mrb[25].mxu1 }
 0x133   : > { %18618 = vst [vmem:[#allocation31_spill] sm:$0xff] %v16498_v45  ;;  %v16503_v47 = vpop.f32.mrb[26].mxu1  ;;  %v16694_v45 = vld [vmem:[%s16227_s29 + $0x40] sm:$0xff]  }
 0x134   : > { %18619 = vst [vmem:[#allocation32_spill] sm:$0xff] %v16503_v47  ;;  %v16508_v49 = vpop.f32.mrb[27].mxu1 }
 0x135   : > { %18620 = vst [vmem:[#allocation33_spill] sm:$0xff] %v16508_v49  ;;  %v16681_v49 = vld [vmem:[%s16227_s29 + $0x30] sm:$0xff]  }
 0x136   : > { %1455 = vmatmul.mubr.bf16.gmra.mrb[132].mxu1 %v15690_v46 }
 0x137   : > { %1462 = vmatprep.mubr.bf16.mxu1 %v15691_v48 }
 0x139   : > { %v16510_v50 = vpop.f32.mrb[28].mxu1 }
 0x13a   : > { %18621 = vst [vmem:[#allocation34_spill] sm:$0xff] %v16510_v50  ;;  %v16512_v51 = vpop.f32.mrb[29].mxu1 }
 0x13b   : > { %18622 = vst [vmem:[#allocation35_spill] sm:$0xff] %v16512_v51  ;;  %v16517_v53 = vpop.f32.mrb[30].mxu1 }
 0x13c   : > { %18623 = vst [vmem:[#allocation36_spill] sm:$0xff] %v16517_v53  ;;  %v16522_v55 = vpop.f32.mrb[31].mxu1  ;;  %v16665_v53 = vld [vmem:[%s16227_s29 + $0x20] sm:$0xff]  }
 0x13d   : > { %18624 = vst [vmem:[#allocation37_spill] sm:$0xff] %v16522_v55 }
 0x13e   : > { %1463 = vmatmul.mubr.bf16.gmra.mrb[136].mxu1 %v15693_v52  ;;  %v15709_v52 = vld [vmem:[%s18577_s2 + $0xe0] ss:$8 sps:$4 sm:$0xff]  }
 0x13f   : > { %1470 = vmatprep.mubr.bf16.mxu1 %v15694_v54 }
 0x141   : > { %v12004_v56 = vpop.f32.mrb[32].mxu1 }
 0x142   : > { %v12005_v57 = vpop.f32.mrb[33].mxu1 }
 0x143   : > { %v12006_v59 = vadd.f32 %v12005_v57, %v12004_v56  ;;  %v12007_v60 = vpop.f32.mrb[34].mxu1  ;;  %v15712_v57 = vld [vmem:[%s18577_s2 + $0xf4] ss:$8 sps:$4 sm:$0xff]  }
 0x144   : > { %v12008_v62 = vpop.f32.mrb[35].mxu1 }
 0x145   : > { %v12009_v63 = vadd.f32 %v12008_v62, %v12007_v60 }
 0x146   : > { %1471 = vmatmul.mubr.bf16.gmra.mrb[140].mxu1 %v15696_v58 }
 0x147   : > { %v16530_v0 = vpack.c.bf16 %v12009_v63, %v12006_v59  ;;  %1478 = vmatprep.mubr.bf16.mxu1 %v15697_v61  ;;  %v15714_v63 = vld [vmem:[%s18577_s2 + $0xf0] ss:$8 sps:$4 sm:$0xff]  }
 0x149   : > { %v12010_v1 = vpop.f32.mrb[36].mxu1 }
 0x14a   : > { %v12011_v2 = vpop.f32.mrb[37].mxu1 }
 0x14b   : > { %v12012_v4 = vadd.f32 %v12011_v2, %v12010_v1  ;;  %v12013_v5 = vpop.f32.mrb[38].mxu1 }
 0x14c   : > { %v12014_v8 = vpop.f32.mrb[39].mxu1 }
 0x14d   : > { %v12015_v12 = vadd.f32 %v12014_v8, %v12013_v5  ;;  %v18587_v5 = vmov 0  }
 0x14e   : > { %1479 = vmatmul.mubr.bf16.gmra.mrb[144].mxu1 %v15699_v3 }
 0x14f   : > { %1486 = vmatprep.mubr.bf16.mxu1 %v15702_v6  ;;  %v16538_v13 = vpack.c.bf16 %v12015_v12, %v12012_v4 }
 0x151   : > { %v12016_v15 = vpop.f32.mrb[40].mxu1 }
 0x152   : > { %v12017_v21 = vpop.f32.mrb[41].mxu1 }
 0x153   : > { %v12018_v27 = vadd.f32 %v12017_v21, %v12016_v15  ;;  %v12019_v29 = vpop.f32.mrb[42].mxu1 }
 0x154   : > { %v12020_v36 = vpop.f32.mrb[43].mxu1 }
 0x155   : > { %v12021_v40 = vadd.f32 %v12020_v36, %v12019_v29  ;;  %v15719_v36 = vld [vmem:[%s18580_s5 + $0x50] sm:$0xff]  }
 0x156   : > { %1487 = vmatmul.mubr.bf16.gmra.mrb[148].mxu1 %v15704_v23 }
 0x157   : > { %1494 = vmatprep.mubr.bf16.mxu1 %v15707_v34  ;;  %v16546_v42 = vpack.c.bf16 %v12021_v40, %v12018_v27  ;;  %v15718_v27 = vld [vmem:[%s18580_s5 + $0x48] sm:$0xff]  }
 0x159   : > { %v12022_v46 = vpop.f32.mrb[44].mxu1 }
 0x15a   : > { %v12023_v48 = vpop.f32.mrb[45].mxu1 }
 0x15b   : > { %v12024_v54 = vadd.f32 %v12023_v48, %v12022_v46  ;;  %v12025_v56 = vpop.f32.mrb[46].mxu1 }
 0x15c   : > { %v12026_v58 = vpop.f32.mrb[47].mxu1 }
 0x15d   : > { %v12027_v59 = vadd.f32 %v12026_v58, %v12025_v56  ;;  %v15720_v56 = vld [vmem:[%s18580_s5 + $0x58] sm:$0xff]   ;;  %v15721_v58 = vld [vmem:[%s18580_s5 + $0x60] sm:$0xff]  }
 0x15e   : > { %1495 = vmatmul.mubr.bf16.gmra.mrb[152].mxu1 %v15709_v52 }
 0x15f   : > { %1502 = vmatprep.mubr.bf16.mxu1 %v15712_v57  ;;  %v16554_v60 = vpack.c.bf16 %v12027_v59, %v12024_v54 }
 0x161   : > { %v12028_v61 = vpop.f32.mrb[48].mxu1 }
 0x162   : > { %v12029_v62 = vpop.f32.mrb[49].mxu1 }
 0x163   : > { %v12030_v1 = vadd.f32 %v12029_v62, %v12028_v61  ;;  %v12031_v2 = vpop.f32.mrb[50].mxu1 }
 0x164   : > { %v12032_v3 = vpop.f32.mrb[51].mxu1 }
 0x165   : > { %v12033_v4 = vadd.f32 %v12032_v3, %v12031_v2  ;;  %v15722_v2 = vld [vmem:[%s18580_s5 + $0x68] sm:$0xff]  }
 0x166   : > { %1503 = vmatmul.mubr.bf16.gmra.mrb[156].mxu1 %v15714_v63 }
 0x167   : > { %13372 = vmatprep.mubr.bf16.mxu1 %v18587_v5  ;;  %v16560_v6 = vpack.c.bf16 %v12033_v4, %v12030_v1 }
 0x169   : > { %v12034_v8 = vpop.f32.mrb[52].mxu1 }
 0x16a   : > { %v12035_v12 = vpop.f32.mrb[53].mxu1 }
 0x16b   : > { %v12036_v15 = vadd.f32 %v12035_v12, %v12034_v8  ;;  %v12037_v21 = vpop.f32.mrb[54].mxu1  ;;  %v15723_v8 = vld [vmem:[%s18580_s5 + $0x70] sm:$0xff]  }
 0x16c   : > { %v12038_v23 = vpop.f32.mrb[55].mxu1 }
 0x16d   : > { %v12039_v29 = vadd.f32 %v12038_v23, %v12037_v21 }
 0x16e   : > { %13373 = vmatmul.mubr.bf16.vlgmr.msra.gmra.mrb[160].mxu1 %v16530_v0 }
 0x16f   : > { %13376 = vmatprep.mubr.bf16.mxu1 %v16538_v13  ;;  %v16567_v34 = vpack.c.bf16 %v12039_v29, %v12036_v15  ;;  %13405 = vmatpush3.bf16.msra.mxu1 %v16465_v31  ;;  %v15724_v29 = vld [vmem:[%s18580_s5 + $0x78] sm:$0xff]  }
 0x170   : > { %13406 = vmatprep.subr.bf16.mxu1 %v15718_v27 }
 0x171   : > { %v12040_v40 = vpop.f32.mrb[56].mxu1 }
 0x172   : > { %v12041_v46 = vpop.f32.mrb[57].mxu1 }
 0x173   : > { %v12042_v48 = vadd.f32 %v12041_v46, %v12040_v40  ;;  %v12043_v52 = vpop.f32.mrb[58].mxu1  ;;  %13407 = vmatpush3.bf16.msra.mxu1 %v15718_v27  ;;  %v16603_v46 = vld [vmem:[%s18580_s5 + $0x80] sm:$0xff]  }
 0x174   : > { %v12044_v54 = vpop.f32.mrb[59].mxu1  ;;  %13408 = vmatprep.subr.bf16.mxu1 %v15719_v36 }
 0x175   : > { %v12045_v57 = vadd.f32 %v12044_v54, %v12043_v52 }
 0x176   : > { %13377 = vmatmul.mubr.bf16.gmra.mrb[164].mxu1 %v16546_v42 }
 0x177   : > { %13380 = vmatprep.mubr.bf16.mxu1 %v16554_v60  ;;  %v16578_v31 = vpack.c.bf16 %v12045_v57, %v12042_v48  ;;  %13409 = vmatpush3.bf16.msra.mxu1 %v15719_v36 }
 0x178   : > { %13410 = vmatprep.subr.bf16.mxu1 %v15720_v56 }
 0x179   : > { %v12046_v59 = vpop.f32.mrb[60].mxu1 }
 0x17a   : > { %v12047_v61 = vpop.f32.mrb[61].mxu1 }
 0x17b   : > { %v12048_v62 = vadd.f32 %v12047_v61, %v12046_v59  ;;  %v12049_v63 = vpop.f32.mrb[62].mxu1  ;;  %13411 = vmatpush3.bf16.msra.mxu1 %v15720_v56 }
 0x17c   : > { %v12050_v1 = vpop.f32.mrb[63].mxu1  ;;  %13412 = vmatprep.subr.bf16.mxu1 %v15721_v58 }
 0x17d   : > { %v12051_v3 = vadd.f32 %v12050_v1, %v12049_v63 }
 0x17e   : > { %13381 = vmatmul.mubr.bf16.gmra.mrb[168].mxu1 %v16560_v6 }
 0x17f   : > { %13384 = vmatprep.mubr.bf16.mxu1 %v16567_v34  ;;  %v16588_v4 = vpack.c.bf16 %v12051_v3, %v12048_v62  ;;  %13413 = vmatpush3.bf16.msra.mxu1 %v15721_v58 }
 0x180   : > { %13414 = vmatprep.subr.bf16.mxu1 %v15722_v2 }
 0x181   : > { %v12052_v12 = vpop.f32.mrb[64].mxu1 }
 0x182   : > { %v12053_v15 = vpop.f32.mrb[65].mxu1 }
 0x183   : > { %v12054_v21 = vadd.f32 %v12053_v15, %v12052_v12  ;;  %v12055_v23 = vpop.f32.mrb[66].mxu1  ;;  %13415 = vmatpush3.bf16.msra.mxu1 %v15722_v2 }
 0x184   : > { %v12056_v27 = vpop.f32.mrb[67].mxu1  ;;  %13416 = vmatprep.subr.bf16.mxu1 %v15723_v8 }
 0x185   : > { %v12057_v36 = vadd.f32 %v12056_v27, %v12055_v23 }
 0x186   : > { %13385 = vmatmul.mubr.bf16.gmra.mrb[172].mxu1 %v16578_v31 }
 0x187   : > { %13388 = vmatprep.mubr.bf16.mxu1 %v16588_v4  ;;  %v16598_v40 = vpack.c.bf16 %v12057_v36, %v12054_v21  ;;  %13417 = vmatpush3.bf16.msra.mxu1 %v15723_v8 }
 0x188   : > { %13418 = vmatprep.subr.bf16.mxu1 %v15724_v29 }
 0x189   : > { %v12058_v48 = vpop.f32.mrb[68].mxu1 }
 0x18a   : > { %v12059_v52 = vpop.f32.mrb[69].mxu1 }
 0x18b   : > { %v12060_v54 = vadd.f32 %v12059_v52, %v12058_v48  ;;  %v12061_v56 = vpop.f32.mrb[70].mxu1  ;;  %13419 = vmatpush3.bf16.msra.mxu1 %v15724_v29 }
 0x18c   : > { %v12062_v57 = vpop.f32.mrb[71].mxu1  ;;  %13452 = vmatprep.subr.bf16.mxu1 %v16603_v46 }
 0x18d   : > { %v12063_v58 = vadd.f32 %v12062_v57, %v12061_v56 }
 0x18e   : > { %13389 = vmatmul.mubr.bf16.gmra.mrb[176].mxu1 %v16598_v40 }
 0x18f   : > { %v16607_v59 = vpack.c.bf16 %v12063_v58, %v12060_v54 }
 0x191   : > { %v12064_v61 = vpop.f32.mrb[72].mxu1  ;;  %13392 = vmatprep.mubr.bf16.mxu1 %v16607_v59 }
 0x192   : > { %v12065_v62 = vpop.f32.mrb[73].mxu1 }
 0x193   : > { %v12066_v63 = vadd.f32 %v12065_v62, %v12064_v61  ;;  %v12067_v1 = vpop.f32.mrb[74].mxu1 }
 0x194   : > { %v12068_v2 = vpop.f32.mrb[75].mxu1 }
 0x195   : > { %v12069_v3 = vadd.f32 %v12068_v2, %v12067_v1 }
 0x197   : > { %v16610_v8 = vpack.c.bf16 %v12069_v3, %v12066_v63 }
 0x199   : > { %v12070_v12 = vpop.f32.mrb[76].mxu1  ;;  %13393 = vmatmul.mubr.bf16.gmra.mrb[180].mxu1 %v16610_v8 }
 0x19a   : > { %v12071_v15 = vpop.f32.mrb[77].mxu1 }
 0x19b   : > { %v12072_v21 = vadd.f32 %v12071_v15, %v12070_v12  ;;  %v12073_v23 = vpop.f32.mrb[78].mxu1 }
 0x19c   : > { %v12074_v27 = vpop.f32.mrb[79].mxu1 }
 0x19d   : > { %v12075_v29 = vadd.f32 %v12074_v27, %v12073_v23 }
 0x19f   : > { %v16613_v36 = vpack.c.bf16 %v12075_v29, %v12072_v21 }
 0x1a1   : > { %v12076_v48 = vpop.f32.mrb[80].mxu1  ;;  %13396 = vmatprep.mubr.bf16.mxu1 %v16613_v36 }
 0x1a2   : > { %v12077_v52 = vpop.f32.mrb[81].mxu1 }
 0x1a3   : > { %v12078_v54 = vadd.f32 %v12077_v52, %v12076_v48  ;;  %v12079_v56 = vpop.f32.mrb[82].mxu1 }
 0x1a4   : > { %v12080_v57 = vpop.f32.mrb[83].mxu1 }
 0x1a5   : > { %v12081_v58 = vadd.f32 %v12080_v57, %v12079_v56 }
 0x1a7   : > { %v16616_v61 = vpack.c.bf16 %v12081_v58, %v12078_v54 }
 0x1a9   : > { %v12082_v62 = vpop.f32.mrb[84].mxu1  ;;  %13397 = vmatmul.mubr.bf16.gmra.mrb[184].mxu1 %v16616_v61 }
 0x1aa   : > { %v12083_v63 = vpop.f32.mrb[85].mxu1 }
 0x1ab   : > { %v12084_v1 = vadd.f32 %v12083_v63, %v12082_v62  ;;  %v12085_v2 = vpop.f32.mrb[86].mxu1 }
 0x1ac   : > { %v12086_v3 = vpop.f32.mrb[87].mxu1 }
 0x1ad   : > { %v12087_v12 = vadd.f32 %v12086_v3, %v12085_v2  ;;  %v15726_v2 = vld [vmem:[%s18580_s5 + $0x88] sm:$0xff]  }
 0x1af   : > { %v16619_v15 = vpack.c.bf16 %v12087_v12, %v12084_v1 }
 0x1b1   : > { %v12088_v21 = vpop.f32.mrb[88].mxu1  ;;  %13400 = vmatprep.mubr.bf16.mxu1 %v16619_v15 }
 0x1b2   : > { %v12089_v23 = vpop.f32.mrb[89].mxu1 }
 0x1b3   : > { %v12090_v27 = vadd.f32 %v12089_v23, %v12088_v21  ;;  %v12091_v29 = vpop.f32.mrb[90].mxu1  ;;  %v16632_v21 = vld [vmem:[%s16227_s29] sm:$0xff]  }
 0x1b4   : > { %v12092_v48 = vpop.f32.mrb[91].mxu1 }
 0x1b5   : > { %v12093_v52 = vadd.f32 %v12092_v48, %v12091_v29 }
 0x1b7   : > { %v16622_v54 = vpack.c.bf16 %v12093_v52, %v12090_v27  ;;  %v16636_v27 = vld [vmem:[%s16227_s29 + $0x8] sm:$0xff]   ;;  %v15727_v52 = vld [vmem:[%s18580_s5 + $0x90] sm:$0xff]  }
 0x1b9   : > { %v12094_v56 = vpop.f32.mrb[92].mxu1  ;;  %13401 = vmatmul.mubr.bf16.gmra.mrb[188].mxu1 %v16622_v54 }
 0x1ba   : > { %v12095_v57 = vpop.f32.mrb[93].mxu1  ;;  %13420 = vmatprep.mubr.bf16.mxu1 %v18587_v5 }
 0x1bb   : > { %v12096_v58 = vadd.f32 %v12095_v57, %v12094_v56  ;;  %v12097_v62 = vpop.f32.mrb[94].mxu1 }
 0x1bc   : > { %v12098_v63 = vpop.f32.mrb[95].mxu1 }
 0x1bd   : > { %v12099_v1 = vadd.f32 %v12098_v63, %v12097_v62  ;;  %v15728_v62 = vld [vmem:[%s18580_s5 + $0x98] sm:$0xff]  }
 0x1bf   : > { %v16629_v3 = vpack.c.bf16 %v12099_v1, %v12096_v58  ;;  %v16649_v1 = vld [vmem:[%s16227_s29 + $0x10] sm:$0xff]  }
 0x1c1   : > { %v12116_v12 = vpop.f32.mrb[96].mxu1  ;;  %13421 = vmatmul.mubr.bf16.vlgmr.msra.gmra.mrb[160].mxu1 %v16632_v21 }
 0x1c2   : > { %v12117_v23 = vpop.f32.mrb[97].mxu1  ;;  %13424 = vmatprep.mubr.bf16.mxu1 %v16636_v27  ;;  %13453 = vmatpush3.bf16.msra.mxu1 %v16603_v46 }
 0x1c3   : > { %v12118_v29 = vadd.f32 %v12117_v23, %v12116_v12  ;;  %v12119_v48 = vpop.f32.mrb[98].mxu1  ;;  %13454 = vmatprep.subr.bf16.mxu1 %v15726_v2  ;;  %v16653_v12 = vld [vmem:[%s16227_s29 + $0x18] sm:$0xff]  }
 0x1c4   : > { %v12120_v56 = vpop.f32.mrb[99].mxu1 }
 0x1c5   : > { %v12121_v57 = vadd.f32 %v12120_v56, %v12119_v48 }
 0x1c6   : > { %13455 = vmatpush3.bf16.msra.mxu1 %v15726_v2 }
 0x1c7   : > { %v16643_v58 = vpack.c.bf16 %v12121_v57, %v12118_v29  ;;  %13456 = vmatprep.subr.bf16.mxu1 %v15727_v52  ;;  %v15729_v29 = vld [vmem:[%s18580_s5 + $0xa0] sm:$0xff]   ;;  %v15730_v57 = vld [vmem:[%s18580_s5 + $0xa8] sm:$0xff]  }
 0x1c9   : > { %v12122_v63 = vpop.f32.mrb[100].mxu1  ;;  %13425 = vmatmul.mubr.bf16.gmra.mrb[164].mxu1 %v16649_v1 }
 0x1ca   : > { %v12123_v46 = vpop.f32.mrb[101].mxu1  ;;  %13428 = vmatprep.mubr.bf16.mxu1 %v16653_v12  ;;  %13457 = vmatpush3.bf16.msra.mxu1 %v15727_v52 }
 0x1cb   : > { %v12124_v2 = vadd.f32 %v12123_v46, %v12122_v63  ;;  %v12125_v23 = vpop.f32.mrb[102].mxu1  ;;  %13458 = vmatprep.subr.bf16.mxu1 %v15728_v62  ;;  %v16669_v63 = vld [vmem:[%s16227_s29 + $0x28] sm:$0xff]  }
 0x1cc   : > { %v12126_v48 = vpop.f32.mrb[103].mxu1 }
 0x1cd   : > { %v12127_v56 = vadd.f32 %v12126_v48, %v12125_v23 }
 0x1ce   : > { %13459 = vmatpush3.bf16.msra.mxu1 %v15728_v62 }
 0x1cf   : > { %13460 = vmatprep.subr.bf16.mxu1 %v15729_v29  ;;  %v16662_v5 = vpack.c.bf16 %v12127_v56, %v12124_v2  ;;  %v15731_v2 = vld [vmem:[%s18580_s5 + $0xb0] sm:$0xff]   ;;  %v15732_v56 = vld [vmem:[%s18580_s5 + $0xb8] sm:$0xff]  }
 0x1d1   : > { %v12128_v55 = vpop.f32.mrb[104].mxu1  ;;  %13429 = vmatmul.mubr.bf16.gmra.mrb[168].mxu1 %v16665_v53 }
 0x1d2   : > { %v12129_v52 = vpop.f32.mrb[105].mxu1  ;;  %13432 = vmatprep.mubr.bf16.mxu1 %v16669_v63  ;;  %13461 = vmatpush3.bf16.msra.mxu1 %v15729_v29  ;;  %v16685_v29 = vld [vmem:[%s16227_s29 + $0x38] sm:$0xff]  }
 0x1d3   : > { %v12130_v62 = vadd.f32 %v12129_v52, %v12128_v55  ;;  %v12131_v46 = vpop.f32.mrb[106].mxu1  ;;  %13462 = vmatprep.subr.bf16.mxu1 %v15730_v57 }
 0x1d4   : > { %v12132_v23 = vpop.f32.mrb[107].mxu1 }
 0x1d5   : > { %v12133_v48 = vadd.f32 %v12132_v23, %v12131_v46 }
 0x1d6   : > { %13463 = vmatpush3.bf16.msra.mxu1 %v15730_v57 }
 0x1d7   : > { %13464 = vmatprep.subr.bf16.mxu1 %v15731_v2  ;;  %v16678_v51 = vpack.c.bf16 %v12133_v48, %v12130_v62  ;;  %v15733_v62 = vld [vmem:[%s18580_s5 + $0xc0] sm:$0xff]  }
 0x1d9   : > { %v12134_v50 = vpop.f32.mrb[108].mxu1  ;;  %13433 = vmatmul.mubr.bf16.gmra.mrb[172].mxu1 %v16681_v49 }
 0x1da   : > { %v12135_v55 = vpop.f32.mrb[109].mxu1  ;;  %13436 = vmatprep.mubr.bf16.mxu1 %v16685_v29  ;;  %13465 = vmatpush3.bf16.msra.mxu1 %v15731_v2  ;;  %v16698_v2 = vld [vmem:[%s16227_s29 + $0x48] sm:$0xff]  }
 0x1db   : > { %v12136_v57 = vadd.f32 %v12135_v55, %v12134_v50  ;;  %v12137_v52 = vpop.f32.mrb[110].mxu1  ;;  %13466 = vmatprep.subr.bf16.mxu1 %v15732_v56 }
 0x1dc   : > { %v12138_v46 = vpop.f32.mrb[111].mxu1 }
 0x1dd   : > { %v12139_v23 = vadd.f32 %v12138_v46, %v12137_v52 }
 0x1de   : > { %13467 = vmatpush3.bf16.msra.mxu1 %v15732_v56 }
 0x1df   : > { %v16691_v48 = vpack.c.bf16 %v12139_v23, %v12136_v57  ;;  %13500 = vmatprep.subr.bf16.mxu1 %v15733_v62  ;;  %v16704_v23 = vld [vmem:[%s16227_s29 + $0x50] sm:$0xff]  }
 0x1e1   : > { %v12140_v47 = vpop.f32.mrb[112].mxu1  ;;  %13437 = vmatmul.mubr.bf16.gmra.mrb[176].mxu1 %v16694_v45 }
 0x1e2   : > { %v12141_v50 = vpop.f32.mrb[113].mxu1  ;;  %13440 = vmatprep.mubr.bf16.mxu1 %v16698_v2 }
 0x1e3   : > { %v12142_v55 = vadd.f32 %v12141_v50, %v12140_v47  ;;  %v12143_v44 = vpop.f32.mrb[114].mxu1 }
 0x1e4   : > { %v12144_v52 = vpop.f32.mrb[115].mxu1 }
 0x1e5   : > { %v12145_v46 = vadd.f32 %v12144_v52, %v12143_v44 }
 0x1e7   : > { %v16701_v56 = vpack.c.bf16 %v12145_v46, %v12142_v55  ;;  %v16714_v55 = vld [vmem:[%s16227_s29 + $0x60] sm:$0xff]   ;;  %v16718_v46 = vld [vmem:[%s16227_s29 + $0x68] sm:$0xff]  }
 0x1e9   : > { %v12146_v57 = vpop.f32.mrb[116].mxu1  ;;  %13441 = vmatmul.mubr.bf16.gmra.mrb[180].mxu1 %v16704_v23 }
 0x1ea   : > { %v12147_v43 = vpop.f32.mrb[117].mxu1  ;;  %13444 = vmatprep.mubr.bf16.mxu1 %v16708_v41 }
 0x1eb   : > { %v12148_v39 = vadd.f32 %v12147_v43, %v12146_v57  ;;  %v12149_v38 = vpop.f32.mrb[118].mxu1 }
 0x1ec   : > { %v12150_v47 = vpop.f32.mrb[119].mxu1 }
 0x1ed   : > { %v12151_v50 = vadd.f32 %v12150_v47, %v12149_v38  ;;  %v16724_v38 = vld [vmem:[%s16227_s29 + $0x70] sm:$0xff]   ;;  %v18625_v47 = vmov 0  }
 0x1ef   : > { %v16711_v37 = vpack.c.bf16 %v12151_v50, %v12148_v39 }
 0x1f1   : > { %v12152_v44 = vpop.f32.mrb[120].mxu1  ;;  %13445 = vmatmul.mubr.bf16.gmra.mrb[184].mxu1 %v16714_v55 }
 0x1f2   : > { %v12153_v52 = vpop.f32.mrb[121].mxu1  ;;  %13448 = vmatprep.mubr.bf16.mxu1 %v16718_v46 }
 0x1f3   : > { %v12154_v35 = vadd.f32 %v12153_v52, %v12152_v44  ;;  %v12155_v33 = vpop.f32.mrb[122].mxu1 }
 0x1f4   : > { %v12156_v32 = vpop.f32.mrb[123].mxu1 }
 0x1f5   : > { %v12157_v43 = vadd.f32 %v12156_v32, %v12155_v33  ;;  %v15734_v32 = vld [vmem:[%s18580_s5 + $0xc8] sm:$0xff]  }
 0x1f7   : > { %v16721_v57 = vpack.c.bf16 %v12157_v43, %v12154_v35  ;;  %v15736_v43 = vld [vmem:[%s18580_s5 + $0xd8] sm:$0xff]  }
 0x1f9   : > { %v12158_v30 = vpop.f32.mrb[124].mxu1  ;;  %13449 = vmatmul.mubr.bf16.gmra.mrb[188].mxu1 %v16724_v38 }
 0x1fa   : > { %v12159_v39 = vpop.f32.mrb[125].mxu1  ;;  %13468 = vmatprep.mubr.bf16.mxu1 %v18625_v47 }
 0x1fb   : > { %v12160_v50 = vadd.f32 %v12159_v39, %v12158_v30  ;;  %v12161_v28 = vpop.f32.mrb[126].mxu1 }
 0x1fc   : > { %v12162_v26 = vpop.f32.mrb[127].mxu1 }
 0x1fd   : > { %v12163_v25 = vadd.f32 %v12162_v26, %v12161_v28  ;;  %v15735_v26 = vld [vmem:[%s18580_s5 + $0xd0] sm:$0xff]  }
 0x1ff   : > { %v16728_v24 = vpack.c.bf16 %v12163_v25, %v12160_v50 }
 0x201   : > { %v12164_v33 = vpop.f32.mrb[128].mxu1  ;;  %13469 = vmatmul.mubr.bf16.vlgmr.msra.gmra.mrb[160].mxu1 %v16643_v58 }
 0x202   : > { %v12165_v35 = vpop.f32.mrb[129].mxu1  ;;  %13472 = vmatprep.mubr.bf16.mxu1 %v16662_v5  ;;  %13501 = vmatpush3.bf16.msra.mxu1 %v15733_v62 }
 0x203   : > { %v12166_v44 = vadd.f32 %v12165_v35, %v12164_v33  ;;  %v12167_v52 = vpop.f32.mrb[130].mxu1  ;;  %13502 = vmatprep.subr.bf16.mxu1 %v15734_v32 }
 0x204   : > { %v12168_v25 = vpop.f32.mrb[131].mxu1 }
 0x205   : > { %v12169_v28 = vadd.f32 %v12168_v25, %v12167_v52  ;;  %v15738_v25 = vld [vmem:[%s18580_s5 + $0xe8] sm:$0xff]  }
 0x206   : > { %13503 = vmatpush3.bf16.msra.mxu1 %v15734_v32  ;;  %v15737_v32 = vld [vmem:[%s18580_s5 + $0xe0] sm:$0xff]  }
 0x207   : > { %v16738_v30 = vpack.c.bf16 %v12169_v28, %v12166_v44  ;;  %13504 = vmatprep.subr.bf16.mxu1 %v15735_v26 }
 0x209   : > { %v12170_v39 = vpop.f32.mrb[132].mxu1  ;;  %13473 = vmatmul.mubr.bf16.gmra.mrb[164].mxu1 %v16678_v51 }
 0x20a   : > { %v12171_v62 = vpop.f32.mrb[133].mxu1  ;;  %13476 = vmatprep.mubr.bf16.mxu1 %v16691_v48  ;;  %13505 = vmatpush3.bf16.msra.mxu1 %v15735_v26 }
 0x20b   : > { %v12172_v50 = vadd.f32 %v12171_v62, %v12170_v39  ;;  %v12173_v33 = vpop.f32.mrb[134].mxu1  ;;  %13506 = vmatprep.subr.bf16.mxu1 %v15736_v43 }
 0x20c   : > { %v12174_v35 = vpop.f32.mrb[135].mxu1 }
 0x20d   : > { %v12175_v44 = vadd.f32 %v12174_v35, %v12173_v33 }
 0x20e   : > { %13507 = vmatpush3.bf16.msra.mxu1 %v15736_v43  ;;  %v15739_v43 = vld [vmem:[%s18580_s5 + $0xf0] sm:$0xff]  }
 0x20f   : > { %v16748_v52 = vpack.c.bf16 %v12175_v44, %v12172_v50  ;;  %13508 = vmatprep.subr.bf16.mxu1 %v15737_v32  ;;  %v15740_v44 = vld [vmem:[%s18580_s5 + $0xf8] sm:$0xff]  }
 0x211   : > { %v12176_v28 = vpop.f32.mrb[136].mxu1  ;;  %13477 = vmatmul.mubr.bf16.gmra.mrb[168].mxu1 %v16701_v56 }
 0x212   : > { %v12177_v26 = vpop.f32.mrb[137].mxu1  ;;  %13480 = vmatprep.mubr.bf16.mxu1 %v16711_v37  ;;  %13509 = vmatpush3.bf16.msra.mxu1 %v15737_v32 }
 0x213   : > { %v12178_v39 = vadd.f32 %v12177_v26, %v12176_v28  ;;  %v12179_v62 = vpop.f32.mrb[138].mxu1  ;;  %13510 = vmatprep.subr.bf16.mxu1 %v15738_v25 }
 0x214   : > { %v12180_v50 = vpop.f32.mrb[139].mxu1 }
 0x215   : > { %v12181_v33 = vadd.f32 %v12180_v50, %v12179_v62 }
 0x216   : > { %13511 = vmatpush3.bf16.msra.mxu1 %v15738_v25  ;;  %v15741_v25 = vld [vmem:[%s18580_s5 + $0x100] sm:$0xff]  }
 0x217   : > { %v16758_v35 = vpack.c.bf16 %v12181_v33, %v12178_v39  ;;  %13512 = vmatprep.subr.bf16.mxu1 %v15739_v43 }
 0x219   : > { %v12182_v22 = vpop.f32.mrb[140].mxu1  ;;  %13481 = vmatmul.mubr.bf16.gmra.mrb[172].mxu1 %v16721_v57 }
 0x21a   : > { %v12183_v32 = vpop.f32.mrb[141].mxu1  ;;  %13484 = vmatprep.mubr.bf16.mxu1 %v16728_v24  ;;  %13513 = vmatpush3.bf16.msra.mxu1 %v15739_v43 }
 0x21b   : > { %v12184_v28 = vadd.f32 %v12183_v32, %v12182_v22  ;;  %v12185_v26 = vpop.f32.mrb[142].mxu1  ;;  %13514 = vmatprep.subr.bf16.mxu1 %v15740_v44 }
 0x21c   : > { %v12186_v39 = vpop.f32.mrb[143].mxu1 }
 0x21d   : > { %v12187_v62 = vadd.f32 %v12186_v39, %v12185_v26 }
 0x21e   : > { %13515 = vmatpush3.bf16.msra.mxu1 %v15740_v44 }
 0x21f   : > { %v16768_v50 = vpack.c.bf16 %v12187_v62, %v12184_v28  ;;  %13548 = vmatprep.subr.bf16.mxu1 %v15741_v25 }
 0x221   : > { %v12188_v33 = vpop.f32.mrb[144].mxu1  ;;  %13485 = vmatmul.mubr.bf16.gmra.mrb[176].mxu1 %v16738_v30 }
 0x222   : > { %v12189_v20 = vpop.f32.mrb[145].mxu1  ;;  %13488 = vmatprep.mubr.bf16.mxu1 %v16748_v52 }
 0x223   : > { %v12190_v43 = vadd.f32 %v12189_v20, %v12188_v33  ;;  %v12191_v22 = vpop.f32.mrb[146].mxu1 }
 0x224   : > { %v12192_v32 = vpop.f32.mrb[147].mxu1 }
 0x225   : > { %v12193_v19 = vadd.f32 %v12192_v32, %v12191_v22 }
 0x227   : > { %v16772_v18 = vpack.c.bf16 %v12193_v19, %v12190_v43 }
 0x229   : > { %v12194_v17 = vpop.f32.mrb[148].mxu1  ;;  %13489 = vmatmul.mubr.bf16.gmra.mrb[180].mxu1 %v16758_v35 }
 0x22a   : > { %v12195_v26 = vpop.f32.mrb[149].mxu1  ;;  %13492 = vmatprep.mubr.bf16.mxu1 %v16768_v50 }
 0x22b   : > { %v12196_v44 = vadd.f32 %v12195_v26, %v12194_v17  ;;  %v12197_v28 = vpop.f32.mrb[150].mxu1 }
 0x22c   : > { %v12198_v39 = vpop.f32.mrb[151].mxu1 }
 0x22d   : > { %v12199_v62 = vadd.f32 %v12198_v39, %v12197_v28 }
 0x22f   : > { %v16776_v16 = vpack.c.bf16 %v12199_v62, %v12196_v44 }
 0x231   : > { %v12200_v14 = vpop.f32.mrb[152].mxu1  ;;  %13493 = vmatmul.mubr.bf16.gmra.mrb[184].mxu1 %v16772_v18 }
 0x232   : > { %v12201_v20 = vpop.f32.mrb[153].mxu1  ;;  %13496 = vmatprep.mubr.bf16.mxu1 %v16776_v16 }
 0x233   : > { %v12202_v19 = vadd.f32 %v12201_v20, %v12200_v14  ;;  %v12203_v33 = vpop.f32.mrb[154].mxu1  ;;  %v15744_v20 = vld [vmem:[%s18580_s5 + $0x118] sm:$0xff]  }
 0x234   : > { %v12204_v43 = vpop.f32.mrb[155].mxu1 }
 0x235   : > { %v12205_v22 = vadd.f32 %v12204_v43, %v12203_v33  ;;  %v15748_v33 = vld [vmem:[%s18580_s5 + $0x138] sm:$0xff]   ;;  %v15749_v43 = vld [vmem:[%s18580_s5 + $0x140] sm:$0xff]  }
 0x237   : > { %v16780_v32 = vpack.c.bf16 %v12205_v22, %v12202_v19  ;;  %v15747_v19 = vld [vmem:[%s18580_s5 + $0x130] sm:$0xff]   ;;  %v15750_v22 = vld [vmem:[%s18580_s5 + $0x148] sm:$0xff]  }
 0x239   : > { %13497 = vmatmul.mubr.bf16.gmra.mrb[188].mxu1 %v16780_v32  ;;  %v12206_v17 = vpop.f32.mrb[156].mxu1 }
 0x23a   : > { %13516 = vmatprep.mubr.bf16.mxu1 %v16530_v0  ;;  %v12207_v26 = vpop.f32.mrb[157].mxu1  ;;  %v15743_v0 = vld [vmem:[%s18580_s5 + $0x110] sm:$0xff]  }
 0x23b   : > { %v12208_v44 = vadd.f32 %v12207_v26, %v12206_v17  ;;  %v12209_v28 = vpop.f32.mrb[158].mxu1  ;;  %v15751_v17 = vld [vmem:[%s18580_s5 + $0x150] sm:$0xff]   ;;  %v15753_v26 = vld [vmem:[%s18580_s5 + $0x160] sm:$0xff]  }
 0x23c   : > { %v12210_v39 = vpop.f32.mrb[159].mxu1 }
 0x23d   : > { %v12211_v62 = vadd.f32 %v12210_v39, %v12209_v28  ;;  %v15755_v28 = vld [vmem:[%s18580_s5 + $0x170] sm:$0xff]   ;;  %v15756_v39 = vld [vmem:[%s18580_s5 + $0x178] sm:$0xff]  }
 0x23f   : > { %v16787_v14 = vpack.c.bf16 %v12211_v62, %v12208_v44  ;;  %v15754_v44 = vld [vmem:[%s18580_s5 + $0x168] sm:$0xff]   ;;  %v15757_v62 = vld [vmem:[%s18580_s5 + $0x180] sm:$0xff]  }
 0x241   : > { %13517 = vmatmul.mubr.bf16.vlgmr.msra.gmra.mrb[160].mxu1 %v16538_v13 }
 0x242   : > { %13520 = vmatprep.mubr.bf16.mxu1 %v16546_v42  ;;  %13549 = vmatpush3.bf16.msra.mxu1 %v15741_v25  ;;  %v15745_v25 = vld [vmem:[%s18580_s5 + $0x120] sm:$0xff]  }
 0x243   : > { %13550 = vmatprep.subr.bf16.mxu1 %v15742_v11 }
 0x246   : > { %13551 = vmatpush3.bf16.msra.mxu1 %v15742_v11  ;;  %v15746_v11 = vld [vmem:[%s18580_s5 + $0x128] sm:$0xff]  }
 0x247   : > { %13552 = vmatprep.subr.bf16.mxu1 %v15743_v0 }
 0x249   : > { %13521 = vmatmul.mubr.bf16.gmra.mrb[164].mxu1 %v16554_v60 }
 0x24a   : > { %13524 = vmatprep.mubr.bf16.mxu1 %v16560_v6  ;;  %13553 = vmatpush3.bf16.msra.mxu1 %v15743_v0  ;;  %v16865_v0 = vld [vmem:[%s16227_s29 + $0x78] sm:$0xff]  }
 0x24b   : > { %13554 = vmatprep.subr.bf16.mxu1 %v15744_v20 }
 0x24e   : > { %13555 = vmatpush3.bf16.msra.mxu1 %v15744_v20  ;;  %v15758_v20 = vld [vmem:[%s18580_s5 + $0x188] sm:$0xff]  }
 0x24f   : > { %13556 = vmatprep.subr.bf16.mxu1 %v15745_v25 }
 0x251   : > { %13525 = vmatmul.mubr.bf16.gmra.mrb[168].mxu1 %v16567_v34 }
 0x252   : > { %13528 = vmatprep.mubr.bf16.mxu1 %v16578_v31  ;;  %13557 = vmatpush3.bf16.msra.mxu1 %v15745_v25  ;;  %v15759_v25 = vld [vmem:[%s18580_s5 + $0x190] sm:$0xff]  }
 0x253   : > { %13558 = vmatprep.subr.bf16.mxu1 %v15746_v11 }
 0x256   : > { %13559 = vmatpush3.bf16.msra.mxu1 %v15746_v11  ;;  %v15761_v11 = vld [vmem:[%s18580_s5 + $0x1a0] sm:$0xff]  }
 0x257   : > { %13560 = vmatprep.subr.bf16.mxu1 %v15747_v19 }
 0x259   : > { %13529 = vmatmul.mubr.bf16.gmra.mrb[172].mxu1 %v16588_v4 }
 0x25a   : > { %13532 = vmatprep.mubr.bf16.mxu1 %v16598_v40  ;;  %13561 = vmatpush3.bf16.msra.mxu1 %v15747_v19  ;;  %v15762_v19 = vld [vmem:[%s18580_s5 + $0x1a8] sm:$0xff]  }
 0x25b   : > { %13562 = vmatprep.subr.bf16.mxu1 %v15748_v33 }
 0x25e   : > { %13563 = vmatpush3.bf16.msra.mxu1 %v15748_v33  ;;  %v15763_v33 = vld [vmem:[%s18580_s5 + $0x1b0] sm:$0xff]  }
 0x25f   : > { %13596 = vmatprep.subr.bf16.mxu1 %v15749_v43 }
 0x261   : > { %13533 = vmatmul.mubr.bf16.gmra.mrb[176].mxu1 %v16607_v59 }
 0x262   : > { %13536 = vmatprep.mubr.bf16.mxu1 %v16610_v8 }
 0x269   : > { %13537 = vmatmul.mubr.bf16.gmra.mrb[180].mxu1 %v16613_v36 }
 0x26a   : > { %13540 = vmatprep.mubr.bf16.mxu1 %v16616_v61 }
 0x271   : > { %13541 = vmatmul.mubr.bf16.gmra.mrb[184].mxu1 %v16619_v15 }
 0x272   : > { %13544 = vmatprep.mubr.bf16.mxu1 %v16622_v54 }
 0x279   : > { %13545 = vmatmul.mubr.bf16.gmra.mrb[188].mxu1 %v16629_v3 }
 0x27a   : > { %13564 = vmatprep.mubr.bf16.mxu1 %v16632_v21  ;;  %v15752_v21 = vld [vmem:[%s18580_s5 + $0x158] sm:$0xff]  }
 0x281   : > { %13565 = vmatmul.mubr.bf16.vlgmr.msra.gmra.mrb[160].mxu1 %v16636_v27 }
 0x282   : > { %13568 = vmatprep.mubr.bf16.mxu1 %v16649_v1  ;;  %13597 = vmatpush3.bf16.msra.mxu1 %v15749_v43  ;;  %v15764_v43 = vld [vmem:[%s18580_s5 + $0x1b8] sm:$0xff]  }
 0x283   : > { %13598 = vmatprep.subr.bf16.mxu1 %v15750_v22 }
 0x286   : > { %13599 = vmatpush3.bf16.msra.mxu1 %v15750_v22  ;;  %v15765_v22 = vld [vmem:[%s18580_s5 + $0x1c0] sm:$0xff]  }
 0x287   : > { %13600 = vmatprep.subr.bf16.mxu1 %v15751_v17 }
 0x289   : > { %13569 = vmatmul.mubr.bf16.gmra.mrb[164].mxu1 %v16653_v12 }
 0x28a   : > { %13572 = vmatprep.mubr.bf16.mxu1 %v16665_v53  ;;  %13601 = vmatpush3.bf16.msra.mxu1 %v15751_v17  ;;  %v15766_v17 = vld [vmem:[%s18580_s5 + $0x1c8] sm:$0xff]  }
 0x28b   : > { %13602 = vmatprep.subr.bf16.mxu1 %v15752_v21 }
 0x28e   : > { %13603 = vmatpush3.bf16.msra.mxu1 %v15752_v21  ;;  %v15767_v21 = vld [vmem:[%s18580_s5 + $0x1d0] sm:$0xff]  }
 0x28f   : > { %13604 = vmatprep.subr.bf16.mxu1 %v15753_v26 }
 0x291   : > { %13573 = vmatmul.mubr.bf16.gmra.mrb[168].mxu1 %v16669_v63 }
 0x292   : > { %13576 = vmatprep.mubr.bf16.mxu1 %v16681_v49  ;;  %13605 = vmatpush3.bf16.msra.mxu1 %v15753_v26 }
 0x293   : > { %13606 = vmatprep.subr.bf16.mxu1 %v15754_v44 }
 0x296   : > { %13607 = vmatpush3.bf16.msra.mxu1 %v15754_v44 }
 0x297   : > { %13608 = vmatprep.subr.bf16.mxu1 %v15755_v28 }
 0x299   : > { %13577 = vmatmul.mubr.bf16.gmra.mrb[172].mxu1 %v16685_v29 }
 0x29a   : > { %13580 = vmatprep.mubr.bf16.mxu1 %v16694_v45  ;;  %13609 = vmatpush3.bf16.msra.mxu1 %v15755_v28 }
 0x29b   : > { %13610 = vmatprep.subr.bf16.mxu1 %v15756_v39 }
 0x29e   : > { %13611 = vmatpush3.bf16.msra.mxu1 %v15756_v39 }
 0x29f   : > { %13644 = vmatprep.subr.bf16.mxu1 %v15757_v62 }
 0x2a1   : > { %13581 = vmatmul.mubr.bf16.gmra.mrb[176].mxu1 %v16698_v2 }
 0x2a2   : > { %13584 = vmatprep.mubr.bf16.mxu1 %v16704_v23 }
 0x2a9   : > { %13585 = vmatmul.mubr.bf16.gmra.mrb[180].mxu1 %v16708_v41 }
 0x2aa   : > { %13588 = vmatprep.mubr.bf16.mxu1 %v16714_v55 }
 0x2b1   : > { %13589 = vmatmul.mubr.bf16.gmra.mrb[184].mxu1 %v16718_v46 }
 0x2b2   : > { %13592 = vmatprep.mubr.bf16.mxu1 %v16724_v38 }
 0x2b9   : > { %13593 = vmatmul.mubr.bf16.gmra.mrb[188].mxu1 %v16865_v0 }
 0x2ba   : > { %13612 = vmatprep.mubr.bf16.mxu1 %v16643_v58  ;;  %v15760_v58 = vld [vmem:[%s18580_s5 + $0x198] sm:$0xff]  }
 0x2c1   : > { %13613 = vmatmul.mubr.bf16.vlgmr.msra.gmra.mrb[160].mxu1 %v16662_v5 }
 0x2c2   : > { %13616 = vmatprep.mubr.bf16.mxu1 %v16678_v51  ;;  %13645 = vmatpush3.bf16.msra.mxu1 %v15757_v62 }
 0x2c3   : > { %13646 = vmatprep.subr.bf16.mxu1 %v15758_v20 }
 0x2c6   : > { %13647 = vmatpush3.bf16.msra.mxu1 %v15758_v20 }
 0x2c7   : > { %13648 = vmatprep.subr.bf16.mxu1 %v15759_v25 }
 0x2c9   : > { %13617 = vmatmul.mubr.bf16.gmra.mrb[164].mxu1 %v16691_v48 }
 0x2ca   : > { %13620 = vmatprep.mubr.bf16.mxu1 %v16701_v56  ;;  %13649 = vmatpush3.bf16.msra.mxu1 %v15759_v25 }
 0x2cb   : > { %13650 = vmatprep.subr.bf16.mxu1 %v15760_v58 }
 0x2ce   : > { %13651 = vmatpush3.bf16.msra.mxu1 %v15760_v58 }
 0x2cf   : > { %13652 = vmatprep.subr.bf16.mxu1 %v15761_v11 }
 0x2d1   : > { %13621 = vmatmul.mubr.bf16.gmra.mrb[168].mxu1 %v16711_v37 }
 0x2d2   : > { %13624 = vmatprep.mubr.bf16.mxu1 %v16721_v57  ;;  %13653 = vmatpush3.bf16.msra.mxu1 %v15761_v11 }
 0x2d3   : > { %13654 = vmatprep.subr.bf16.mxu1 %v15762_v19 }
 0x2d6   : > { %13655 = vmatpush3.bf16.msra.mxu1 %v15762_v19 }
 0x2d7   : > { %13656 = vmatprep.subr.bf16.mxu1 %v15763_v33 }
 0x2d9   : > { %13625 = vmatmul.mubr.bf16.gmra.mrb[172].mxu1 %v16728_v24 }
 0x2da   : > { %13628 = vmatprep.mubr.bf16.mxu1 %v16738_v30  ;;  %13657 = vmatpush3.bf16.msra.mxu1 %v15763_v33 }
 0x2db   : > { %13658 = vmatprep.subr.bf16.mxu1 %v15764_v43 }
 0x2de   : > { %13659 = vmatpush3.bf16.msra.mxu1 %v15764_v43 }
 0x2df   : > { %13692 = vmatprep.subr.bf16.mxu1 %v15765_v22 }
 0x2e1   : > { %13629 = vmatmul.mubr.bf16.gmra.mrb[176].mxu1 %v16748_v52 }
 0x2e2   : > { %13632 = vmatprep.mubr.bf16.mxu1 %v16758_v35 }
 0x2e9   : > { %13633 = vmatmul.mubr.bf16.gmra.mrb[180].mxu1 %v16768_v50 }
 0x2ea   : > { %13636 = vmatprep.mubr.bf16.mxu1 %v16772_v18 }
 0x2f1   : > { %13637 = vmatmul.mubr.bf16.gmra.mrb[184].mxu1 %v16776_v16 }
 0x2f2   : > { %13640 = vmatprep.mubr.bf16.mxu1 %v16780_v32 }
 0x2f9   : > { %13641 = vmatmul.mubr.bf16.gmra.mrb[188].mxu1 %v16787_v14 }
 0x2fa   : > { %13660 = vmatprep.mubr.bf16.mxu1 %v16538_v13  ;;  %v15768_v13 = vld [vmem:[%s18580_s5 + $0x1d8] sm:$0xff]  }
 0x301   : > { %13661 = vmatmul.mubr.bf16.vlgmr.msra.gmra.mrb[160].mxu1 %v16546_v42  ;;  %v15769_v42 = vld [vmem:[%s18580_s5 + $0x1e0] sm:$0xff]  }
 0x302   : > { %13664 = vmatprep.mubr.bf16.mxu1 %v16554_v60  ;;  %13693 = vmatpush3.bf16.msra.mxu1 %v15765_v22  ;;  %v15770_v60 = vld [vmem:[%s18580_s5 + $0x1e8] sm:$0xff]  }
 0x303   : > { %13694 = vmatprep.subr.bf16.mxu1 %v15766_v17 }
 0x306   : > { %13695 = vmatpush3.bf16.msra.mxu1 %v15766_v17 }
 0x307   : > { %13696 = vmatprep.subr.bf16.mxu1 %v15767_v21 }
 0x309   : > { %13665 = vmatmul.mubr.bf16.gmra.mrb[164].mxu1 %v16560_v6  ;;  %v15771_v6 = vld [vmem:[%s18580_s5 + $0x1f0] sm:$0xff]  }
 0x30a   : > { %13668 = vmatprep.mubr.bf16.mxu1 %v16567_v34  ;;  %13697 = vmatpush3.bf16.msra.mxu1 %v15767_v21  ;;  %v15772_v34 = vld [vmem:[%s18580_s5 + $0x1f8] sm:$0xff]  }
 0x30b   : > { %13698 = vmatprep.subr.bf16.mxu1 %v15768_v13 }
 0x30e   : > { %13699 = vmatpush3.bf16.msra.mxu1 %v15768_v13 }
 0x30f   : > { %13700 = vmatprep.subr.bf16.mxu1 %v15769_v42 }
 0x311   : > { %13669 = vmatmul.mubr.bf16.gmra.mrb[168].mxu1 %v16578_v31  ;;  %v15773_v31 = vld [vmem:[%s18580_s5 + $0x200] sm:$0xff]  }
 0x312   : > { %13672 = vmatprep.mubr.bf16.mxu1 %v16588_v4  ;;  %13701 = vmatpush3.bf16.msra.mxu1 %v15769_v42  ;;  %v15774_v4 = vld [vmem:[%s18580_s5 + $0x208] sm:$0xff]  }
 0x313   : > { %13702 = vmatprep.subr.bf16.mxu1 %v15770_v60 }
 0x316   : > { %13703 = vmatpush3.bf16.msra.mxu1 %v15770_v60 }
 0x317   : > { %13704 = vmatprep.subr.bf16.mxu1 %v15771_v6 }
 0x319   : > { %13673 = vmatmul.mubr.bf16.gmra.mrb[172].mxu1 %v16598_v40  ;;  %v15775_v40 = vld [vmem:[%s18580_s5 + $0x210] sm:$0xff]  }
 0x31a   : > { %13676 = vmatprep.mubr.bf16.mxu1 %v16607_v59  ;;  %13705 = vmatpush3.bf16.msra.mxu1 %v15771_v6  ;;  %v15776_v59 = vld [vmem:[%s18580_s5 + $0x218] sm:$0xff]  }
 0x31b   : > { %13706 = vmatprep.subr.bf16.mxu1 %v15772_v34 }
 0x31e   : > { %13707 = vmatpush3.bf16.msra.mxu1 %v15772_v34 }
 0x31f   : > { %13740 = vmatprep.subr.bf16.mxu1 %v15773_v31 }
 0x321   : > { %13677 = vmatmul.mubr.bf16.gmra.mrb[176].mxu1 %v16610_v8  ;;  %v15777_v8 = vld [vmem:[%s18580_s5 + $0x220] sm:$0xff]  }
 0x322   : > { %13680 = vmatprep.mubr.bf16.mxu1 %v16613_v36  ;;  %v15778_v36 = vld [vmem:[%s18580_s5 + $0x228] sm:$0xff]  }
 0x329   : > { %13681 = vmatmul.mubr.bf16.gmra.mrb[180].mxu1 %v16616_v61  ;;  %v15780_v61 = vld [vmem:[%s18580_s5 + $0x238] sm:$0xff]  }
 0x32a   : > { %13684 = vmatprep.mubr.bf16.mxu1 %v16619_v15 }
 0x331   : > { %13685 = vmatmul.mubr.bf16.gmra.mrb[184].mxu1 %v16622_v54 }
 0x332   : > { %13688 = vmatprep.mubr.bf16.mxu1 %v16629_v3 }
 0x339   : > { %13689 = vmatmul.mubr.bf16.gmra.mrb[188].mxu1 %v18625_v47 }
 0x33a   : > { %13708 = vmatprep.mubr.bf16.mxu1 %v16636_v27 }
 0x341   : > { %13709 = vmatmul.mubr.bf16.vlgmr.msra.gmra.mrb[160].mxu1 %v16649_v1 }
 0x342   : > { %13712 = vmatprep.mubr.bf16.mxu1 %v16653_v12  ;;  %13741 = vmatpush3.bf16.msra.mxu1 %v15773_v31 }
 0x343   : > { %13742 = vmatprep.subr.bf16.mxu1 %v15774_v4 }
 0x346   : > { %13743 = vmatpush3.bf16.msra.mxu1 %v15774_v4 }
 0x347   : > { %13744 = vmatprep.subr.bf16.mxu1 %v15775_v40 }
 0x349   : > { %13713 = vmatmul.mubr.bf16.gmra.mrb[164].mxu1 %v16665_v53  ;;  %v15779_v53 = vld [vmem:[%s18580_s5 + $0x230] sm:$0xff]  }
 0x34a   : > { %13716 = vmatprep.mubr.bf16.mxu1 %v16669_v63  ;;  %13745 = vmatpush3.bf16.msra.mxu1 %v15775_v40 }
 0x34b   : > { %13746 = vmatprep.subr.bf16.mxu1 %v15776_v59 }
 0x34e   : > { %13747 = vmatpush3.bf16.msra.mxu1 %v15776_v59 }
 0x34f   : > { %13748 = vmatprep.subr.bf16.mxu1 %v15777_v8 }
 0x351   : > { %13717 = vmatmul.mubr.bf16.gmra.mrb[168].mxu1 %v16681_v49 }
 0x352   : > { %13720 = vmatprep.mubr.bf16.mxu1 %v16685_v29  ;;  %13749 = vmatpush3.bf16.msra.mxu1 %v15777_v8 }
 0x353   : > { %13750 = vmatprep.subr.bf16.mxu1 %v15778_v36 }
 0x356   : > { %13751 = vmatpush3.bf16.msra.mxu1 %v15778_v36 }
 0x357   : > { %13752 = vmatprep.subr.bf16.mxu1 %v15779_v53 }
 0x359   : > { %13721 = vmatmul.mubr.bf16.gmra.mrb[172].mxu1 %v16694_v45 }
 0x35a   : > { %13724 = vmatprep.mubr.bf16.mxu1 %v16698_v2  ;;  %13753 = vmatpush3.bf16.msra.mxu1 %v15779_v53 }
 0x35b   : > { %13754 = vmatprep.subr.bf16.mxu1 %v15780_v61 }
 0x35e   : > { %13755 = vmatpush3.bf16.msra.mxu1 %v15780_v61 }
 0x361   : > { %13725 = vmatmul.mubr.bf16.gmra.mrb[176].mxu1 %v16704_v23 }
 0x362   : > { %13728 = vmatprep.mubr.bf16.mxu1 %v16708_v41 }
 0x369   : > { %13729 = vmatmul.mubr.bf16.gmra.mrb[180].mxu1 %v16714_v55 }
 0x36a   : > { %13732 = vmatprep.mubr.bf16.mxu1 %v16718_v46 }
 0x371   : > { %13733 = vmatmul.mubr.bf16.gmra.mrb[184].mxu1 %v16724_v38 }
 0x372   : > { %13736 = vmatprep.mubr.bf16.mxu1 %v16865_v0 }
 0x379   : > { %13737 = vmatmul.mubr.bf16.gmra.mrb[188].mxu1 %v18625_v47 }
 0x37a   : > { %13756 = vmatprep.mubr.bf16.mxu1 %v16662_v5 }
 0x381   : > { %13757 = vmatmul.mubr.bf16.vlgmr.msra.gmra.mrb[160].mxu1 %v16678_v51 }
 0x382   : > { %13760 = vmatprep.mubr.bf16.mxu1 %v16691_v48 }
 0x389   : > { %13761 = vmatmul.mubr.bf16.gmra.mrb[164].mxu1 %v16701_v56 }
 0x38a   : > { %13764 = vmatprep.mubr.bf16.mxu1 %v16711_v37  ;;  %v17007_v37 = vld [vmem:[%s18581_s6] ss:$0 sm:$0xff] }
 0x391   : > { %13765 = vmatmul.mubr.bf16.gmra.mrb[168].mxu1 %v16721_v57 }
 0x392   : > { %13768 = vmatprep.mubr.bf16.mxu1 %v16728_v24  ;;  %v15783_v24 = vld [vmem:[%s18576_s1 + $0x4] ss:$8 sps:$4 sm:$0xff]  }
 0x399   : > { %13769 = vmatmul.mubr.bf16.gmra.mrb[172].mxu1 %v16738_v30 }
 0x39a   : > { %13772 = vmatprep.mubr.bf16.mxu1 %v16748_v52 }
 0x3a1   : > { %13773 = vmatmul.mubr.bf16.gmra.mrb[176].mxu1 %v16758_v35 }
 0x3a2   : > { %13776 = vmatprep.mubr.bf16.mxu1 %v16768_v50 }
 0x3a9   : > { %13777 = vmatmul.mubr.bf16.gmra.mrb[180].mxu1 %v16772_v18 }
 0x3aa   : > { %13780 = vmatprep.mubr.bf16.mxu1 %v16776_v16 }
 0x3b1   : > { %13781 = vmatmul.mubr.bf16.gmra.mrb[184].mxu1 %v16780_v32 }
 0x3b2   : > { %13784 = vmatprep.mubr.bf16.mxu1 %v16787_v14 }
 0x3b9   : > { %13785 = vmatmul.mubr.bf16.gmra.mrb[188].mxu1 %v18625_v47 }
 0x3ba   : > { %4320 = vmatprep.mubr.bf16.mxu1 %v15783_v24 }
 0x454   : > { %v13758_v41 = vpop.f32.mrb[160].mxu1 }
 0x455   : > { %v14748_v18 = vadd.f32 %v13758_v41, %v17007_v37  ;;  %v3889_v16 = vpop.f32.mrb[161].mxu1 }
 0x456   : > { %v14749_v45 = vadd.f32 %v17007_v37, %v3889_v16  ;;  %v13759_v49 = vpop.f32.mrb[162].mxu1  ;;  %v15819_v16 = vld [vmem:[%s18577_s2 + $0x4] ss:$8 sps:$4 sm:$0xff]  }
 0x457   : > { %v14750_v51 = vadd.f32 %v13759_v49, %v17007_v37  ;;  %v3892_v5 = vpop.f32.mrb[163].mxu1  ;;  %v4050_v54 = vmax.f32 %v14748_v18, 0.0  ;;  %4689 = vmatprep.mubr.bf16.mxu0 %v15819_v16 }
 0x458   : > { %v14751_v15 = vadd.f32 %v17007_v37, %v3892_v5  ;;  %v4048_v27 = vmax.f32 %v14749_v45, 0.0 }
 0x459   : > { %v4051_v3 = vmax.f32 %v14750_v51, 0.0 }
 0x45a   : > { %v4049_v1 = vmax.f32 %v14751_v15, 0.0 }
 0x45b   : > { %v17013_v12 = vpack.c.bf16 %v4051_v3, %v4050_v54 }
 0x45c   : > { %v17015_v63 = vpack.c.bf16 %v4049_v1, %v4048_v27  ;;  %v13762_v29 = vpop.f32.mrb[164].mxu1 }
 0x45d   : > { %v14752_v48 = vadd.f32 %v13762_v29, %v17007_v37  ;;  %v3905_v2 = vpop.f32.mrb[165].mxu1 }
 0x45e   : > { %v14753_v56 = vadd.f32 %v17007_v37, %v3905_v2  ;;  %v13763_v23 = vpop.f32.mrb[166].mxu1 }
 0x45f   : > { %v14754_v55 = vadd.f32 %v13763_v23, %v17007_v37  ;;  %v3908_v46 = vpop.f32.mrb[167].mxu1  ;;  %v4054_v38 = vmax.f32 %v14752_v48, 0.0 }
 0x460   : > { %v14755_v57 = vadd.f32 %v17007_v37, %v3908_v46  ;;  %v4052_v52 = vmax.f32 %v14753_v56, 0.0 }
 0x461   : > { %v4055_v30 = vmax.f32 %v14754_v55, 0.0 }
 0x462   : > { %v4053_v35 = vmax.f32 %v14755_v57, 0.0 }
 0x463   : > { %v17021_v50 = vpack.c.bf16 %v4055_v30, %v4054_v38 }
 0x464   : > { %v17023_v32 = vpack.c.bf16 %v4053_v35, %v4052_v52  ;;  %v13766_v14 = vpop.f32.mrb[168].mxu1 }
 0x465   : > { %v14756_v26 = vadd.f32 %v13766_v14, %v17007_v37  ;;  %v3921_v44 = vpop.f32.mrb[169].mxu1 }
 0x466   : > { %v14757_v28 = vadd.f32 %v17007_v37, %v3921_v44  ;;  %v13767_v39 = vpop.f32.mrb[170].mxu1 }
 0x467   : > { %v14758_v62 = vadd.f32 %v13767_v39, %v17007_v37  ;;  %v3924_v0 = vpop.f32.mrb[171].mxu1  ;;  %v4058_v25 = vmax.f32 %v14756_v26, 0.0 }
 0x468   : > { %v14759_v20 = vadd.f32 %v17007_v37, %v3924_v0  ;;  %v4056_v11 = vmax.f32 %v14757_v28, 0.0 }
 0x469   : > { %v4059_v58 = vmax.f32 %v14758_v62, 0.0 }
 0x46a   : > { %v4057_v19 = vmax.f32 %v14759_v20, 0.0 }
 0x46b   : > { %v17029_v33 = vpack.c.bf16 %v4059_v58, %v4058_v25 }
 0x46c   : > { %v17031_v43 = vpack.c.bf16 %v4057_v19, %v4056_v11  ;;  %v13770_v22 = vpop.f32.mrb[172].mxu1 }
 0x46d   : > { %v14760_v17 = vadd.f32 %v13770_v22, %v17007_v37  ;;  %v3937_v21 = vpop.f32.mrb[173].mxu1 }
 0x46e   : > { %v14761_v13 = vadd.f32 %v17007_v37, %v3937_v21  ;;  %v13771_v42 = vpop.f32.mrb[174].mxu1 }
 0x46f   : > { %v14762_v60 = vadd.f32 %v13771_v42, %v17007_v37  ;;  %v3940_v6 = vpop.f32.mrb[175].mxu1  ;;  %v4062_v31 = vmax.f32 %v14760_v17, 0.0 }
 0x470   : > { %v14763_v34 = vadd.f32 %v17007_v37, %v3940_v6  ;;  %v4060_v40 = vmax.f32 %v14761_v13, 0.0 }
 0x471   : > { %v4063_v4 = vmax.f32 %v14762_v60, 0.0 }
 0x472   : > { %v4061_v59 = vmax.f32 %v14763_v34, 0.0 }
 0x473   : > { %v17037_v8 = vpack.c.bf16 %v4063_v4, %v4062_v31 }
 0x474   : > { %v17039_v36 = vpack.c.bf16 %v4061_v59, %v4060_v40  ;;  %v13774_v53 = vpop.f32.mrb[176].mxu1 }
 0x475   : > { %v14764_v61 = vadd.f32 %v13774_v53, %v17007_v37  ;;  %v3953_v24 = vpop.f32.mrb[177].mxu1 }
 0x476   : > { %v14765_v41 = vadd.f32 %v17007_v37, %v3953_v24  ;;  %v13775_v18 = vpop.f32.mrb[178].mxu1 }
 0x477   : > { %v14766_v45 = vadd.f32 %v13775_v18, %v17007_v37  ;;  %v3956_v49 = vpop.f32.mrb[179].mxu1  ;;  %v4066_v5 = vmax.f32 %v14764_v61, 0.0 }
 0x478   : > { %v14767_v51 = vadd.f32 %v17007_v37, %v3956_v49  ;;  %v4064_v54 = vmax.f32 %v14765_v41, 0.0  ;;  %v15817_v49 = vld [vmem:[%s18577_s2] ss:$8 sps:$4 sm:$0xff]  }
 0x479   : > { %v4067_v15 = vmax.f32 %v14766_v45, 0.0  ;;  %v15781_v45 = vld [vmem:[%s18576_s1] ss:$8 sps:$4 sm:$0xff]  }
 0x47a   : > { %v4065_v3 = vmax.f32 %v14767_v51, 0.0  ;;  %v15784_v51 = vld [vmem:[%s18576_s1 + $0x14] ss:$8 sps:$4 sm:$0xff]  }
 0x47b   : > { %v17048_v27 = vpack.c.bf16 %v4067_v15, %v4066_v5  ;;  %v15823_v5 = vld [vmem:[%s18577_s2 + $0x14] ss:$8 sps:$4 sm:$0xff]   ;;  %v15866_v15 = vld [vmem:[%s18582_s7 + $0x8] sm:$0xff]  }
 0x47c   : > { %v17050_v1 = vpack.c.bf16 %v4065_v3, %v4064_v54  ;;  %v13778_v29 = vpop.f32.mrb[180].mxu1  ;;  %v15870_v54 = vld [vmem:[%s18582_s7 + $0x10] sm:$0xff]  }
 0x47d   : > { %v14768_v48 = vadd.f32 %v13778_v29, %v17007_v37  ;;  %v3969_v2 = vpop.f32.mrb[181].mxu1  ;;  %v15786_v3 = vld [vmem:[%s18576_s1 + $0x10] ss:$8 sps:$4 sm:$0xff]  }
 0x47e   : > { %v14769_v56 = vadd.f32 %v17007_v37, %v3969_v2  ;;  %v13779_v23 = vpop.f32.mrb[182].mxu1  ;;  %12428 = vmatprep.subr.bf16.mxu1 %v17050_v1  ;;  %12540 = vmatprep.subr.bf16.mxu0 %v17050_v1  ;;  %v15825_v29 = vld [vmem:[%s18577_s2 + $0x10] ss:$8 sps:$4 sm:$0xff]   ;;  %v15829_v2 = vld [vmem:[%s18577_s2 + $0x24] ss:$8 sps:$4 sm:$0xff]  }
 0x47f   : > { %v14770_v55 = vadd.f32 %v13779_v23, %v17007_v37  ;;  %v3972_v46 = vpop.f32.mrb[183].mxu1  ;;  %12429 = vmatpush3.bf16.msra.mxu1 %v17015_v63  ;;  %12541 = vmatpush3.bf16.msra.mxu0 %v17015_v63  ;;  %v4070_v38 = vmax.f32 %v14768_v48, 0.0  ;;  %v15787_v48 = vld [vmem:[%s18576_s1 + $0x24] ss:$8 sps:$4 sm:$0xff]  }
 0x480   : > { %v14771_v57 = vadd.f32 %v17007_v37, %v3972_v46  ;;  %12430 = vmatprep.subr.bf16.mxu1 %v17048_v27  ;;  %12542 = vmatprep.subr.bf16.mxu0 %v17048_v27  ;;  %v4068_v52 = vmax.f32 %v14769_v56, 0.0  ;;  %v15871_v56 = vld [vmem:[%s18582_s7 + $0x18] sm:$0xff]   ;;  %v15875_v23 = vld [vmem:[%s18582_s7 + $0x20] sm:$0xff]  }
 0x481   : > { %v4071_v30 = vmax.f32 %v14770_v55, 0.0  ;;  %v15789_v55 = vld [vmem:[%s18576_s1 + $0x20] ss:$8 sps:$4 sm:$0xff]  }
 0x482   : > { %v4069_v35 = vmax.f32 %v14771_v57, 0.0  ;;  %v15831_v46 = vld [vmem:[%s18577_s2 + $0x20] ss:$8 sps:$4 sm:$0xff]   ;;  %v15790_v57 = vld [vmem:[%s18576_s1 + $0x34] ss:$8 sps:$4 sm:$0xff]  }
 0x483   : > { %v17062_v14 = vpack.c.bf16 %v4071_v30, %v4070_v38  ;;  %12431 = vmatpush3.bf16.msra.mxu1 %v17013_v12  ;;  %12543 = vmatpush3.bf16.msra.mxu0 %v17013_v12  ;;  %v15835_v38 = vld [vmem:[%s18577_s2 + $0x34] ss:$8 sps:$4 sm:$0xff]   ;;  %v15876_v30 = vld [vmem:[%s18582_s7 + $0x28] sm:$0xff]  }
 0x484   : > { %v17066_v26 = vpack.c.bf16 %v4069_v35, %v4068_v52  ;;  %v13782_v44 = vpop.f32.mrb[184].mxu1  ;;  %v15792_v52 = vld [vmem:[%s18576_s1 + $0x30] ss:$8 sps:$4 sm:$0xff]  }
 0x485   : > { %v14772_v28 = vadd.f32 %v13782_v44, %v17007_v37  ;;  %v3985_v39 = vpop.f32.mrb[185].mxu1  ;;  %v15837_v35 = vld [vmem:[%s18577_s2 + $0x30] ss:$8 sps:$4 sm:$0xff]   ;;  %v15793_v44 = vld [vmem:[%s18576_s1 + $0x44] ss:$8 sps:$4 sm:$0xff]  }
 0x486   : > { %v14773_v62 = vadd.f32 %v17007_v37, %v3985_v39  ;;  %v13783_v0 = vpop.f32.mrb[186].mxu1  ;;  %12432 = vmatprep.subr.bf16.mxu1 %v17066_v26  ;;  %12544 = vmatprep.subr.bf16.mxu0 %v17066_v26  ;;  %v15795_v39 = vld [vmem:[%s18576_s1 + $0x40] ss:$8 sps:$4 sm:$0xff]  }
 0x487   : > { %v14774_v20 = vadd.f32 %v13783_v0, %v17007_v37  ;;  %v3988_v25 = vpop.f32.mrb[187].mxu1  ;;  %12433 = vmatpush3.bf16.msra.mxu1 %v17023_v32  ;;  %12545 = vmatpush3.bf16.msra.mxu0 %v17023_v32  ;;  %v4074_v11 = vmax.f32 %v14772_v28, 0.0  ;;  %v15838_v28 = vld [vmem:[%s18577_s2 + $0x44] ss:$8 sps:$4 sm:$0xff]   ;;  %v15796_v0 = vld [vmem:[%s18576_s1 + $0x54] ss:$8 sps:$4 sm:$0xff]  }
 0x488   : > { %v14775_v58 = vadd.f32 %v17007_v37, %v3988_v25  ;;  %12434 = vmatprep.subr.bf16.mxu1 %v17062_v14  ;;  %12546 = vmatprep.subr.bf16.mxu0 %v17062_v14  ;;  %v4072_v22 = vmax.f32 %v14773_v62, 0.0  ;;  %v15840_v62 = vld [vmem:[%s18577_s2 + $0x40] ss:$8 sps:$4 sm:$0xff]   ;;  %v15798_v25 = vld [vmem:[%s18576_s1 + $0x50] ss:$8 sps:$4 sm:$0xff]  }
 0x489   : > { %v4075_v19 = vmax.f32 %v14774_v20, 0.0  ;;  %v15841_v20 = vld [vmem:[%s18577_s2 + $0x54] ss:$8 sps:$4 sm:$0xff]  }
 0x48a   : > { %v4073_v17 = vmax.f32 %v14775_v58, 0.0  ;;  %v15843_v58 = vld [vmem:[%s18577_s2 + $0x50] ss:$8 sps:$4 sm:$0xff]  }
 0x48b   : > { %v17078_v21 = vpack.c.bf16 %v4075_v19, %v4074_v11  ;;  %12435 = vmatpush3.bf16.msra.mxu1 %v17021_v50  ;;  %12547 = vmatpush3.bf16.msra.mxu0 %v17021_v50  ;;  %v15799_v11 = vld [vmem:[%s18576_s1 + $0x64] ss:$8 sps:$4 sm:$0xff]  }
 0x48c   : > { %v17082_v13 = vpack.c.bf16 %v4073_v17, %v4072_v22  ;;  %v13786_v42 = vpop.f32.mrb[188].mxu1  ;;  %v15844_v19 = vld [vmem:[%s18577_s2 + $0x64] ss:$8 sps:$4 sm:$0xff]   ;;  %v15801_v22 = vld [vmem:[%s18576_s1 + $0x60] ss:$8 sps:$4 sm:$0xff]  }
 0x48d   : > { %v14776_v60 = vadd.f32 %v13786_v42, %v17007_v37  ;;  %v4001_v6 = vpop.f32.mrb[189].mxu1  ;;  %v15846_v17 = vld [vmem:[%s18577_s2 + $0x60] ss:$8 sps:$4 sm:$0xff]   ;;  %v15802_v42 = vld [vmem:[%s18576_s1 + $0x74] ss:$8 sps:$4 sm:$0xff]  }
 0x48e   : > { %v14777_v34 = vadd.f32 %v17007_v37, %v4001_v6  ;;  %v13787_v31 = vpop.f32.mrb[190].mxu1  ;;  %12436 = vmatprep.subr.bf16.mxu1 %v17082_v13  ;;  %12548 = vmatprep.subr.bf16.mxu0 %v17082_v13  ;;  %v15804_v6 = vld [vmem:[%s18576_s1 + $0x70] ss:$8 sps:$4 sm:$0xff]  }
 0x48f   : > { %v14778_v4 = vadd.f32 %v13787_v31, %v17007_v37  ;;  %v4004_v40 = vpop.f32.mrb[191].mxu1  ;;  %12437 = vmatpush3.bf16.msra.mxu1 %v17031_v43  ;;  %12549 = vmatpush3.bf16.msra.mxu0 %v17031_v43  ;;  %v4078_v53 = vmax.f32 %v14776_v60, 0.0  ;;  %v15847_v60 = vld [vmem:[%s18577_s2 + $0x74] ss:$8 sps:$4 sm:$0xff]   ;;  %v15805_v31 = vld [vmem:[%s18576_s1 + $0x84] ss:$8 sps:$4 sm:$0xff]  }
 0x490   : > { %v14779_v59 = vadd.f32 %v17007_v37, %v4004_v40  ;;  %12438 = vmatprep.subr.bf16.mxu1 %v17078_v21  ;;  %12550 = vmatprep.subr.bf16.mxu0 %v17078_v21  ;;  %v4076_v24 = vmax.f32 %v14777_v34, 0.0  ;;  %v15865_v37 = vld [vmem:[%s18582_s7] sm:$0xff]   ;;  %v15849_v34 = vld [vmem:[%s18577_s2 + $0x70] ss:$8 sps:$4 sm:$0xff]  }
 0x491   : > { %v4079_v61 = vmax.f32 %v14778_v4, 0.0  ;;  %v15850_v4 = vld [vmem:[%s18577_s2 + $0x84] ss:$8 sps:$4 sm:$0xff]   ;;  %v15807_v40 = vld [vmem:[%s18576_s1 + $0x80] ss:$8 sps:$4 sm:$0xff]  }
 0x492   : > { %v4077_v41 = vmax.f32 %v14779_v59, 0.0  ;;  %v15852_v59 = vld [vmem:[%s18577_s2 + $0x80] ss:$8 sps:$4 sm:$0xff]  }
 0x493   : > { %v17094_v18 = vpack.c.bf16 %v4079_v61, %v4078_v53  ;;  %12439 = vmatpush3.bf16.msra.mxu1 %v17029_v33  ;;  %12551 = vmatpush3.bf16.msra.mxu0 %v17029_v33  ;;  %v15808_v53 = vld [vmem:[%s18576_s1 + $0x94] ss:$8 sps:$4 sm:$0xff]  }
 0x494   : > { %v17098_v16 = vpack.c.bf16 %v4077_v41, %v4076_v24  ;;  %v15853_v61 = vld [vmem:[%s18577_s2 + $0x94] ss:$8 sps:$4 sm:$0xff]   ;;  %v15810_v24 = vld [vmem:[%s18576_s1 + $0x90] ss:$8 sps:$4 sm:$0xff]  }
 0x495   : > { %18626 = vst [vmem:[#allocation38_spill] sm:$0xff] %v17094_v18  ;;  %v15855_v41 = vld [vmem:[%s18577_s2 + $0x90] ss:$8 sps:$4 sm:$0xff]  }
 0x496   : > { %12440 = vmatprep.subr.bf16.mxu1 %v17098_v16  ;;  %12552 = vmatprep.subr.bf16.mxu0 %v17098_v16 }
 0x497   : > { %12441 = vmatpush3.bf16.msra.mxu1 %v17039_v36  ;;  %12553 = vmatpush3.bf16.msra.mxu0 %v17039_v36 }
 0x498   : > { %12442 = vmatprep.subr.bf16.mxu1 %v17094_v18  ;;  %12554 = vmatprep.subr.bf16.mxu0 %v17094_v18 }
 0x49b   : > { %12443 = vmatpush3.bf16.msra.mxu1 %v17037_v8  ;;  %12555 = vmatpush3.bf16.msra.mxu0 %v17037_v8 }
 0x49c   : > { %13788 = vmatprep.subr.bf16.mxu0 %v15865_v37 }
 0x49e   : > { %4321 = vmatmul.mubr.bf16.vlgmr.msra.gmra.mrb[192].mxu1 %v15781_v45  ;;  %4690 = vmatmul.mubr.bf16.vlgmr.msra.gmra.mrb[0].mxu0 %v15817_v49  ;;  %v15856_v45 = vld [vmem:[%s18577_s2 + $0xa4] ss:$8 sps:$4 sm:$0xff]   ;;  %v15813_v49 = vld [vmem:[%s18576_s1 + $0xa0] ss:$8 sps:$4 sm:$0xff]  }
 0x49f   : > { %4328 = vmatprep.mubr.bf16.mxu1 %v15784_v51  ;;  %4697 = vmatprep.mubr.bf16.mxu0 %v15823_v5  ;;  %v15858_v51 = vld [vmem:[%s18577_s2 + $0xa0] ss:$8 sps:$4 sm:$0xff]   ;;  %v15814_v5 = vld [vmem:[%s18576_s1 + $0xb4] ss:$8 sps:$4 sm:$0xff]  }
 0x4a0   : > { %13789 = vmatpush3.bf16.msra.mxu0 %v15865_v37  ;;  %v15811_v37 = vld [vmem:[%s18576_s1 + $0xa4] ss:$8 sps:$4 sm:$0xff]  }
 0x4a1   : > { %13790 = vmatprep.subr.bf16.mxu0 %v15866_v15 }
 0x4a4   : > { %13791 = vmatpush3.bf16.msra.mxu0 %v15866_v15  ;;  %v15859_v15 = vld [vmem:[%s18577_s2 + $0xb4] ss:$8 sps:$4 sm:$0xff]  }
 0x4a5   : > { %13792 = vmatprep.subr.bf16.mxu0 %v15870_v54 }
 0x4a6   : > { %4329 = vmatmul.mubr.bf16.gmra.mrb[196].mxu1 %v15786_v3  ;;  %4698 = vmatmul.mubr.bf16.gmra.mrb[4].mxu0 %v15825_v29  ;;  %v15816_v3 = vld [vmem:[%s18576_s1 + $0xb0] ss:$8 sps:$4 sm:$0xff]  }
 0x4a7   : > { %4336 = vmatprep.mubr.bf16.mxu1 %v15787_v48  ;;  %4705 = vmatprep.mubr.bf16.mxu0 %v15829_v2  ;;  %v15861_v29 = vld [vmem:[%s18577_s2 + $0xb0] ss:$8 sps:$4 sm:$0xff]   ;;  %v15820_v48 = vld [vmem:[%s18576_s1 + $0xc4] ss:$8 sps:$4 sm:$0xff]  }
 0x4a8   : > { %13793 = vmatpush3.bf16.msra.mxu0 %v15870_v54  ;;  %v15880_v54 = vld [vmem:[%s18582_s7 + $0x30] sm:$0xff]   ;;  %v15862_v2 = vld [vmem:[%s18577_s2 + $0xc4] ss:$8 sps:$4 sm:$0xff]  }
 0x4a9   : > { %13794 = vmatprep.subr.bf16.mxu0 %v15871_v56 }
 0x4ac   : > { %13795 = vmatpush3.bf16.msra.mxu0 %v15871_v56  ;;  %v15881_v56 = vld [vmem:[%s18582_s7 + $0x38] sm:$0xff]  }
 0x4ad   : > { %13796 = vmatprep.subr.bf16.mxu0 %v15875_v23 }
 0x4ae   : > { %4337 = vmatmul.mubr.bf16.gmra.mrb[200].mxu1 %v15789_v55  ;;  %4706 = vmatmul.mubr.bf16.gmra.mrb[8].mxu0 %v15831_v46  ;;  %v15864_v55 = vld [vmem:[%s18577_s2 + $0xc0] ss:$8 sps:$4 sm:$0xff]   ;;  %v15826_v46 = vld [vmem:[%s18576_s1 + $0xd4] ss:$8 sps:$4 sm:$0xff]  }
 0x4af   : > { %4344 = vmatprep.mubr.bf16.mxu1 %v15790_v57  ;;  %4713 = vmatprep.mubr.bf16.mxu0 %v15835_v38  ;;  %v15867_v57 = vld [vmem:[%s18577_s2 + $0xd4] ss:$8 sps:$4 sm:$0xff]   ;;  %v15828_v38 = vld [vmem:[%s18576_s1 + $0xd0] ss:$8 sps:$4 sm:$0xff]  }
 0x4b0   : > { %13797 = vmatpush3.bf16.msra.mxu0 %v15875_v23  ;;  %v15822_v23 = vld [vmem:[%s18576_s1 + $0xc0] ss:$8 sps:$4 sm:$0xff]  }
 0x4b1   : > { %13798 = vmatprep.subr.bf16.mxu0 %v15876_v30 }
 0x4b4   : > { %13799 = vmatpush3.bf16.msra.mxu0 %v15876_v30  ;;  %v15869_v30 = vld [vmem:[%s18577_s2 + $0xd0] ss:$8 sps:$4 sm:$0xff]  }
 0x4b5   : > { %13800 = vmatprep.subr.bf16.mxu0 %v15880_v54 }
 0x4b6   : > { %4345 = vmatmul.mubr.bf16.gmra.mrb[204].mxu1 %v15792_v52  ;;  %4714 = vmatmul.mubr.bf16.gmra.mrb[12].mxu0 %v15837_v35  ;;  %v15832_v52 = vld [vmem:[%s18576_s1 + $0xe4] ss:$8 sps:$4 sm:$0xff]  }
 0x4b7   : > { %4352 = vmatprep.mubr.bf16.mxu1 %v15793_v44  ;;  %4721 = vmatprep.mubr.bf16.mxu0 %v15838_v28  ;;  %v15872_v35 = vld [vmem:[%s18577_s2 + $0xe4] ss:$8 sps:$4 sm:$0xff]   ;;  %v15834_v44 = vld [vmem:[%s18576_s1 + $0xe0] ss:$8 sps:$4 sm:$0xff]  }
 0x4b8   : > { %13801 = vmatpush3.bf16.msra.mxu0 %v15880_v54  ;;  %v15874_v28 = vld [vmem:[%s18577_s2 + $0xe0] ss:$8 sps:$4 sm:$0xff]  }
 0x4b9   : > { %13802 = vmatprep.subr.bf16.mxu0 %v15881_v56 }
 0x4bc   : > { %13803 = vmatpush3.bf16.msra.mxu0 %v15881_v56 }
 0x4be   : > { %4353 = vmatmul.mubr.bf16.gmra.mrb[208].mxu1 %v15795_v39  ;;  %4722 = vmatmul.mubr.bf16.gmra.mrb[16].mxu0 %v15840_v62  ;;  %v15877_v39 = vld [vmem:[%s18577_s2 + $0xf4] ss:$8 sps:$4 sm:$0xff]   ;;  %v15879_v62 = vld [vmem:[%s18577_s2 + $0xf0] ss:$8 sps:$4 sm:$0xff]  }
 0x4bf   : > { %4360 = vmatprep.mubr.bf16.mxu1 %v15796_v0  ;;  %4729 = vmatprep.mubr.bf16.mxu0 %v15841_v20  ;;  %v15882_v0 = vld [vmem:[%s18576_s1 + $0xf4] ss:$8 sps:$4 sm:$0xff]   ;;  %v15884_v20 = vld [vmem:[%s18576_s1 + $0xf0] ss:$8 sps:$4 sm:$0xff]  }
 0x4c6   : > { %4361 = vmatmul.mubr.bf16.gmra.mrb[212].mxu1 %v15798_v25  ;;  %4730 = vmatmul.mubr.bf16.gmra.mrb[20].mxu0 %v15843_v58  ;;  %v15885_v25 = vld [vmem:[%s18582_s7 + $0x40] sm:$0xff]  }
 0x4c7   : > { %4368 = vmatprep.mubr.bf16.mxu1 %v15799_v11  ;;  %4737 = vmatprep.mubr.bf16.mxu0 %v15844_v19 }
 0x4c8   : > { %13836 = vmatprep.subr.bf16.mxu0 %v15885_v25 }
 0x4ce   : > { %4369 = vmatmul.mubr.bf16.gmra.mrb[216].mxu1 %v15801_v22  ;;  %4738 = vmatmul.mubr.bf16.gmra.mrb[24].mxu0 %v15846_v17 }
 0x4cf   : > { %4376 = vmatprep.mubr.bf16.mxu1 %v15802_v42  ;;  %4745 = vmatprep.mubr.bf16.mxu0 %v15847_v60 }
 0x4d6   : > { %4377 = vmatmul.mubr.bf16.gmra.mrb[220].mxu1 %v15804_v6  ;;  %4746 = vmatmul.mubr.bf16.gmra.mrb[28].mxu0 %v15849_v34 }
 0x4d7   : > { %4384 = vmatprep.mubr.bf16.mxu1 %v15805_v31  ;;  %4753 = vmatprep.mubr.bf16.mxu0 %v15850_v4 }
 0x4de   : > { %4385 = vmatmul.mubr.bf16.gmra.mrb[224].mxu1 %v15807_v40  ;;  %4754 = vmatmul.mubr.bf16.gmra.mrb[32].mxu0 %v15852_v59 }
 0x4df   : > { %4392 = vmatprep.mubr.bf16.mxu1 %v15808_v53  ;;  %4761 = vmatprep.mubr.bf16.mxu0 %v15853_v61  ;;  %v15886_v53 = vld [vmem:[%s18582_s7 + $0x48] sm:$0xff]  }
 0x4e6   : > { %4393 = vmatmul.mubr.bf16.gmra.mrb[228].mxu1 %v15810_v24  ;;  %4762 = vmatmul.mubr.bf16.gmra.mrb[36].mxu0 %v15855_v41 }
 0x4e7   : > { %4400 = vmatprep.mubr.bf16.mxu1 %v15811_v37  ;;  %4769 = vmatprep.mubr.bf16.mxu0 %v15856_v45 }
 0x4ee   : > { %4401 = vmatmul.mubr.bf16.gmra.mrb[232].mxu1 %v15813_v49  ;;  %4770 = vmatmul.mubr.bf16.gmra.mrb[40].mxu0 %v15858_v51 }
 0x4ef   : > { %4408 = vmatprep.mubr.bf16.mxu1 %v15814_v5  ;;  %4777 = vmatprep.mubr.bf16.mxu0 %v15859_v15  ;;  %v15887_v5 = vld [vmem:[%s18582_s7 + $0x50] sm:$0xff]  }
 0x4f6   : > { %4409 = vmatmul.mubr.bf16.gmra.mrb[236].mxu1 %v15816_v3  ;;  %4778 = vmatmul.mubr.bf16.gmra.mrb[44].mxu0 %v15861_v29 }
 0x4f7   : > { %4416 = vmatprep.mubr.bf16.mxu1 %v15820_v48  ;;  %4785 = vmatprep.mubr.bf16.mxu0 %v15862_v2 }
 0x4fe   : > { %4417 = vmatmul.mubr.bf16.gmra.mrb[240].mxu1 %v15822_v23  ;;  %4786 = vmatmul.mubr.bf16.gmra.mrb[48].mxu0 %v15864_v55  ;;  %v15888_v23 = vld [vmem:[%s18582_s7 + $0x58] sm:$0xff]  }
 0x4ff   : > { %4424 = vmatprep.mubr.bf16.mxu1 %v15826_v46  ;;  %4793 = vmatprep.mubr.bf16.mxu0 %v15867_v57 }
 0x506   : > { %4425 = vmatmul.mubr.bf16.gmra.mrb[244].mxu1 %v15828_v38  ;;  %4794 = vmatmul.mubr.bf16.gmra.mrb[52].mxu0 %v15869_v30 }
 0x507   : > { %4432 = vmatprep.mubr.bf16.mxu1 %v15832_v52  ;;  %4801 = vmatprep.mubr.bf16.mxu0 %v15872_v35 }
 0x50e   : > { %4433 = vmatmul.mubr.bf16.gmra.mrb[248].mxu1 %v15834_v44  ;;  %4802 = vmatmul.mubr.bf16.gmra.mrb[56].mxu0 %v15874_v28  ;;  %v15889_v44 = vld [vmem:[%s18582_s7 + $0x60] sm:$0xff]  }
 0x50f   : > { %4809 = vmatprep.mubr.bf16.mxu0 %v15877_v39  ;;  %4440 = vmatprep.mubr.bf16.mxu1 %v15882_v0 }
 0x516   : > { %4810 = vmatmul.mubr.bf16.gmra.mrb[60].mxu0 %v15879_v62  ;;  %4441 = vmatmul.mubr.bf16.gmra.mrb[252].mxu1 %v15884_v20 }
 0x517   : > { %13804 = vmatprep.mubr.bf16.mxu0 %v18625_v47 }
 0x571   : > { %v12444_v58 = vpop.f32.mrb[192].mxu1  ;;  %v12556_v11 = vpop.f32.mrb[0].mxu0 }
 0x572   : > { %v12445_v19 = vpop.f32.mrb[193].mxu1  ;;  %v12557_v22 = vpop.f32.mrb[1].mxu0 }
 0x573   : > { %v12446_v17 = vadd.f32 %v12445_v19, %v12444_v58  ;;  %v12447_v42 = vpop.f32.mrb[194].mxu1  ;;  %v12558_v60 = vadd.f32 %v12557_v22, %v12556_v11  ;;  %v12559_v6 = vpop.f32.mrb[2].mxu0  ;;  %v15890_v11 = vld [vmem:[%s18582_s7 + $0x68] sm:$0xff]  }
 0x574   : > { %v12448_v34 = vpop.f32.mrb[195].mxu1  ;;  %v12560_v31 = vpop.f32.mrb[3].mxu0 }
 0x575   : > { %v12449_v4 = vadd.f32 %v12448_v34, %v12447_v42  ;;  %v12561_v40 = vadd.f32 %v12560_v31, %v12559_v6  ;;  %v15891_v31 = vld [vmem:[%s18582_s7 + $0x70] sm:$0xff]  }
 0x577   : > { %v17322_v59 = vpack.c.bf16 %v12449_v4, %v12446_v17  ;;  %v17327_v61 = vpack.c.bf16 %v12561_v40, %v12558_v60 }
 0x579   : > { %v12450_v24 = vpop.f32.mrb[196].mxu1  ;;  %13805 = vmatmul.mubr.bf16.vlgmr.msra.gmra.mrb[64].mxu0 %v17322_v59  ;;  %v12562_v41 = vpop.f32.mrb[4].mxu0 }
 0x57a   : > { %v12451_v37 = vpop.f32.mrb[197].mxu1  ;;  %13837 = vmatpush3.bf16.msra.mxu0 %v15885_v25  ;;  %v12563_v45 = vpop.f32.mrb[5].mxu0 }
 0x57b   : > { %v12452_v49 = vadd.f32 %v12451_v37, %v12450_v24  ;;  %v12453_v51 = vpop.f32.mrb[198].mxu1  ;;  %13838 = vmatprep.subr.bf16.mxu0 %v15886_v53  ;;  %v12564_v15 = vadd.f32 %v12563_v45, %v12562_v41  ;;  %v12565_v54 = vpop.f32.mrb[6].mxu0 }
 0x57c   : > { %v12454_v3 = vpop.f32.mrb[199].mxu1  ;;  %v12566_v29 = vpop.f32.mrb[7].mxu0 }
 0x57d   : > { %v12455_v48 = vadd.f32 %v12454_v3, %v12453_v51  ;;  %v12567_v2 = vadd.f32 %v12566_v29, %v12565_v54 }
 0x57e   : > { %13839 = vmatpush3.bf16.msra.mxu0 %v15886_v53 }
 0x57f   : > { %v17333_v56 = vpack.c.bf16 %v12455_v48, %v12452_v49  ;;  %13840 = vmatprep.subr.bf16.mxu0 %v15887_v5  ;;  %v17338_v55 = vpack.c.bf16 %v12567_v2, %v12564_v15  ;;  %v15892_v49 = vld [vmem:[%s18582_s7 + $0x78] sm:$0xff]  }
 0x581   : > { %v12456_v46 = vpop.f32.mrb[200].mxu1  ;;  %13808 = vmatprep.mubr.bf16.mxu0 %v17333_v56  ;;  %v12568_v57 = vpop.f32.mrb[8].mxu0 }
 0x582   : > { %v12457_v38 = vpop.f32.mrb[201].mxu1  ;;  %13841 = vmatpush3.bf16.msra.mxu0 %v15887_v5  ;;  %v12569_v30 = vpop.f32.mrb[9].mxu0 }
 0x583   : > { %v12458_v52 = vadd.f32 %v12457_v38, %v12456_v46  ;;  %v12459_v35 = vpop.f32.mrb[202].mxu1  ;;  %13842 = vmatprep.subr.bf16.mxu0 %v15888_v23  ;;  %v12570_v28 = vadd.f32 %v12569_v30, %v12568_v57  ;;  %v12571_v39 = vpop.f32.mrb[10].mxu0  ;;  %v17366_v46 = vld [vmem:[%s18582_s7 + $0x80] sm:$0xff]  }
 0x584   : > { %v12460_v62 = vpop.f32.mrb[203].mxu1  ;;  %v12572_v0 = vpop.f32.mrb[11].mxu0 }
 0x585   : > { %v12461_v20 = vadd.f32 %v12460_v62, %v12459_v35  ;;  %v12573_v25 = vadd.f32 %v12572_v0, %v12571_v39 }
 0x586   : > { %13843 = vmatpush3.bf16.msra.mxu0 %v15888_v23 }
 0x587   : > { %v17344_v58 = vpack.c.bf16 %v12461_v20, %v12458_v52  ;;  %13844 = vmatprep.subr.bf16.mxu0 %v15889_v44  ;;  %v17349_v19 = vpack.c.bf16 %v12573_v25, %v12570_v28 }
 0x589   : > { %v12462_v22 = vpop.f32.mrb[204].mxu1  ;;  %13809 = vmatmul.mubr.bf16.gmra.mrb[68].mxu0 %v17344_v58  ;;  %v12574_v17 = vpop.f32.mrb[12].mxu0 }
 0x58a   : > { %v12463_v42 = vpop.f32.mrb[205].mxu1  ;;  %13845 = vmatpush3.bf16.msra.mxu0 %v15889_v44  ;;  %v12575_v60 = vpop.f32.mrb[13].mxu0 }
 0x58b   : > { %v12464_v6 = vadd.f32 %v12463_v42, %v12462_v22  ;;  %v12465_v34 = vpop.f32.mrb[206].mxu1  ;;  %13846 = vmatprep.subr.bf16.mxu0 %v15890_v11  ;;  %v12576_v4 = vadd.f32 %v12575_v60, %v12574_v17  ;;  %v12577_v40 = vpop.f32.mrb[14].mxu0 }
 0x58c   : > { %v12466_v53 = vpop.f32.mrb[207].mxu1  ;;  %v12578_v24 = vpop.f32.mrb[15].mxu0 }
 0x58d   : > { %v12467_v41 = vadd.f32 %v12466_v53, %v12465_v34  ;;  %v12579_v37 = vadd.f32 %v12578_v24, %v12577_v40 }
 0x58e   : > { %13847 = vmatpush3.bf16.msra.mxu0 %v15890_v11 }
 0x58f   : > { %v17355_v45 = vpack.c.bf16 %v12467_v41, %v12464_v6  ;;  %13848 = vmatprep.subr.bf16.mxu0 %v15891_v31  ;;  %v17360_v51 = vpack.c.bf16 %v12579_v37, %v12576_v4 }
 0x591   : > { %v12468_v5 = vpop.f32.mrb[208].mxu1  ;;  %13812 = vmatprep.mubr.bf16.mxu0 %v17355_v45  ;;  %v12580_v15 = vpop.f32.mrb[16].mxu0 }
 0x592   : > { %v12469_v54 = vpop.f32.mrb[209].mxu1  ;;  %13849 = vmatpush3.bf16.msra.mxu0 %v15891_v31  ;;  %v12581_v3 = vpop.f32.mrb[17].mxu0 }
 0x593   : > { %v12470_v29 = vadd.f32 %v12469_v54, %v12468_v5  ;;  %v12471_v48 = vpop.f32.mrb[210].mxu1  ;;  %13850 = vmatprep.subr.bf16.mxu0 %v15892_v49  ;;  %v12582_v2 = vadd.f32 %v12581_v3, %v12580_v15  ;;  %v12583_v23 = vpop.f32.mrb[18].mxu0 }
 0x594   : > { %v12472_v57 = vpop.f32.mrb[211].mxu1  ;;  %v12584_v38 = vpop.f32.mrb[19].mxu0 }
 0x595   : > { %v12473_v30 = vadd.f32 %v12472_v57, %v12471_v48  ;;  %v12585_v52 = vadd.f32 %v12584_v38, %v12583_v23 }
 0x596   : > { %13851 = vmatpush3.bf16.msra.mxu0 %v15892_v49 }
 0x597   : > { %v17368_v35 = vpack.c.bf16 %v12473_v30, %v12470_v29  ;;  %v17370_v44 = vpack.c.bf16 %v12585_v52, %v12582_v2  ;;  %13884 = vmatprep.subr.bf16.mxu0 %v17366_v46 }
 0x599   : > { %v12474_v28 = vpop.f32.mrb[212].mxu1  ;;  %13813 = vmatmul.mubr.bf16.gmra.mrb[72].mxu0 %v17368_v35  ;;  %v12586_v39 = vpop.f32.mrb[20].mxu0 }
 0x59a   : > { %v12475_v62 = vpop.f32.mrb[213].mxu1  ;;  %v12587_v0 = vpop.f32.mrb[21].mxu0 }
 0x59b   : > { %v12476_v20 = vadd.f32 %v12475_v62, %v12474_v28  ;;  %v12477_v25 = vpop.f32.mrb[214].mxu1  ;;  %v12588_v11 = vadd.f32 %v12587_v0, %v12586_v39  ;;  %v12589_v22 = vpop.f32.mrb[22].mxu0 }
 0x59c   : > { %v12478_v17 = vpop.f32.mrb[215].mxu1  ;;  %v12590_v42 = vpop.f32.mrb[23].mxu0 }
 0x59d   : > { %v12479_v60 = vadd.f32 %v12478_v17, %v12477_v25  ;;  %v12591_v6 = vadd.f32 %v12590_v42, %v12589_v22 }
 0x59f   : > { %v17374_v34 = vpack.c.bf16 %v12479_v60, %v12476_v20  ;;  %v17376_v31 = vpack.c.bf16 %v12591_v6, %v12588_v11 }
 0x5a1   : > { %v12480_v4 = vpop.f32.mrb[216].mxu1  ;;  %13816 = vmatprep.mubr.bf16.mxu0 %v17374_v34  ;;  %v12592_v40 = vpop.f32.mrb[24].mxu0 }
 0x5a2   : > { %v12481_v53 = vpop.f32.mrb[217].mxu1  ;;  %v12593_v24 = vpop.f32.mrb[25].mxu0 }
 0x5a3   : > { %v12482_v41 = vadd.f32 %v12481_v53, %v12480_v4  ;;  %v12483_v37 = vpop.f32.mrb[218].mxu1  ;;  %v12594_v49 = vadd.f32 %v12593_v24, %v12592_v40  ;;  %v12595_v5 = vpop.f32.mrb[26].mxu0 }
 0x5a4   : > { %v12484_v15 = vpop.f32.mrb[219].mxu1  ;;  %v12596_v54 = vpop.f32.mrb[27].mxu0 }
 0x5a5   : > { %v12485_v3 = vadd.f32 %v12484_v15, %v12483_v37  ;;  %v12597_v29 = vadd.f32 %v12596_v54, %v12595_v5 }
 0x5a7   : > { %v17379_v48 = vpack.c.bf16 %v12485_v3, %v12482_v41  ;;  %v17381_v2 = vpack.c.bf16 %v12597_v29, %v12594_v49 }
 0x5a9   : > { %v12486_v23 = vpop.f32.mrb[220].mxu1  ;;  %13817 = vmatmul.mubr.bf16.gmra.mrb[76].mxu0 %v17379_v48  ;;  %v12598_v57 = vpop.f32.mrb[28].mxu0 }
 0x5aa   : > { %v12487_v38 = vpop.f32.mrb[221].mxu1  ;;  %v12599_v30 = vpop.f32.mrb[29].mxu0 }
 0x5ab   : > { %v12488_v52 = vadd.f32 %v12487_v38, %v12486_v23  ;;  %v12489_v28 = vpop.f32.mrb[222].mxu1  ;;  %v12600_v39 = vadd.f32 %v12599_v30, %v12598_v57  ;;  %v12601_v62 = vpop.f32.mrb[30].mxu0 }
 0x5ac   : > { %v12490_v0 = vpop.f32.mrb[223].mxu1  ;;  %v12602_v20 = vpop.f32.mrb[31].mxu0 }
 0x5ad   : > { %v12491_v25 = vadd.f32 %v12490_v0, %v12489_v28  ;;  %v12603_v11 = vadd.f32 %v12602_v20, %v12601_v62 }
 0x5af   : > { %v17384_v22 = vpack.c.bf16 %v12491_v25, %v12488_v52  ;;  %v17386_v17 = vpack.c.bf16 %v12603_v11, %v12600_v39 }
 0x5b1   : > { %v12492_v42 = vpop.f32.mrb[224].mxu1  ;;  %13820 = vmatprep.mubr.bf16.mxu0 %v17384_v22  ;;  %v12604_v60 = vpop.f32.mrb[32].mxu0 }
 0x5b2   : > { %v12493_v6 = vpop.f32.mrb[225].mxu1  ;;  %v12605_v4 = vpop.f32.mrb[33].mxu0 }
 0x5b3   : > { %v12494_v40 = vadd.f32 %v12493_v6, %v12492_v42  ;;  %v12495_v53 = vpop.f32.mrb[226].mxu1  ;;  %v12606_v24 = vadd.f32 %v12605_v4, %v12604_v60  ;;  %v12607_v41 = vpop.f32.mrb[34].mxu0 }
 0x5b4   : > { %v12496_v37 = vpop.f32.mrb[227].mxu1  ;;  %v12608_v49 = vpop.f32.mrb[35].mxu0 }
 0x5b5   : > { %v12497_v5 = vadd.f32 %v12496_v37, %v12495_v53  ;;  %v12609_v15 = vadd.f32 %v12608_v49, %v12607_v41 }
 0x5b7   : > { %v17389_v54 = vpack.c.bf16 %v12497_v5, %v12494_v40  ;;  %v17391_v3 = vpack.c.bf16 %v12609_v15, %v12606_v24 }
 0x5b9   : > { %v12498_v29 = vpop.f32.mrb[228].mxu1  ;;  %13821 = vmatmul.mubr.bf16.gmra.mrb[80].mxu0 %v17389_v54  ;;  %v12610_v23 = vpop.f32.mrb[36].mxu0 }
 0x5ba   : > { %v12499_v57 = vpop.f32.mrb[229].mxu1  ;;  %v12611_v38 = vpop.f32.mrb[37].mxu0 }
 0x5bb   : > { %v12500_v30 = vadd.f32 %v12499_v57, %v12498_v29  ;;  %v12501_v52 = vpop.f32.mrb[230].mxu1  ;;  %v12612_v28 = vadd.f32 %v12611_v38, %v12610_v23  ;;  %v12613_v39 = vpop.f32.mrb[38].mxu0 }
 0x5bc   : > { %v12502_v62 = vpop.f32.mrb[231].mxu1  ;;  %v12614_v0 = vpop.f32.mrb[39].mxu0 }
 0x5bd   : > { %v12503_v20 = vadd.f32 %v12502_v62, %v12501_v52  ;;  %v12615_v25 = vadd.f32 %v12614_v0, %v12613_v39 }
 0x5bf   : > { %v17394_v11 = vpack.c.bf16 %v12503_v20, %v12500_v30  ;;  %v17396_v42 = vpack.c.bf16 %v12615_v25, %v12612_v28 }
 0x5c1   : > { %v12504_v60 = vpop.f32.mrb[232].mxu1  ;;  %13824 = vmatprep.mubr.bf16.mxu0 %v17394_v11  ;;  %v12616_v6 = vpop.f32.mrb[40].mxu0 }
 0x5c2   : > { %v12505_v4 = vpop.f32.mrb[233].mxu1  ;;  %v12617_v40 = vpop.f32.mrb[41].mxu0 }
 0x5c3   : > { %v12506_v53 = vadd.f32 %v12505_v4, %v12504_v60  ;;  %v12507_v24 = vpop.f32.mrb[234].mxu1  ;;  %v12618_v41 = vadd.f32 %v12617_v40, %v12616_v6  ;;  %v12619_v37 = vpop.f32.mrb[42].mxu0 }
 0x5c4   : > { %v12508_v49 = vpop.f32.mrb[235].mxu1  ;;  %v12620_v5 = vpop.f32.mrb[43].mxu0 }
 0x5c5   : > { %v12509_v15 = vadd.f32 %v12508_v49, %v12507_v24  ;;  %v12621_v29 = vadd.f32 %v12620_v5, %v12619_v37 }
 0x5c7   : > { %v17399_v23 = vpack.c.bf16 %v12509_v15, %v12506_v53  ;;  %v17401_v57 = vpack.c.bf16 %v12621_v29, %v12618_v41 }
 0x5c9   : > { %v12510_v38 = vpop.f32.mrb[236].mxu1  ;;  %13825 = vmatmul.mubr.bf16.gmra.mrb[84].mxu0 %v17399_v23  ;;  %v12622_v30 = vpop.f32.mrb[44].mxu0 }
 0x5ca   : > { %v12511_v52 = vpop.f32.mrb[237].mxu1  ;;  %v12623_v28 = vpop.f32.mrb[45].mxu0 }
 0x5cb   : > { %v12512_v39 = vadd.f32 %v12511_v52, %v12510_v38  ;;  %v12513_v62 = vpop.f32.mrb[238].mxu1  ;;  %v12624_v0 = vadd.f32 %v12623_v28, %v12622_v30  ;;  %v12625_v20 = vpop.f32.mrb[46].mxu0 }
 0x5cc   : > { %v12514_v25 = vpop.f32.mrb[239].mxu1  ;;  %v12626_v60 = vpop.f32.mrb[47].mxu0 }
 0x5cd   : > { %v12515_v6 = vadd.f32 %v12514_v25, %v12513_v62  ;;  %v12627_v4 = vadd.f32 %v12626_v60, %v12625_v20 }
 0x5cf   : > { %v17404_v40 = vpack.c.bf16 %v12515_v6, %v12512_v39  ;;  %v17406_v53 = vpack.c.bf16 %v12627_v4, %v12624_v0 }
 0x5d1   : > { %v12516_v24 = vpop.f32.mrb[240].mxu1  ;;  %13828 = vmatprep.mubr.bf16.mxu0 %v17404_v40  ;;  %v12628_v41 = vpop.f32.mrb[48].mxu0 }
 0x5d2   : > { %v12517_v37 = vpop.f32.mrb[241].mxu1  ;;  %v12629_v49 = vpop.f32.mrb[49].mxu0 }
 0x5d3   : > { %v12518_v5 = vadd.f32 %v12517_v37, %v12516_v24  ;;  %v12519_v15 = vpop.f32.mrb[242].mxu1  ;;  %v12630_v29 = vadd.f32 %v12629_v49, %v12628_v41  ;;  %v12631_v38 = vpop.f32.mrb[50].mxu0 }
 0x5d4   : > { %v12520_v30 = vpop.f32.mrb[243].mxu1  ;;  %v12632_v52 = vpop.f32.mrb[51].mxu0 }
 0x5d5   : > { %v12521_v28 = vadd.f32 %v12520_v30, %v12519_v15  ;;  %v12633_v10 = vadd.f32 %v12632_v52, %v12631_v38 }
 0x5d7   : > { %v17409_v62 = vpack.c.bf16 %v12521_v28, %v12518_v5  ;;  %v17411_v39 = vpack.c.bf16 %v12633_v10, %v12630_v29 }
 0x5d9   : > { %18627 = vst [vmem:[#allocation39_spill] sm:$0xff] %v17409_v62  ;;  %v12522_v0 = vpop.f32.mrb[244].mxu1  ;;  %13829 = vmatmul.mubr.bf16.gmra.mrb[88].mxu0 %v17409_v62  ;;  %v12634_v20 = vpop.f32.mrb[52].mxu0 }
 0x5da   : > { %v12523_v25 = vpop.f32.mrb[245].mxu1  ;;  %v12635_v60 = vpop.f32.mrb[53].mxu0 }
 0x5db   : > { %v12524_v6 = vadd.f32 %v12523_v25, %v12522_v0  ;;  %v12525_v4 = vpop.f32.mrb[246].mxu1  ;;  %v12636_v24 = vadd.f32 %v12635_v60, %v12634_v20  ;;  %v12637_v37 = vpop.f32.mrb[54].mxu0 }
 0x5dc   : > { %v12526_v41 = vpop.f32.mrb[247].mxu1  ;;  %v12638_v49 = vpop.f32.mrb[55].mxu0 }
 0x5dd   : > { %v12527_v9 = vadd.f32 %v12526_v41, %v12525_v4  ;;  %v12639_v7 = vadd.f32 %v12638_v49, %v12637_v37  ;;  %v15897_v41 = vld [vmem:[%s18582_s7 + $0xa0] sm:$0xff]  }
 0x5df   : > { %v17414_v15 = vpack.c.bf16 %v12527_v9, %v12524_v6  ;;  %v17416_v5 = vpack.c.bf16 %v12639_v7, %v12636_v24  ;;  %v15894_v7 = vld [vmem:[%s18582_s7 + $0x88] sm:$0xff]  }
 0x5e1   : > { %v12528_v10 = vpop.f32.mrb[248].mxu1  ;;  %13832 = vmatprep.mubr.bf16.mxu0 %v17414_v15  ;;  %v12640_v29 = vpop.f32.mrb[56].mxu0 }
 0x5e2   : > { %v12529_v38 = vpop.f32.mrb[249].mxu1  ;;  %v12641_v30 = vpop.f32.mrb[57].mxu0 }
 0x5e3   : > { %v12530_v52 = vadd.f32 %v12529_v38, %v12528_v10  ;;  %v12531_v28 = vpop.f32.mrb[250].mxu1  ;;  %v12642_v0 = vadd.f32 %v12641_v30, %v12640_v29  ;;  %v12643_v25 = vpop.f32.mrb[58].mxu0  ;;  %v15898_v38 = vld [vmem:[%s18582_s7 + $0xa8] sm:$0xff]   ;;  %v15899_v30 = vld [vmem:[%s18582_s7 + $0xb0] sm:$0xff]  }
 0x5e4   : > { %v12532_v20 = vpop.f32.mrb[251].mxu1  ;;  %v12644_v60 = vpop.f32.mrb[59].mxu0 }
 0x5e5   : > { %v12533_v18 = vadd.f32 %v12532_v20, %v12531_v28  ;;  %v12645_v62 = vadd.f32 %v12644_v60, %v12643_v25  ;;  %v15901_v28 = vld [vmem:[%s18582_s7 + $0xc0] sm:$0xff]  }
 0x5e7   : > { %v17419_v4 = vpack.c.bf16 %v12533_v18, %v12530_v52  ;;  %v17421_v9 = vpack.c.bf16 %v12645_v62, %v12642_v0  ;;  %v15895_v18 = vld [vmem:[%s18582_s7 + $0x90] sm:$0xff]   ;;  %v15896_v62 = vld [vmem:[%s18582_s7 + $0x98] sm:$0xff]  }
 0x5e8   : > { %v15900_v52 = vld [vmem:[%s18582_s7 + $0xb8] sm:$0xff]  }
 0x5e9   : > { %13833 = vmatmul.mubr.bf16.gmra.mrb[92].mxu0 %v17419_v4  ;;  %v12646_v6 = vpop.f32.mrb[60].mxu0  ;;  %v12534_v0 = vpop.f32.mrb[252].mxu1 }
 0x5ea   : > { %13852 = vmatprep.mubr.bf16.mxu0 %v18625_v47  ;;  %v12647_v24 = vpop.f32.mrb[61].mxu0  ;;  %v12535_v25 = vpop.f32.mrb[253].mxu1 }
 0x5eb   : > { %v12648_v37 = vadd.f32 %v12647_v24, %v12646_v6  ;;  %v12536_v20 = vadd.f32 %v12535_v25, %v12534_v0  ;;  %v12537_v60 = vpop.f32.mrb[254].mxu1  ;;  %v15903_v24 = vld [vmem:[%s18582_s7 + $0xd0] sm:$0xff]   ;;  %v15914_v0 = vld [vmem:[%s18582_s7 + $0x128] sm:$0xff]  }
 0x5ec   : > { %v15915_v25 = vld [vmem:[%s18582_s7 + $0x130] sm:$0xff]  }
 0x5f1   : > { %13853 = vmatmul.mubr.bf16.vlgmr.msra.gmra.mrb[64].mxu0 %v17015_v63 }
 0x5f2   : > { %13856 = vmatprep.mubr.bf16.mxu0 %v17013_v12  ;;  %13885 = vmatpush3.bf16.msra.mxu0 %v17366_v46  ;;  %v12649_v46 = vpop.f32.mrb[62].mxu0 }
 0x5f3   : > { %13886 = vmatprep.subr.bf16.mxu0 %v15894_v7  ;;  %v12650_v49 = vpop.f32.mrb[63].mxu0 }
 0x5f4   : > { %v12651_v10 = vadd.f32 %v12650_v49, %v12649_v46  ;;  %v15905_v46 = vld [vmem:[%s18582_s7 + $0xe0] sm:$0xff]   ;;  %v15907_v49 = vld [vmem:[%s18582_s7 + $0xf0] sm:$0xff]  }
 0x5f6   : > { %13887 = vmatpush3.bf16.msra.mxu0 %v15894_v7  ;;  %v17442_v29 = vpack.c.bf16 %v12651_v10, %v12648_v37  ;;  %v12538_v7 = vpop.f32.mrb[255].mxu1  ;;  %v15904_v37 = vld [vmem:[%s18582_s7 + $0xd8] sm:$0xff]  }
 0x5f7   : > { %13888 = vmatprep.subr.bf16.mxu0 %v15895_v18  ;;  %v12539_v6 = vadd.f32 %v12538_v7, %v12537_v60  ;;  %v15908_v10 = vld [vmem:[%s18582_s7 + $0xf8] sm:$0xff]   ;;  %v15917_v60 = vld [vmem:[%s18582_s7 + $0x140] sm:$0xff]   ;;  %v18628_v7 = vld [vmem:[#allocation39_spill] sm:$0xff] }
 0x5f9   : > { %13857 = vmatmul.mubr.bf16.gmra.mrb[68].mxu0 %v17023_v32 }
 0x5fa   : > { %13860 = vmatprep.mubr.bf16.mxu0 %v17021_v50  ;;  %13889 = vmatpush3.bf16.msra.mxu0 %v15895_v18  ;;  %v17466_v18 = vpack.c.bf16 %v12539_v6, %v12536_v20  ;;  %v15916_v20 = vld [vmem:[%s18582_s7 + $0x138] sm:$0xff]   ;;  %v15918_v6 = vld [vmem:[%s18582_s7 + $0x148] sm:$0xff]  }
 0x5fb   : > { %13890 = vmatprep.subr.bf16.mxu0 %v15896_v62 }
 0x5fe   : > { %13891 = vmatpush3.bf16.msra.mxu0 %v15896_v62  ;;  %v15902_v62 = vld [vmem:[%s18582_s7 + $0xc8] sm:$0xff]  }
 0x5ff   : > { %13892 = vmatprep.subr.bf16.mxu0 %v15897_v41 }
 0x601   : > { %13861 = vmatmul.mubr.bf16.gmra.mrb[72].mxu0 %v17031_v43 }
 0x602   : > { %13864 = vmatprep.mubr.bf16.mxu0 %v17029_v33  ;;  %13893 = vmatpush3.bf16.msra.mxu0 %v15897_v41  ;;  %v15906_v41 = vld [vmem:[%s18582_s7 + $0xe8] sm:$0xff]  }
 0x603   : > { %13894 = vmatprep.subr.bf16.mxu0 %v15898_v38 }
 0x606   : > { %13895 = vmatpush3.bf16.msra.mxu0 %v15898_v38  ;;  %v15909_v38 = vld [vmem:[%s18582_s7 + $0x100] sm:$0xff]  }
 0x607   : > { %13896 = vmatprep.subr.bf16.mxu0 %v15899_v30 }
 0x609   : > { %13865 = vmatmul.mubr.bf16.gmra.mrb[76].mxu0 %v17039_v36 }
 0x60a   : > { %13868 = vmatprep.mubr.bf16.mxu0 %v17037_v8  ;;  %13897 = vmatpush3.bf16.msra.mxu0 %v15899_v30  ;;  %v15910_v30 = vld [vmem:[%s18582_s7 + $0x108] sm:$0xff]  }
 0x60b   : > { %13898 = vmatprep.subr.bf16.mxu0 %v15900_v52 }
 0x60e   : > { %13899 = vmatpush3.bf16.msra.mxu0 %v15900_v52  ;;  %v15911_v52 = vld [vmem:[%s18582_s7 + $0x110] sm:$0xff]  }
 0x60f   : > { %13932 = vmatprep.subr.bf16.mxu0 %v15901_v28 }
 0x611   : > { %13869 = vmatmul.mubr.bf16.gmra.mrb[80].mxu0 %v17050_v1 }
 0x612   : > { %13872 = vmatprep.mubr.bf16.mxu0 %v17048_v27 }
 0x619   : > { %13873 = vmatmul.mubr.bf16.gmra.mrb[84].mxu0 %v17066_v26 }
 0x61a   : > { %13876 = vmatprep.mubr.bf16.mxu0 %v17062_v14 }
 0x621   : > { %13877 = vmatmul.mubr.bf16.gmra.mrb[88].mxu0 %v17082_v13 }
 0x622   : > { %13880 = vmatprep.mubr.bf16.mxu0 %v17078_v21 }
 0x629   : > { %13881 = vmatmul.mubr.bf16.gmra.mrb[92].mxu0 %v17098_v16 }
 0x62a   : > { %13900 = vmatprep.mubr.bf16.mxu0 %v18625_v47 }
 0x631   : > { %13901 = vmatmul.mubr.bf16.vlgmr.msra.gmra.mrb[64].mxu0 %v17327_v61 }
 0x632   : > { %13904 = vmatprep.mubr.bf16.mxu0 %v17338_v55  ;;  %13933 = vmatpush3.bf16.msra.mxu0 %v15901_v28  ;;  %v15913_v28 = vld [vmem:[%s18582_s7 + $0x120] sm:$0xff]  }
 0x633   : > { %13934 = vmatprep.subr.bf16.mxu0 %v15902_v62 }
 0x636   : > { %13935 = vmatpush3.bf16.msra.mxu0 %v15902_v62  ;;  %v15919_v62 = vld [vmem:[%s18582_s7 + $0x150] sm:$0xff]  }
 0x637   : > { %13936 = vmatprep.subr.bf16.mxu0 %v15903_v24 }
 0x639   : > { %13905 = vmatmul.mubr.bf16.gmra.mrb[68].mxu0 %v17349_v19 }
 0x63a   : > { %13908 = vmatprep.mubr.bf16.mxu0 %v17360_v51  ;;  %13937 = vmatpush3.bf16.msra.mxu0 %v15903_v24  ;;  %v15921_v24 = vld [vmem:[%s18582_s7 + $0x160] sm:$0xff]  }
 0x63b   : > { %13938 = vmatprep.subr.bf16.mxu0 %v15904_v37 }
 0x63e   : > { %13939 = vmatpush3.bf16.msra.mxu0 %v15904_v37  ;;  %v15922_v37 = vld [vmem:[%s18582_s7 + $0x168] sm:$0xff]  }
 0x63f   : > { %13940 = vmatprep.subr.bf16.mxu0 %v15905_v46 }
 0x641   : > { %13909 = vmatmul.mubr.bf16.gmra.mrb[72].mxu0 %v17370_v44 }
 0x642   : > { %13912 = vmatprep.mubr.bf16.mxu0 %v17376_v31  ;;  %13941 = vmatpush3.bf16.msra.mxu0 %v15905_v46  ;;  %v15923_v46 = vld [vmem:[%s18582_s7 + $0x170] sm:$0xff]  }
 0x643   : > { %13942 = vmatprep.subr.bf16.mxu0 %v15906_v41 }
 0x646   : > { %13943 = vmatpush3.bf16.msra.mxu0 %v15906_v41  ;;  %v15924_v41 = vld [vmem:[%s18582_s7 + $0x178] sm:$0xff]  }
 0x647   : > { %13944 = vmatprep.subr.bf16.mxu0 %v15907_v49 }
 0x649   : > { %13913 = vmatmul.mubr.bf16.gmra.mrb[76].mxu0 %v17381_v2 }
 0x64a   : > { %13916 = vmatprep.mubr.bf16.mxu0 %v17386_v17  ;;  %13945 = vmatpush3.bf16.msra.mxu0 %v15907_v49  ;;  %v15925_v49 = vld [vmem:[%s18582_s7 + $0x180] sm:$0xff]  }
 0x64b   : > { %13946 = vmatprep.subr.bf16.mxu0 %v15908_v10 }
 0x64e   : > { %13947 = vmatpush3.bf16.msra.mxu0 %v15908_v10  ;;  %v18629_v10 = vld [vmem:[#allocation38_spill] sm:$0xff] }
 0x64f   : > { %13980 = vmatprep.subr.bf16.mxu0 %v15909_v38 }
 0x651   : > { %13917 = vmatmul.mubr.bf16.gmra.mrb[80].mxu0 %v17391_v3 }
 0x652   : > { %13920 = vmatprep.mubr.bf16.mxu0 %v17396_v42 }
 0x659   : > { %13921 = vmatmul.mubr.bf16.gmra.mrb[84].mxu0 %v17401_v57 }
 0x65a   : > { %13924 = vmatprep.mubr.bf16.mxu0 %v17406_v53 }
 0x661   : > { %13925 = vmatmul.mubr.bf16.gmra.mrb[88].mxu0 %v17411_v39 }
 0x662   : > { %13928 = vmatprep.mubr.bf16.mxu0 %v17416_v5 }
 0x669   : > { %13929 = vmatmul.mubr.bf16.gmra.mrb[92].mxu0 %v17421_v9 }
 0x66a   : > { %13948 = vmatprep.mubr.bf16.mxu0 %v17322_v59  ;;  %v15912_v59 = vld [vmem:[%s18582_s7 + $0x118] sm:$0xff]  }
 0x671   : > { %13949 = vmatmul.mubr.bf16.vlgmr.msra.gmra.mrb[64].mxu0 %v17333_v56 }
 0x672   : > { %13952 = vmatprep.mubr.bf16.mxu0 %v17344_v58  ;;  %13981 = vmatpush3.bf16.msra.mxu0 %v15909_v38  ;;  %v15926_v38 = vld [vmem:[%s18582_s7 + $0x188] sm:$0xff]  }
 0x673   : > { %13982 = vmatprep.subr.bf16.mxu0 %v15910_v30 }
 0x676   : > { %13983 = vmatpush3.bf16.msra.mxu0 %v15910_v30  ;;  %v15927_v30 = vld [vmem:[%s18582_s7 + $0x190] sm:$0xff]  }
 0x677   : > { %13984 = vmatprep.subr.bf16.mxu0 %v15911_v52 }
 0x679   : > { %13953 = vmatmul.mubr.bf16.gmra.mrb[68].mxu0 %v17355_v45 }
 0x67a   : > { %13956 = vmatprep.mubr.bf16.mxu0 %v17368_v35  ;;  %13985 = vmatpush3.bf16.msra.mxu0 %v15911_v52  ;;  %v15929_v52 = vld [vmem:[%s18582_s7 + $0x1a0] sm:$0xff]  }
 0x67b   : > { %13986 = vmatprep.subr.bf16.mxu0 %v15912_v59 }
 0x67e   : > { %13987 = vmatpush3.bf16.msra.mxu0 %v15912_v59  ;;  %v15930_v59 = vld [vmem:[%s18582_s7 + $0x1a8] sm:$0xff]  }
 0x67f   : > { %13988 = vmatprep.subr.bf16.mxu0 %v15913_v28 }
 0x681   : > { %13957 = vmatmul.mubr.bf16.gmra.mrb[72].mxu0 %v17374_v34 }
 0x682   : > { %13960 = vmatprep.mubr.bf16.mxu0 %v17379_v48  ;;  %13989 = vmatpush3.bf16.msra.mxu0 %v15913_v28  ;;  %v15931_v28 = vld [vmem:[%s18582_s7 + $0x1b0] sm:$0xff]  }
 0x683   : > { %13990 = vmatprep.subr.bf16.mxu0 %v15914_v0 }
 0x686   : > { %13991 = vmatpush3.bf16.msra.mxu0 %v15914_v0  ;;  %v15932_v0 = vld [vmem:[%s18582_s7 + $0x1b8] sm:$0xff]  }
 0x687   : > { %13992 = vmatprep.subr.bf16.mxu0 %v15915_v25 }
 0x689   : > { %13961 = vmatmul.mubr.bf16.gmra.mrb[76].mxu0 %v17384_v22 }
 0x68a   : > { %13964 = vmatprep.mubr.bf16.mxu0 %v17389_v54  ;;  %13993 = vmatpush3.bf16.msra.mxu0 %v15915_v25  ;;  %v15933_v25 = vld [vmem:[%s18582_s7 + $0x1c0] sm:$0xff]  }
 0x68b   : > { %13994 = vmatprep.subr.bf16.mxu0 %v15916_v20 }
 0x68e   : > { %13995 = vmatpush3.bf16.msra.mxu0 %v15916_v20  ;;  %v15934_v20 = vld [vmem:[%s18582_s7 + $0x1c8] sm:$0xff]  }
 0x68f   : > { %14028 = vmatprep.subr.bf16.mxu0 %v15917_v60 }
 0x691   : > { %13965 = vmatmul.mubr.bf16.gmra.mrb[80].mxu0 %v17394_v11 }
 0x692   : > { %13968 = vmatprep.mubr.bf16.mxu0 %v17399_v23 }
 0x699   : > { %13969 = vmatmul.mubr.bf16.gmra.mrb[84].mxu0 %v17404_v40 }
 0x69a   : > { %13972 = vmatprep.mubr.bf16.mxu0 %v18628_v7 }
 0x6a1   : > { %13973 = vmatmul.mubr.bf16.gmra.mrb[88].mxu0 %v17414_v15 }
 0x6a2   : > { %13976 = vmatprep.mubr.bf16.mxu0 %v17419_v4 }
 0x6a9   : > { %13977 = vmatmul.mubr.bf16.gmra.mrb[92].mxu0 %v17466_v18 }
 0x6aa   : > { %13996 = vmatprep.mubr.bf16.mxu0 %v17015_v63  ;;  %v15920_v63 = vld [vmem:[%s18582_s7 + $0x158] sm:$0xff]  }
 0x6b1   : > { %13997 = vmatmul.mubr.bf16.vlgmr.msra.gmra.mrb[64].mxu0 %v17013_v12 }
 0x6b2   : > { %14000 = vmatprep.mubr.bf16.mxu0 %v17023_v32  ;;  %14029 = vmatpush3.bf16.msra.mxu0 %v15917_v60  ;;  %v15935_v60 = vld [vmem:[%s18582_s7 + $0x1d0] sm:$0xff]  }
 0x6b3   : > { %14030 = vmatprep.subr.bf16.mxu0 %v15918_v6 }
 0x6b6   : > { %14031 = vmatpush3.bf16.msra.mxu0 %v15918_v6 }
 0x6b7   : > { %14032 = vmatprep.subr.bf16.mxu0 %v15919_v62 }
 0x6b9   : > { %14001 = vmatmul.mubr.bf16.gmra.mrb[68].mxu0 %v17021_v50 }
 0x6ba   : > { %14004 = vmatprep.mubr.bf16.mxu0 %v17031_v43  ;;  %14033 = vmatpush3.bf16.msra.mxu0 %v15919_v62 }
 0x6bb   : > { %14034 = vmatprep.subr.bf16.mxu0 %v15920_v63 }
 0x6be   : > { %14035 = vmatpush3.bf16.msra.mxu0 %v15920_v63 }
 0x6bf   : > { %14036 = vmatprep.subr.bf16.mxu0 %v15921_v24 }
 0x6c1   : > { %14005 = vmatmul.mubr.bf16.gmra.mrb[72].mxu0 %v17029_v33 }
 0x6c2   : > { %14008 = vmatprep.mubr.bf16.mxu0 %v17039_v36  ;;  %14037 = vmatpush3.bf16.msra.mxu0 %v15921_v24 }
 0x6c3   : > { %14038 = vmatprep.subr.bf16.mxu0 %v15922_v37 }
 0x6c6   : > { %14039 = vmatpush3.bf16.msra.mxu0 %v15922_v37 }
 0x6c7   : > { %14040 = vmatprep.subr.bf16.mxu0 %v15923_v46 }
 0x6c9   : > { %14009 = vmatmul.mubr.bf16.gmra.mrb[76].mxu0 %v17037_v8 }
 0x6ca   : > { %14012 = vmatprep.mubr.bf16.mxu0 %v17050_v1  ;;  %14041 = vmatpush3.bf16.msra.mxu0 %v15923_v46 }
 0x6cb   : > { %14042 = vmatprep.subr.bf16.mxu0 %v15924_v41 }
 0x6ce   : > { %14043 = vmatpush3.bf16.msra.mxu0 %v15924_v41 }
 0x6cf   : > { %14076 = vmatprep.subr.bf16.mxu0 %v15925_v49 }
 0x6d1   : > { %14013 = vmatmul.mubr.bf16.gmra.mrb[80].mxu0 %v17048_v27 }
 0x6d2   : > { %14016 = vmatprep.mubr.bf16.mxu0 %v17066_v26 }
 0x6d9   : > { %14017 = vmatmul.mubr.bf16.gmra.mrb[84].mxu0 %v17062_v14 }
 0x6da   : > { %14020 = vmatprep.mubr.bf16.mxu0 %v17082_v13 }
 0x6e1   : > { %14021 = vmatmul.mubr.bf16.gmra.mrb[88].mxu0 %v17078_v21 }
 0x6e2   : > { %14024 = vmatprep.mubr.bf16.mxu0 %v17098_v16 }
 0x6e9   : > { %14025 = vmatmul.mubr.bf16.gmra.mrb[92].mxu0 %v18629_v10 }
 0x6ea   : > { %14044 = vmatprep.mubr.bf16.mxu0 %v17327_v61  ;;  %v15928_v61 = vld [vmem:[%s18582_s7 + $0x198] sm:$0xff]  }
 0x6f1   : > { %14045 = vmatmul.mubr.bf16.vlgmr.msra.gmra.mrb[64].mxu0 %v17338_v55 }
 0x6f2   : > { %14048 = vmatprep.mubr.bf16.mxu0 %v17349_v19  ;;  %14077 = vmatpush3.bf16.msra.mxu0 %v15925_v49 }
 0x6f3   : > { %14078 = vmatprep.subr.bf16.mxu0 %v15926_v38 }
 0x6f6   : > { %14079 = vmatpush3.bf16.msra.mxu0 %v15926_v38 }
 0x6f7   : > { %14080 = vmatprep.subr.bf16.mxu0 %v15927_v30 }
 0x6f9   : > { %14049 = vmatmul.mubr.bf16.gmra.mrb[68].mxu0 %v17360_v51 }
 0x6fa   : > { %14052 = vmatprep.mubr.bf16.mxu0 %v17370_v44  ;;  %14081 = vmatpush3.bf16.msra.mxu0 %v15927_v30 }
 0x6fb   : > { %14082 = vmatprep.subr.bf16.mxu0 %v15928_v61 }
 0x6fe   : > { %14083 = vmatpush3.bf16.msra.mxu0 %v15928_v61 }
 0x6ff   : > { %14084 = vmatprep.subr.bf16.mxu0 %v15929_v52 }
 0x701   : > { %14053 = vmatmul.mubr.bf16.gmra.mrb[72].mxu0 %v17376_v31 }
 0x702   : > { %14056 = vmatprep.mubr.bf16.mxu0 %v17381_v2  ;;  %14085 = vmatpush3.bf16.msra.mxu0 %v15929_v52 }
 0x703   : > { %14086 = vmatprep.subr.bf16.mxu0 %v15930_v59 }
 0x706   : > { %14087 = vmatpush3.bf16.msra.mxu0 %v15930_v59 }
 0x707   : > { %14088 = vmatprep.subr.bf16.mxu0 %v15931_v28 }
 0x709   : > { %14057 = vmatmul.mubr.bf16.gmra.mrb[76].mxu0 %v17386_v17 }
 0x70a   : > { %14060 = vmatprep.mubr.bf16.mxu0 %v17391_v3  ;;  %14089 = vmatpush3.bf16.msra.mxu0 %v15931_v28 }
 0x70b   : > { %14090 = vmatprep.subr.bf16.mxu0 %v15932_v0 }
 0x70e   : > { %14091 = vmatpush3.bf16.msra.mxu0 %v15932_v0 }
 0x70f   : > { %14124 = vmatprep.subr.bf16.mxu0 %v15933_v25 }
 0x711   : > { %14061 = vmatmul.mubr.bf16.gmra.mrb[80].mxu0 %v17396_v42 }
 0x712   : > { %14064 = vmatprep.mubr.bf16.mxu0 %v17401_v57 }
 0x719   : > { %14065 = vmatmul.mubr.bf16.gmra.mrb[84].mxu0 %v17406_v53 }
 0x71a   : > { %14068 = vmatprep.mubr.bf16.mxu0 %v17411_v39 }
 0x721   : > { %14069 = vmatmul.mubr.bf16.gmra.mrb[88].mxu0 %v17416_v5 }
 0x722   : > { %14072 = vmatprep.mubr.bf16.mxu0 %v17421_v9 }
 0x729   : > { %14073 = vmatmul.mubr.bf16.gmra.mrb[92].mxu0 %v17442_v29 }
 0x72a   : > { %14092 = vmatprep.mubr.bf16.mxu0 %v17333_v56  ;;  %v15936_v56 = vld [vmem:[%s18582_s7 + $0x1d8] sm:$0xff]  }
 0x731   : > { %14093 = vmatmul.mubr.bf16.vlgmr.msra.gmra.mrb[64].mxu0 %v17344_v58  ;;  %v15937_v58 = vld [vmem:[%s18582_s7 + $0x1e0] sm:$0xff]  }
 0x732   : > { %14096 = vmatprep.mubr.bf16.mxu0 %v17355_v45  ;;  %14125 = vmatpush3.bf16.msra.mxu0 %v15933_v25  ;;  %v15938_v45 = vld [vmem:[%s18582_s7 + $0x1e8] sm:$0xff]  }
 0x733   : > { %14126 = vmatprep.subr.bf16.mxu0 %v15934_v20 }
 0x736   : > { %14127 = vmatpush3.bf16.msra.mxu0 %v15934_v20 }
 0x737   : > { %14128 = vmatprep.subr.bf16.mxu0 %v15935_v60 }
 0x739   : > { %14097 = vmatmul.mubr.bf16.gmra.mrb[68].mxu0 %v17368_v35  ;;  %v15939_v35 = vld [vmem:[%s18582_s7 + $0x1f0] sm:$0xff]  }
 0x73a   : > { %14100 = vmatprep.mubr.bf16.mxu0 %v17374_v34  ;;  %14129 = vmatpush3.bf16.msra.mxu0 %v15935_v60  ;;  %v15940_v34 = vld [vmem:[%s18582_s7 + $0x1f8] sm:$0xff]  }
 0x73b   : > { %14130 = vmatprep.subr.bf16.mxu0 %v15936_v56 }
 0x73e   : > { %14131 = vmatpush3.bf16.msra.mxu0 %v15936_v56 }
 0x73f   : > { %14132 = vmatprep.subr.bf16.mxu0 %v15937_v58 }
 0x741   : > { %14101 = vmatmul.mubr.bf16.gmra.mrb[72].mxu0 %v17379_v48  ;;  %v15941_v48 = vld [vmem:[%s18582_s7 + $0x200] sm:$0xff]  }
 0x742   : > { %14104 = vmatprep.mubr.bf16.mxu0 %v17384_v22  ;;  %14133 = vmatpush3.bf16.msra.mxu0 %v15937_v58  ;;  %v15942_v22 = vld [vmem:[%s18582_s7 + $0x208] sm:$0xff]  }
 0x743   : > { %14134 = vmatprep.subr.bf16.mxu0 %v15938_v45 }
 0x746   : > { %14135 = vmatpush3.bf16.msra.mxu0 %v15938_v45 }
 0x747   : > { %14136 = vmatprep.subr.bf16.mxu0 %v15939_v35 }
 0x749   : > { %14105 = vmatmul.mubr.bf16.gmra.mrb[76].mxu0 %v17389_v54  ;;  %v15943_v54 = vld [vmem:[%s18582_s7 + $0x210] sm:$0xff]  }
 0x74a   : > { %14108 = vmatprep.mubr.bf16.mxu0 %v17394_v11  ;;  %14137 = vmatpush3.bf16.msra.mxu0 %v15939_v35 }
 0x74b   : > { %14138 = vmatprep.subr.bf16.mxu0 %v15940_v34 }
 0x74e   : > { %14139 = vmatpush3.bf16.msra.mxu0 %v15940_v34 }
 0x74f   : > { %14172 = vmatprep.subr.bf16.mxu0 %v15941_v48 }
 0x751   : > { %14109 = vmatmul.mubr.bf16.gmra.mrb[80].mxu0 %v17399_v23 }
 0x752   : > { %14112 = vmatprep.mubr.bf16.mxu0 %v17404_v40 }
 0x759   : > { %14113 = vmatmul.mubr.bf16.gmra.mrb[84].mxu0 %v18628_v7 }
 0x75a   : > { %14116 = vmatprep.mubr.bf16.mxu0 %v17414_v15 }
 0x761   : > { %14117 = vmatmul.mubr.bf16.gmra.mrb[88].mxu0 %v17419_v4 }
 0x762   : > { %14120 = vmatprep.mubr.bf16.mxu0 %v17466_v18 }
 0x769   : > { %14121 = vmatmul.mubr.bf16.gmra.mrb[92].mxu0 %v18625_v47 }
 0x76a   : > { %14140 = vmatprep.mubr.bf16.mxu0 %v17013_v12  ;;  %v15944_v12 = vld [vmem:[%s18582_s7 + $0x218] sm:$0xff]  }
 0x771   : > { %14141 = vmatmul.mubr.bf16.vlgmr.msra.gmra.mrb[64].mxu0 %v17023_v32  ;;  %v15946_v32 = vld [vmem:[%s18582_s7 + $0x228] sm:$0xff]  }
 0x772   : > { %14144 = vmatprep.mubr.bf16.mxu0 %v17021_v50  ;;  %14173 = vmatpush3.bf16.msra.mxu0 %v15941_v48  ;;  %v15945_v50 = vld [vmem:[%s18582_s7 + $0x220] sm:$0xff]  }
 0x773   : > { %14174 = vmatprep.subr.bf16.mxu0 %v15942_v22 }
 0x776   : > { %14175 = vmatpush3.bf16.msra.mxu0 %v15942_v22 }
 0x777   : > { %14176 = vmatprep.subr.bf16.mxu0 %v15943_v54 }
 0x779   : > { %14145 = vmatmul.mubr.bf16.gmra.mrb[68].mxu0 %v17031_v43  ;;  %v15948_v43 = vld [vmem:[%s18582_s7 + $0x238] sm:$0xff]  }
 0x77a   : > { %14148 = vmatprep.mubr.bf16.mxu0 %v17029_v33  ;;  %14177 = vmatpush3.bf16.msra.mxu0 %v15943_v54  ;;  %v15947_v33 = vld [vmem:[%s18582_s7 + $0x230] sm:$0xff]  }
 0x77b   : > { %14178 = vmatprep.subr.bf16.mxu0 %v15944_v12 }
 0x77e   : > { %14179 = vmatpush3.bf16.msra.mxu0 %v15944_v12 }
 0x77f   : > { %14180 = vmatprep.subr.bf16.mxu0 %v15945_v50 }
 0x781   : > { %14149 = vmatmul.mubr.bf16.gmra.mrb[72].mxu0 %v17039_v36  ;;  %v17729_v36 = vld [vmem:[%s18583_s8] ss:$0 sm:$0xff] }
 0x782   : > { %14152 = vmatprep.mubr.bf16.mxu0 %v17037_v8  ;;  %14181 = vmatpush3.bf16.msra.mxu0 %v15945_v50  ;;  %v15951_v8 = vld [vmem:[%s18576_s1 + $0x4] ss:$8 sps:$4 sm:$0xff]  }
 0x783   : > { %14182 = vmatprep.subr.bf16.mxu0 %v15946_v32  ;;  %7627 = vmatprep.mubr.bf16.mxu1 %v15951_v8 }
 0x786   : > { %14183 = vmatpush3.bf16.msra.mxu0 %v15946_v32 }
 0x787   : > { %14184 = vmatprep.subr.bf16.mxu0 %v15947_v33 }
 0x789   : > { %14153 = vmatmul.mubr.bf16.gmra.mrb[76].mxu0 %v17050_v1 }
 0x78a   : > { %14156 = vmatprep.mubr.bf16.mxu0 %v17048_v27  ;;  %14185 = vmatpush3.bf16.msra.mxu0 %v15947_v33 }
 0x78b   : > { %14186 = vmatprep.subr.bf16.mxu0 %v15948_v43 }
 0x78e   : > { %14187 = vmatpush3.bf16.msra.mxu0 %v15948_v43 }
 0x791   : > { %14157 = vmatmul.mubr.bf16.gmra.mrb[80].mxu0 %v17066_v26 }
 0x792   : > { %14160 = vmatprep.mubr.bf16.mxu0 %v17062_v14 }
 0x799   : > { %14161 = vmatmul.mubr.bf16.gmra.mrb[84].mxu0 %v17082_v13 }
 0x79a   : > { %14164 = vmatprep.mubr.bf16.mxu0 %v17078_v21 }
 0x7a1   : > { %14165 = vmatmul.mubr.bf16.gmra.mrb[88].mxu0 %v17098_v16 }
 0x7a2   : > { %14168 = vmatprep.mubr.bf16.mxu0 %v18629_v10 }
 0x7a9   : > { %14169 = vmatmul.mubr.bf16.gmra.mrb[92].mxu0 %v18625_v47 }
 0x7aa   : > { %14188 = vmatprep.mubr.bf16.mxu0 %v17338_v55 }
 0x7b1   : > { %14189 = vmatmul.mubr.bf16.vlgmr.msra.gmra.mrb[64].mxu0 %v17349_v19 }
 0x7b2   : > { %14192 = vmatprep.mubr.bf16.mxu0 %v17360_v51 }
 0x7b9   : > { %14193 = vmatmul.mubr.bf16.gmra.mrb[68].mxu0 %v17370_v44 }
 0x7ba   : > { %14196 = vmatprep.mubr.bf16.mxu0 %v17376_v31 }
 0x7c1   : > { %14197 = vmatmul.mubr.bf16.gmra.mrb[72].mxu0 %v17381_v2 }
 0x7c2   : > { %14200 = vmatprep.mubr.bf16.mxu0 %v17386_v17 }
 0x7c9   : > { %14201 = vmatmul.mubr.bf16.gmra.mrb[76].mxu0 %v17391_v3 }
 0x7ca   : > { %14204 = vmatprep.mubr.bf16.mxu0 %v17396_v42 }
 0x7d1   : > { %14205 = vmatmul.mubr.bf16.gmra.mrb[80].mxu0 %v17401_v57 }
 0x7d2   : > { %14208 = vmatprep.mubr.bf16.mxu0 %v17406_v53 }
 0x7d9   : > { %14209 = vmatmul.mubr.bf16.gmra.mrb[84].mxu0 %v17411_v39 }
 0x7da   : > { %14212 = vmatprep.mubr.bf16.mxu0 %v17416_v5 }
 0x7e1   : > { %14213 = vmatmul.mubr.bf16.gmra.mrb[88].mxu0 %v17421_v9 }
 0x7e2   : > { %14216 = vmatprep.mubr.bf16.mxu0 %v17442_v29 }
 0x7e9   : > { %14217 = vmatmul.mubr.bf16.gmra.mrb[92].mxu0 %v18625_v47 }
 0x7ea   : > { %14236 = vmatprep.mubr.bf16.mxu0 %v18625_v47 }
 0x884   : > { %v14190_v27 = vpop.f32.mrb[64].mxu0 }
 0x885   : > { %v14780_v1 = vadd.f32 %v14190_v27, %v17729_v36  ;;  %v7196_v14 = vpop.f32.mrb[65].mxu0 }
 0x886   : > { %v14781_v26 = vadd.f32 %v17729_v36, %v7196_v14  ;;  %v14191_v21 = vpop.f32.mrb[66].mxu0 }
 0x887   : > { %v14782_v13 = vadd.f32 %v14191_v21, %v17729_v36  ;;  %v7199_v16 = vpop.f32.mrb[67].mxu0  ;;  %v7357_v19 = vmax.f32 %v14780_v1, 0.0 }
 0x888   : > { %v14783_v55 = vadd.f32 %v17729_v36, %v7199_v16  ;;  %v7355_v44 = vmax.f32 %v14781_v26, 0.0 }
 0x889   : > { %v7358_v51 = vmax.f32 %v14782_v13, 0.0 }
 0x88a   : > { %v7356_v31 = vmax.f32 %v14783_v55, 0.0 }
 0x88b   : > { %v17735_v2 = vpack.c.bf16 %v7358_v51, %v7357_v19 }
 0x88c   : > { %v17737_v17 = vpack.c.bf16 %v7356_v31, %v7355_v44  ;;  %v14194_v3 = vpop.f32.mrb[68].mxu0 }
 0x88d   : > { %v14784_v11 = vadd.f32 %v14194_v3, %v17729_v36  ;;  %v7212_v42 = vpop.f32.mrb[69].mxu0 }
 0x88e   : > { %v14785_v23 = vadd.f32 %v17729_v36, %v7212_v42  ;;  %v14195_v57 = vpop.f32.mrb[70].mxu0 }
 0x88f   : > { %v14786_v40 = vadd.f32 %v14195_v57, %v17729_v36  ;;  %v7215_v53 = vpop.f32.mrb[71].mxu0  ;;  %v7361_v15 = vmax.f32 %v14784_v11, 0.0 }
 0x890   : > { %v14787_v39 = vadd.f32 %v17729_v36, %v7215_v53  ;;  %v7359_v4 = vmax.f32 %v14785_v23, 0.0 }
 0x891   : > { %v7362_v5 = vmax.f32 %v14786_v40, 0.0 }
 0x892   : > { %v7360_v9 = vmax.f32 %v14787_v39, 0.0 }
 0x893   : > { %v17743_v29 = vpack.c.bf16 %v7362_v5, %v7361_v15 }
 0x894   : > { %v17745_v18 = vpack.c.bf16 %v7360_v9, %v7359_v4  ;;  %v14198_v7 = vpop.f32.mrb[72].mxu0 }
 0x895   : > { %v14788_v6 = vadd.f32 %v14198_v7, %v17729_v36  ;;  %v7228_v62 = vpop.f32.mrb[73].mxu0 }
 0x896   : > { %v14789_v63 = vadd.f32 %v17729_v36, %v7228_v62  ;;  %v14199_v24 = vpop.f32.mrb[74].mxu0 }
 0x897   : > { %v14790_v37 = vadd.f32 %v14199_v24, %v17729_v36  ;;  %v7231_v46 = vpop.f32.mrb[75].mxu0  ;;  %v7365_v49 = vmax.f32 %v14788_v6, 0.0 }
 0x898   : > { %v14791_v41 = vadd.f32 %v17729_v36, %v7231_v46  ;;  %v7363_v38 = vmax.f32 %v14789_v63, 0.0 }
 0x899   : > { %v7366_v10 = vmax.f32 %v14790_v37, 0.0 }
 0x89a   : > { %v7364_v30 = vmax.f32 %v14791_v41, 0.0 }
 0x89b   : > { %v17751_v61 = vpack.c.bf16 %v7366_v10, %v7365_v49 }
 0x89c   : > { %v17753_v52 = vpack.c.bf16 %v7364_v30, %v7363_v38  ;;  %v14202_v59 = vpop.f32.mrb[76].mxu0 }
 0x89d   : > { %v14792_v28 = vadd.f32 %v14202_v59, %v17729_v36  ;;  %v7244_v0 = vpop.f32.mrb[77].mxu0 }
 0x89e   : > { %v14793_v25 = vadd.f32 %v17729_v36, %v7244_v0  ;;  %v14203_v20 = vpop.f32.mrb[78].mxu0 }
 0x89f   : > { %v14794_v60 = vadd.f32 %v14203_v20, %v17729_v36  ;;  %v7247_v56 = vpop.f32.mrb[79].mxu0  ;;  %v7369_v45 = vmax.f32 %v14792_v28, 0.0 }
 0x8a0   : > { %v14795_v58 = vadd.f32 %v17729_v36, %v7247_v56  ;;  %v7367_v34 = vmax.f32 %v14793_v25, 0.0 }
 0x8a1   : > { %v7370_v35 = vmax.f32 %v14794_v60, 0.0 }
 0x8a2   : > { %v7368_v48 = vmax.f32 %v14795_v58, 0.0 }
 0x8a3   : > { %v17759_v22 = vpack.c.bf16 %v7370_v35, %v7369_v45 }
 0x8a4   : > { %v17761_v54 = vpack.c.bf16 %v7368_v48, %v7367_v34  ;;  %v14206_v12 = vpop.f32.mrb[80].mxu0 }
 0x8a5   : > { %v14796_v50 = vadd.f32 %v14206_v12, %v17729_v36  ;;  %v7260_v32 = vpop.f32.mrb[81].mxu0 }
 0x8a6   : > { %v14797_v33 = vadd.f32 %v17729_v36, %v7260_v32  ;;  %v14207_v43 = vpop.f32.mrb[82].mxu0  ;;  %v15954_v32 = vld [vmem:[%s18576_s1 + $0x14] ss:$8 sps:$4 sm:$0xff]  }
 0x8a7   : > { %v14798_v8 = vadd.f32 %v14207_v43, %v17729_v36  ;;  %v7263_v27 = vpop.f32.mrb[83].mxu0  ;;  %v7373_v14 = vmax.f32 %v14796_v50, 0.0  ;;  %v15957_v43 = vld [vmem:[%s18576_s1 + $0x24] ss:$8 sps:$4 sm:$0xff]  }
 0x8a8   : > { %v14799_v1 = vadd.f32 %v17729_v36, %v7263_v27  ;;  %v7371_v21 = vmax.f32 %v14797_v33, 0.0  ;;  %v15952_v33 = vld [vmem:[%s18576_s1 + $0x10] ss:$8 sps:$4 sm:$0xff]   ;;  %v15960_v27 = vld [vmem:[%s18576_s1 + $0x34] ss:$8 sps:$4 sm:$0xff]  }
 0x8a9   : > { %v7374_v26 = vmax.f32 %v14798_v8, 0.0  ;;  %v15955_v8 = vld [vmem:[%s18576_s1 + $0x20] ss:$8 sps:$4 sm:$0xff]  }
 0x8aa   : > { %v7372_v13 = vmax.f32 %v14799_v1, 0.0  ;;  %v15958_v1 = vld [vmem:[%s18576_s1 + $0x30] ss:$8 sps:$4 sm:$0xff]  }
 0x8ab   : > { %v17767_v16 = vpack.c.bf16 %v7374_v26, %v7373_v14  ;;  %v15963_v14 = vld [vmem:[%s18576_s1 + $0x44] ss:$8 sps:$4 sm:$0xff]   ;;  %v15961_v26 = vld [vmem:[%s18576_s1 + $0x40] ss:$8 sps:$4 sm:$0xff]  }
 0x8ac   : > { %v17769_v55 = vpack.c.bf16 %v7372_v13, %v7371_v21  ;;  %v14210_v19 = vpop.f32.mrb[84].mxu0  ;;  %v15966_v21 = vld [vmem:[%s18576_s1 + $0x54] ss:$8 sps:$4 sm:$0xff]   ;;  %v15964_v13 = vld [vmem:[%s18576_s1 + $0x50] ss:$8 sps:$4 sm:$0xff]  }
 0x8ad   : > { %v14800_v51 = vadd.f32 %v14210_v19, %v17729_v36  ;;  %v7276_v44 = vpop.f32.mrb[85].mxu0  ;;  %v15969_v19 = vld [vmem:[%s18576_s1 + $0x64] ss:$8 sps:$4 sm:$0xff]  }
 0x8ae   : > { %v14801_v31 = vadd.f32 %v17729_v36, %v7276_v44  ;;  %v14211_v3 = vpop.f32.mrb[86].mxu0  ;;  %12868 = vmatprep.subr.bf16.mxu1 %v17769_v55  ;;  %v15972_v44 = vld [vmem:[%s18576_s1 + $0x74] ss:$8 sps:$4 sm:$0xff]  }
 0x8af   : > { %v14802_v11 = vadd.f32 %v14211_v3, %v17729_v36  ;;  %v7279_v42 = vpop.f32.mrb[87].mxu0  ;;  %12869 = vmatpush3.bf16.msra.mxu1 %v17737_v17  ;;  %v7377_v57 = vmax.f32 %v14800_v51, 0.0  ;;  %v15967_v51 = vld [vmem:[%s18576_s1 + $0x60] ss:$8 sps:$4 sm:$0xff]   ;;  %v15975_v3 = vld [vmem:[%s18576_s1 + $0x84] ss:$8 sps:$4 sm:$0xff]  }
 0x8b0   : > { %v14803_v23 = vadd.f32 %v17729_v36, %v7279_v42  ;;  %12870 = vmatprep.subr.bf16.mxu1 %v17767_v16  ;;  %v7375_v53 = vmax.f32 %v14801_v31, 0.0  ;;  %v15970_v31 = vld [vmem:[%s18576_s1 + $0x70] ss:$8 sps:$4 sm:$0xff]   ;;  %v15973_v42 = vld [vmem:[%s18576_s1 + $0x80] ss:$8 sps:$4 sm:$0xff]  }
 0x8b1   : > { %v7378_v40 = vmax.f32 %v14802_v11, 0.0  ;;  %v16042_v11 = vld [vmem:[%s18584_s9] sm:$0xff]  }
 0x8b2   : > { %v7376_v39 = vmax.f32 %v14803_v23, 0.0  ;;  %14220 = vmatprep.subr.bf16.mxu0 %v16042_v11  ;;  %v15978_v23 = vld [vmem:[%s18576_s1 + $0x94] ss:$8 sps:$4 sm:$0xff]  }
 0x8b3   : > { %v17778_v15 = vpack.c.bf16 %v7378_v40, %v7377_v57  ;;  %12871 = vmatpush3.bf16.msra.mxu1 %v17735_v2  ;;  %14221 = vmatpush3.bf16.msra.mxu0 %v16042_v11  ;;  %v16043_v57 = vld [vmem:[%s18584_s9 + $0x8] sm:$0xff]   ;;  %v16044_v40 = vld [vmem:[%s18584_s9 + $0x10] sm:$0xff]  }
 0x8b4   : > { %v17781_v5 = vpack.c.bf16 %v7376_v39, %v7375_v53  ;;  %v14214_v4 = vpop.f32.mrb[88].mxu0  ;;  %14222 = vmatprep.subr.bf16.mxu0 %v16043_v57  ;;  %v15976_v53 = vld [vmem:[%s18576_s1 + $0x90] ss:$8 sps:$4 sm:$0xff]   ;;  %v15981_v39 = vld [vmem:[%s18576_s1 + $0xa4] ss:$8 sps:$4 sm:$0xff]  }
 0x8b5   : > { %v14804_v9 = vadd.f32 %v14214_v4, %v17729_v36  ;;  %v7292_v7 = vpop.f32.mrb[89].mxu0  ;;  %v16045_v4 = vld [vmem:[%s18584_s9 + $0x18] sm:$0xff]  }
 0x8b6   : > { %v14805_v6 = vadd.f32 %v17729_v36, %v7292_v7  ;;  %v14215_v62 = vpop.f32.mrb[90].mxu0  ;;  %12872 = vmatprep.subr.bf16.mxu1 %v17781_v5  ;;  %v15979_v7 = vld [vmem:[%s18576_s1 + $0xa0] ss:$8 sps:$4 sm:$0xff]  }
 0x8b7   : > { %v14806_v63 = vadd.f32 %v14215_v62, %v17729_v36  ;;  %v7295_v24 = vpop.f32.mrb[91].mxu0  ;;  %12873 = vmatpush3.bf16.msra.mxu1 %v17745_v18  ;;  %v7381_v46 = vmax.f32 %v14804_v9, 0.0  ;;  %14223 = vmatpush3.bf16.msra.mxu0 %v16043_v57  ;;  %v16046_v9 = vld [vmem:[%s18584_s9 + $0x20] sm:$0xff]   ;;  %v16047_v62 = vld [vmem:[%s18584_s9 + $0x28] sm:$0xff]  }
 0x8b8   : > { %v14807_v37 = vadd.f32 %v17729_v36, %v7295_v24  ;;  %12874 = vmatprep.subr.bf16.mxu1 %v17778_v15  ;;  %v7379_v49 = vmax.f32 %v14805_v6, 0.0  ;;  %14224 = vmatprep.subr.bf16.mxu0 %v16044_v40  ;;  %v15984_v6 = vld [vmem:[%s18576_s1 + $0xb4] ss:$8 sps:$4 sm:$0xff]   ;;  %v15982_v24 = vld [vmem:[%s18576_s1 + $0xb0] ss:$8 sps:$4 sm:$0xff]  }
 0x8b9   : > { %v7382_v41 = vmax.f32 %v14806_v63, 0.0  ;;  %v16048_v63 = vld [vmem:[%s18584_s9 + $0x30] sm:$0xff]   ;;  %v16035_v57 = vld [vmem:[%s18577_s2 + $0xc4] ss:$8 sps:$4 sm:$0xff]  }
 0x8ba   : > { %v7380_v10 = vmax.f32 %v14807_v37, 0.0  ;;  %v15987_v37 = vld [vmem:[%s18576_s1 + $0xc4] ss:$8 sps:$4 sm:$0xff]  }
 0x8bb   : > { %v17790_v38 = vpack.c.bf16 %v7382_v41, %v7381_v46  ;;  %12875 = vmatpush3.bf16.msra.mxu1 %v17743_v29  ;;  %14225 = vmatpush3.bf16.msra.mxu0 %v16044_v40  ;;  %v16049_v46 = vld [vmem:[%s18584_s9 + $0x38] sm:$0xff]   ;;  %v15985_v41 = vld [vmem:[%s18576_s1 + $0xc0] ss:$8 sps:$4 sm:$0xff]  }
 0x8bc   : > { %v17793_v30 = vpack.c.bf16 %v7380_v10, %v7379_v49  ;;  %v14218_v59 = vpop.f32.mrb[92].mxu0  ;;  %14226 = vmatprep.subr.bf16.mxu0 %v16045_v4  ;;  %v15990_v49 = vld [vmem:[%s18576_s1 + $0xd4] ss:$8 sps:$4 sm:$0xff]   ;;  %v15988_v10 = vld [vmem:[%s18576_s1 + $0xd0] ss:$8 sps:$4 sm:$0xff]  }
 0x8bd   : > { %v14808_v28 = vadd.f32 %v14218_v59, %v17729_v36  ;;  %v7308_v0 = vpop.f32.mrb[93].mxu0  ;;  %v15993_v59 = vld [vmem:[%s18576_s1 + $0xe4] ss:$8 sps:$4 sm:$0xff]  }
 0x8be   : > { %v14809_v25 = vadd.f32 %v17729_v36, %v7308_v0  ;;  %v14219_v20 = vpop.f32.mrb[94].mxu0  ;;  %12876 = vmatprep.subr.bf16.mxu1 %v17793_v30  ;;  %v15996_v0 = vld [vmem:[%s18576_s1 + $0xf4] ss:$8 sps:$4 sm:$0xff]  }
 0x8bf   : > { %v14810_v60 = vadd.f32 %v14219_v20, %v17729_v36  ;;  %v7311_v56 = vpop.f32.mrb[95].mxu0  ;;  %12877 = vmatpush3.bf16.msra.mxu1 %v17753_v52  ;;  %v7385_v45 = vmax.f32 %v14808_v28, 0.0  ;;  %14227 = vmatpush3.bf16.msra.mxu0 %v16045_v4  ;;  %v15991_v28 = vld [vmem:[%s18576_s1 + $0xe0] ss:$8 sps:$4 sm:$0xff]   ;;  %v15999_v20 = vld [vmem:[%s18577_s2 + $0x4] ss:$8 sps:$4 sm:$0xff]  }
 0x8c0   : > { %v14811_v58 = vadd.f32 %v17729_v36, %v7311_v56  ;;  %12878 = vmatprep.subr.bf16.mxu1 %v17790_v38  ;;  %v7383_v34 = vmax.f32 %v14809_v25, 0.0  ;;  %v15949_v36 = vld [vmem:[%s18576_s1] ss:$8 sps:$4 sm:$0xff]   ;;  %14228 = vmatprep.subr.bf16.mxu0 %v16046_v9  ;;  %v15994_v25 = vld [vmem:[%s18576_s1 + $0xf0] ss:$8 sps:$4 sm:$0xff]  }
 0x8c1   : > { %v7386_v35 = vmax.f32 %v14810_v60, 0.0  ;;  %v15997_v60 = vld [vmem:[%s18577_s2] ss:$8 sps:$4 sm:$0xff]   ;;  %v16002_v56 = vld [vmem:[%s18577_s2 + $0x14] ss:$8 sps:$4 sm:$0xff]  }
 0x8c2   : > { %v7384_v48 = vmax.f32 %v14811_v58, 0.0  ;;  %v16000_v58 = vld [vmem:[%s18577_s2 + $0x10] ss:$8 sps:$4 sm:$0xff]  }
 0x8c3   : > { %v17802_v12 = vpack.c.bf16 %v7386_v35, %v7385_v45  ;;  %12879 = vmatpush3.bf16.msra.mxu1 %v17751_v61  ;;  %14229 = vmatpush3.bf16.msra.mxu0 %v16046_v9  ;;  %v16005_v45 = vld [vmem:[%s18577_s2 + $0x24] ss:$8 sps:$4 sm:$0xff]   ;;  %v16003_v35 = vld [vmem:[%s18577_s2 + $0x20] ss:$8 sps:$4 sm:$0xff]  }
 0x8c4   : > { %v17805_v50 = vpack.c.bf16 %v7384_v48, %v7383_v34  ;;  %14230 = vmatprep.subr.bf16.mxu0 %v16047_v62  ;;  %v16008_v34 = vld [vmem:[%s18577_s2 + $0x34] ss:$8 sps:$4 sm:$0xff]   ;;  %v16006_v48 = vld [vmem:[%s18577_s2 + $0x30] ss:$8 sps:$4 sm:$0xff]  }
 0x8c6   : > { %12880 = vmatprep.subr.bf16.mxu1 %v17805_v50 }
 0x8c7   : > { %12881 = vmatpush3.bf16.msra.mxu1 %v17761_v54  ;;  %14231 = vmatpush3.bf16.msra.mxu0 %v16047_v62  ;;  %v16033_v62 = vld [vmem:[%s18577_s2 + $0xc0] ss:$8 sps:$4 sm:$0xff]  }
 0x8c8   : > { %12882 = vmatprep.subr.bf16.mxu1 %v17802_v12  ;;  %14232 = vmatprep.subr.bf16.mxu0 %v16048_v63 }
 0x8cb   : > { %12883 = vmatpush3.bf16.msra.mxu1 %v17759_v22  ;;  %14233 = vmatpush3.bf16.msra.mxu0 %v16048_v63 }
 0x8cc   : > { %12980 = vmatprep.subr.bf16.mxu1 %v17769_v55  ;;  %14234 = vmatprep.subr.bf16.mxu0 %v16049_v46 }
 0x8ce   : > { %7628 = vmatmul.mubr.bf16.vlgmr.msra.gmra.mrb[32].mxu1 %v15949_v36  ;;  %v16011_v36 = vld [vmem:[%s18577_s2 + $0x44] ss:$8 sps:$4 sm:$0xff]  }
 0x8cf   : > { %12981 = vmatpush3.bf16.msra.mxu1 %v17737_v17  ;;  %7635 = vmatprep.mubr.bf16.mxu1 %v15954_v32  ;;  %v16009_v32 = vld [vmem:[%s18577_s2 + $0x40] ss:$8 sps:$4 sm:$0xff]  }
 0x8d0   : > { %12982 = vmatprep.subr.bf16.mxu1 %v17767_v16  ;;  %14235 = vmatpush3.bf16.msra.mxu0 %v16049_v46 }
 0x8d3   : > { %12983 = vmatpush3.bf16.msra.mxu1 %v17735_v2 }
 0x8d4   : > { %12984 = vmatprep.subr.bf16.mxu1 %v17781_v5 }
 0x8d6   : > { %7636 = vmatmul.mubr.bf16.gmra.mrb[36].mxu1 %v15952_v33  ;;  %v16014_v33 = vld [vmem:[%s18577_s2 + $0x54] ss:$8 sps:$4 sm:$0xff]  }
 0x8d7   : > { %12985 = vmatpush3.bf16.msra.mxu1 %v17745_v18  ;;  %7643 = vmatprep.mubr.bf16.mxu1 %v15957_v43  ;;  %v16050_v43 = vld [vmem:[%s18584_s9 + $0x40] sm:$0xff]  }
 0x8d8   : > { %12986 = vmatprep.subr.bf16.mxu1 %v17778_v15  ;;  %14268 = vmatprep.subr.bf16.mxu0 %v16050_v43 }
 0x8db   : > { %12987 = vmatpush3.bf16.msra.mxu1 %v17743_v29 }
 0x8dc   : > { %12988 = vmatprep.subr.bf16.mxu1 %v17793_v30 }
 0x8de   : > { %7644 = vmatmul.mubr.bf16.gmra.mrb[40].mxu1 %v15955_v8  ;;  %v16012_v8 = vld [vmem:[%s18577_s2 + $0x50] ss:$8 sps:$4 sm:$0xff]  }
 0x8df   : > { %12989 = vmatpush3.bf16.msra.mxu1 %v17753_v52  ;;  %7651 = vmatprep.mubr.bf16.mxu1 %v15960_v27  ;;  %v16017_v27 = vld [vmem:[%s18577_s2 + $0x64] ss:$8 sps:$4 sm:$0xff]  }
 0x8e0   : > { %12990 = vmatprep.subr.bf16.mxu1 %v17790_v38 }
 0x8e3   : > { %12991 = vmatpush3.bf16.msra.mxu1 %v17751_v61 }
 0x8e4   : > { %12992 = vmatprep.subr.bf16.mxu1 %v17805_v50 }
 0x8e6   : > { %7652 = vmatmul.mubr.bf16.gmra.mrb[44].mxu1 %v15958_v1  ;;  %v16015_v1 = vld [vmem:[%s18577_s2 + $0x60] ss:$8 sps:$4 sm:$0xff]  }
 0x8e7   : > { %12993 = vmatpush3.bf16.msra.mxu1 %v17761_v54  ;;  %7659 = vmatprep.mubr.bf16.mxu1 %v15963_v14  ;;  %v16020_v14 = vld [vmem:[%s18577_s2 + $0x74] ss:$8 sps:$4 sm:$0xff]  }
 0x8e8   : > { %12994 = vmatprep.subr.bf16.mxu1 %v17802_v12 }
 0x8eb   : > { %12995 = vmatpush3.bf16.msra.mxu1 %v17759_v22 }
 0x8ee   : > { %7660 = vmatmul.mubr.bf16.gmra.mrb[48].mxu1 %v15961_v26  ;;  %v16018_v26 = vld [vmem:[%s18577_s2 + $0x70] ss:$8 sps:$4 sm:$0xff]  }
 0x8ef   : > { %7667 = vmatprep.mubr.bf16.mxu1 %v15966_v21  ;;  %v16023_v21 = vld [vmem:[%s18577_s2 + $0x84] ss:$8 sps:$4 sm:$0xff]  }
 0x8f6   : > { %7668 = vmatmul.mubr.bf16.gmra.mrb[52].mxu1 %v15964_v13  ;;  %v16021_v13 = vld [vmem:[%s18577_s2 + $0x80] ss:$8 sps:$4 sm:$0xff]  }
 0x8f7   : > { %7675 = vmatprep.mubr.bf16.mxu1 %v15969_v19  ;;  %v16026_v19 = vld [vmem:[%s18577_s2 + $0x94] ss:$8 sps:$4 sm:$0xff]  }
 0x8fe   : > { %7676 = vmatmul.mubr.bf16.gmra.mrb[56].mxu1 %v15967_v51  ;;  %v16024_v51 = vld [vmem:[%s18577_s2 + $0x90] ss:$8 sps:$4 sm:$0xff]  }
 0x8ff   : > { %7683 = vmatprep.mubr.bf16.mxu1 %v15972_v44  ;;  %v16029_v44 = vld [vmem:[%s18577_s2 + $0xa4] ss:$8 sps:$4 sm:$0xff]  }
 0x906   : > { %7684 = vmatmul.mubr.bf16.gmra.mrb[60].mxu1 %v15970_v31  ;;  %v16027_v31 = vld [vmem:[%s18577_s2 + $0xa0] ss:$8 sps:$4 sm:$0xff]  }
 0x907   : > { %7691 = vmatprep.mubr.bf16.mxu1 %v15975_v3  ;;  %v16032_v3 = vld [vmem:[%s18577_s2 + $0xb4] ss:$8 sps:$4 sm:$0xff]  }
 0x90e   : > { %7692 = vmatmul.mubr.bf16.gmra.mrb[64].mxu1 %v15973_v42  ;;  %v16030_v42 = vld [vmem:[%s18577_s2 + $0xb0] ss:$8 sps:$4 sm:$0xff]  }
 0x90f   : > { %7699 = vmatprep.mubr.bf16.mxu1 %v15978_v23 }
 0x916   : > { %7700 = vmatmul.mubr.bf16.gmra.mrb[68].mxu1 %v15976_v53 }
 0x917   : > { %7707 = vmatprep.mubr.bf16.mxu1 %v15981_v39 }
 0x91e   : > { %7708 = vmatmul.mubr.bf16.gmra.mrb[72].mxu1 %v15979_v7  ;;  %v16051_v7 = vld [vmem:[%s18584_s9 + $0x48] sm:$0xff]  }
 0x91f   : > { %7715 = vmatprep.mubr.bf16.mxu1 %v15984_v6 }
 0x926   : > { %7716 = vmatmul.mubr.bf16.gmra.mrb[76].mxu1 %v15982_v24  ;;  %v16038_v24 = vld [vmem:[%s18577_s2 + $0xd4] ss:$8 sps:$4 sm:$0xff]  }
 0x927   : > { %7723 = vmatprep.mubr.bf16.mxu1 %v15987_v37 }
 0x92e   : > { %7724 = vmatmul.mubr.bf16.gmra.mrb[80].mxu1 %v15985_v41  ;;  %v16052_v41 = vld [vmem:[%s18584_s9 + $0x50] sm:$0xff]  }
 0x92f   : > { %7731 = vmatprep.mubr.bf16.mxu1 %v15990_v49 }
 0x936   : > { %7732 = vmatmul.mubr.bf16.gmra.mrb[84].mxu1 %v15988_v10 }
 0x937   : > { %7739 = vmatprep.mubr.bf16.mxu1 %v15993_v59 }
 0x93e   : > { %7740 = vmatmul.mubr.bf16.gmra.mrb[88].mxu1 %v15991_v28  ;;  %v16053_v28 = vld [vmem:[%s18584_s9 + $0x58] sm:$0xff]  }
 0x93f   : > { %7747 = vmatprep.mubr.bf16.mxu1 %v15996_v0 }
 0x946   : > { %7748 = vmatmul.mubr.bf16.gmra.mrb[92].mxu1 %v15994_v25  ;;  %v16036_v25 = vld [vmem:[%s18577_s2 + $0xd0] ss:$8 sps:$4 sm:$0xff]  }
 0x947   : > { %7996 = vmatprep.mubr.bf16.mxu1 %v15999_v20 }
 0x94e   : > { %7997 = vmatmul.mubr.bf16.vlgmr.msra.gmra.mrb[96].mxu1 %v15997_v60  ;;  %v16041_v60 = vld [vmem:[%s18577_s2 + $0xe4] ss:$8 sps:$4 sm:$0xff]  }
 0x94f   : > { %8004 = vmatprep.mubr.bf16.mxu1 %v16002_v56 }
 0x956   : > { %8005 = vmatmul.mubr.bf16.gmra.mrb[100].mxu1 %v16000_v58 }
 0x957   : > { %8012 = vmatprep.mubr.bf16.mxu1 %v16005_v45  ;;  %v16054_v45 = vld [vmem:[%s18584_s9 + $0x60] sm:$0xff]  }
 0x95e   : > { %8013 = vmatmul.mubr.bf16.gmra.mrb[104].mxu1 %v16003_v35 }
 0x95f   : > { %8020 = vmatprep.mubr.bf16.mxu1 %v16008_v34 }
 0x966   : > { %8021 = vmatmul.mubr.bf16.gmra.mrb[108].mxu1 %v16006_v48 }
 0x967   : > { %8028 = vmatprep.mubr.bf16.mxu1 %v16011_v36  ;;  %v16055_v36 = vld [vmem:[%s18584_s9 + $0x68] sm:$0xff]  }
 0x96e   : > { %8029 = vmatmul.mubr.bf16.gmra.mrb[112].mxu1 %v16009_v32 }
 0x96f   : > { %8036 = vmatprep.mubr.bf16.mxu1 %v16014_v33  ;;  %v16039_v33 = vld [vmem:[%s18577_s2 + $0xe0] ss:$8 sps:$4 sm:$0xff]  }
 0x976   : > { %8037 = vmatmul.mubr.bf16.gmra.mrb[116].mxu1 %v16012_v8 }
 0x977   : > { %8044 = vmatprep.mubr.bf16.mxu1 %v16017_v27 }
 0x97e   : > { %8045 = vmatmul.mubr.bf16.gmra.mrb[120].mxu1 %v16015_v1  ;;  %v16056_v1 = vld [vmem:[%s18584_s9 + $0x70] sm:$0xff]  }
 0x97f   : > { %8052 = vmatprep.mubr.bf16.mxu1 %v16020_v14 }
 0x986   : > { %8053 = vmatmul.mubr.bf16.gmra.mrb[124].mxu1 %v16018_v26 }
 0x987   : > { %8060 = vmatprep.mubr.bf16.mxu1 %v16023_v21 }
 0x98e   : > { %8061 = vmatmul.mubr.bf16.gmra.mrb[128].mxu1 %v16021_v13  ;;  %v16057_v13 = vld [vmem:[%s18584_s9 + $0x78] sm:$0xff]  }
 0x98f   : > { %8068 = vmatprep.mubr.bf16.mxu1 %v16026_v19 }
 0x996   : > { %8069 = vmatmul.mubr.bf16.gmra.mrb[132].mxu1 %v16024_v51 }
 0x997   : > { %8076 = vmatprep.mubr.bf16.mxu1 %v16029_v44 }
 0x99e   : > { %8077 = vmatmul.mubr.bf16.gmra.mrb[136].mxu1 %v16027_v31 }
 0x99f   : > { %8084 = vmatprep.mubr.bf16.mxu1 %v16032_v3  ;;  %v18073_v3 = vld [vmem:[%s18584_s9 + $0x80] sm:$0xff]  }
 0x9a1   : > { %v12884_v11 = vpop.f32.mrb[32].mxu1 }
 0x9a2   : > { %v12885_v23 = vpop.f32.mrb[33].mxu1 }
 0x9a3   : > { %v12886_v40 = vadd.f32 %v12885_v23, %v12884_v11  ;;  %v12887_v53 = vpop.f32.mrb[34].mxu1 }
 0x9a4   : > { %v12888_v39 = vpop.f32.mrb[35].mxu1 }
 0x9a5   : > { %v12889_v4 = vadd.f32 %v12888_v39, %v12887_v53 }
 0x9a6   : > { %8085 = vmatmul.mubr.bf16.gmra.mrb[140].mxu1 %v16030_v42 }
 0x9a7   : > { %8092 = vmatprep.mubr.bf16.mxu1 %v16035_v57  ;;  %v18022_v9 = vpack.c.bf16 %v12889_v4, %v12886_v40 }
 0x9a9   : > { %v12890_v6 = vpop.f32.mrb[36].mxu1  ;;  %14237 = vmatmul.mubr.bf16.vlgmr.msra.gmra.mrb[96].mxu0 %v18022_v9 }
 0x9aa   : > { %v12891_v63 = vpop.f32.mrb[37].mxu1  ;;  %14269 = vmatpush3.bf16.msra.mxu0 %v16050_v43 }
 0x9ab   : > { %v12892_v37 = vadd.f32 %v12891_v63, %v12890_v6  ;;  %v12893_v46 = vpop.f32.mrb[38].mxu1  ;;  %14270 = vmatprep.subr.bf16.mxu0 %v16051_v7 }
 0x9ac   : > { %v12894_v49 = vpop.f32.mrb[39].mxu1 }
 0x9ad   : > { %v12895_v10 = vadd.f32 %v12894_v49, %v12893_v46 }
 0x9ae   : > { %8093 = vmatmul.mubr.bf16.gmra.mrb[144].mxu1 %v16033_v62  ;;  %14271 = vmatpush3.bf16.msra.mxu0 %v16051_v7 }
 0x9af   : > { %8100 = vmatprep.mubr.bf16.mxu1 %v16038_v24  ;;  %v18037_v59 = vpack.c.bf16 %v12895_v10, %v12892_v37  ;;  %14272 = vmatprep.subr.bf16.mxu0 %v16052_v41 }
 0x9b1   : > { %v12896_v0 = vpop.f32.mrb[40].mxu1  ;;  %14240 = vmatprep.mubr.bf16.mxu0 %v18037_v59 }
 0x9b2   : > { %v12897_v20 = vpop.f32.mrb[41].mxu1  ;;  %14273 = vmatpush3.bf16.msra.mxu0 %v16052_v41 }
 0x9b3   : > { %v12898_v56 = vadd.f32 %v12897_v20, %v12896_v0  ;;  %v12899_v58 = vpop.f32.mrb[42].mxu1  ;;  %14274 = vmatprep.subr.bf16.mxu0 %v16053_v28 }
 0x9b4   : > { %v12900_v35 = vpop.f32.mrb[43].mxu1 }
 0x9b5   : > { %v12901_v34 = vadd.f32 %v12900_v35, %v12899_v58 }
 0x9b6   : > { %8101 = vmatmul.mubr.bf16.gmra.mrb[148].mxu1 %v16036_v25  ;;  %14275 = vmatpush3.bf16.msra.mxu0 %v16053_v28 }
 0x9b7   : > { %8108 = vmatprep.mubr.bf16.mxu1 %v16041_v60  ;;  %v18052_v48 = vpack.c.bf16 %v12901_v34, %v12898_v56  ;;  %14276 = vmatprep.subr.bf16.mxu0 %v16054_v45 }
 0x9b9   : > { %v12902_v32 = vpop.f32.mrb[44].mxu1  ;;  %14241 = vmatmul.mubr.bf16.gmra.mrb[100].mxu0 %v18052_v48 }
 0x9ba   : > { %v12903_v43 = vpop.f32.mrb[45].mxu1  ;;  %14277 = vmatpush3.bf16.msra.mxu0 %v16054_v45 }
 0x9bb   : > { %v12904_v8 = vadd.f32 %v12903_v43, %v12902_v32  ;;  %v12905_v27 = vpop.f32.mrb[46].mxu1  ;;  %14278 = vmatprep.subr.bf16.mxu0 %v16055_v36 }
 0x9bc   : > { %v12906_v14 = vpop.f32.mrb[47].mxu1 }
 0x9bd   : > { %v12907_v26 = vadd.f32 %v12906_v14, %v12905_v27 }
 0x9be   : > { %8109 = vmatmul.mubr.bf16.gmra.mrb[152].mxu1 %v16039_v33  ;;  %14279 = vmatpush3.bf16.msra.mxu0 %v16055_v36 }
 0x9bf   : > { %v18064_v21 = vpack.c.bf16 %v12907_v26, %v12904_v8  ;;  %14280 = vmatprep.subr.bf16.mxu0 %v16056_v1 }
 0x9c1   : > { %v12908_v19 = vpop.f32.mrb[48].mxu1  ;;  %14244 = vmatprep.mubr.bf16.mxu0 %v18064_v21 }
 0x9c2   : > { %v12909_v51 = vpop.f32.mrb[49].mxu1  ;;  %14281 = vmatpush3.bf16.msra.mxu0 %v16056_v1 }
 0x9c3   : > { %v12910_v44 = vadd.f32 %v12909_v51, %v12908_v19  ;;  %v12911_v31 = vpop.f32.mrb[50].mxu1  ;;  %14282 = vmatprep.subr.bf16.mxu0 %v16057_v13 }
 0x9c4   : > { %v12912_v11 = vpop.f32.mrb[51].mxu1 }
 0x9c5   : > { %v12913_v42 = vadd.f32 %v12912_v11, %v12911_v31 }
 0x9c6   : > { %14283 = vmatpush3.bf16.msra.mxu0 %v16057_v13 }
 0x9c7   : > { %v18075_v23 = vpack.c.bf16 %v12913_v42, %v12910_v44  ;;  %14316 = vmatprep.subr.bf16.mxu0 %v18073_v3 }
 0x9c9   : > { %v12914_v57 = vpop.f32.mrb[52].mxu1  ;;  %14245 = vmatmul.mubr.bf16.gmra.mrb[104].mxu0 %v18075_v23 }
 0x9ca   : > { %v12915_v40 = vpop.f32.mrb[53].mxu1 }
 0x9cb   : > { %v12916_v53 = vadd.f32 %v12915_v40, %v12914_v57  ;;  %v12917_v39 = vpop.f32.mrb[54].mxu1  ;;  %v16068_v40 = vld [vmem:[%s18577_s2 + $0xf4] ss:$8 sps:$4 sm:$0xff]  }
 0x9cc   : > { %v12918_v4 = vpop.f32.mrb[55].mxu1  ;;  %8116 = vmatprep.mubr.bf16.mxu1 %v16068_v40 }
 0x9cd   : > { %v12919_v7 = vadd.f32 %v12918_v4, %v12917_v39  ;;  %v16066_v39 = vld [vmem:[%s18577_s2 + $0xf0] ss:$8 sps:$4 sm:$0xff]  }
 0x9ce   : > { %8117 = vmatmul.mubr.bf16.gmra.mrb[156].mxu1 %v16066_v39 }
 0x9cf   : > { %v18079_v6 = vpack.c.bf16 %v12919_v7, %v12916_v53 }
 0x9d1   : > { %v12920_v62 = vpop.f32.mrb[56].mxu1  ;;  %14248 = vmatprep.mubr.bf16.mxu0 %v18079_v6 }
 0x9d2   : > { %v12921_v63 = vpop.f32.mrb[57].mxu1 }
 0x9d3   : > { %v12922_v24 = vadd.f32 %v12921_v63, %v12920_v62  ;;  %v12923_v37 = vpop.f32.mrb[58].mxu1 }
 0x9d4   : > { %v12924_v46 = vpop.f32.mrb[59].mxu1 }
 0x9d5   : > { %v12925_v41 = vadd.f32 %v12924_v46, %v12923_v37 }
 0x9d7   : > { %v18082_v49 = vpack.c.bf16 %v12925_v41, %v12922_v24 }
 0x9d9   : > { %v12926_v10 = vpop.f32.mrb[60].mxu1  ;;  %14249 = vmatmul.mubr.bf16.gmra.mrb[108].mxu0 %v18082_v49 }
 0x9da   : > { %v12927_v28 = vpop.f32.mrb[61].mxu1 }
 0x9db   : > { %v12928_v0 = vadd.f32 %v12927_v28, %v12926_v10  ;;  %v12929_v25 = vpop.f32.mrb[62].mxu1 }
 0x9dc   : > { %v12930_v20 = vpop.f32.mrb[63].mxu1 }
 0x9dd   : > { %v12931_v60 = vadd.f32 %v12930_v20, %v12929_v25 }
 0x9df   : > { %v18085_v56 = vpack.c.bf16 %v12931_v60, %v12928_v0 }
 0x9e1   : > { %v12932_v58 = vpop.f32.mrb[64].mxu1  ;;  %14252 = vmatprep.mubr.bf16.mxu0 %v18085_v56 }
 0x9e2   : > { %v12933_v45 = vpop.f32.mrb[65].mxu1 }
 0x9e3   : > { %v12934_v35 = vadd.f32 %v12933_v45, %v12932_v58  ;;  %v12935_v34 = vpop.f32.mrb[66].mxu1 }
 0x9e4   : > { %v12936_v36 = vpop.f32.mrb[67].mxu1 }
 0x9e5   : > { %v12937_v32 = vadd.f32 %v12936_v36, %v12935_v34 }
 0x9e7   : > { %v18088_v33 = vpack.c.bf16 %v12937_v32, %v12934_v35 }
 0x9e9   : > { %v12938_v43 = vpop.f32.mrb[68].mxu1  ;;  %14253 = vmatmul.mubr.bf16.gmra.mrb[112].mxu0 %v18088_v33 }
 0x9ea   : > { %v12939_v8 = vpop.f32.mrb[69].mxu1 }
 0x9eb   : > { %v12940_v27 = vadd.f32 %v12939_v8, %v12938_v43  ;;  %v12941_v1 = vpop.f32.mrb[70].mxu1 }
 0x9ec   : > { %v12942_v14 = vpop.f32.mrb[71].mxu1 }
 0x9ed   : > { %v12943_v26 = vadd.f32 %v12942_v14, %v12941_v1 }
 0x9ef   : > { %v18091_v13 = vpack.c.bf16 %v12943_v26, %v12940_v27 }
 0x9f1   : > { %v12944_v19 = vpop.f32.mrb[72].mxu1  ;;  %14256 = vmatprep.mubr.bf16.mxu0 %v18091_v13 }
 0x9f2   : > { %v12945_v51 = vpop.f32.mrb[73].mxu1 }
 0x9f3   : > { %v12946_v44 = vadd.f32 %v12945_v51, %v12944_v19  ;;  %v12947_v31 = vpop.f32.mrb[74].mxu1 }
 0x9f4   : > { %v12948_v11 = vpop.f32.mrb[75].mxu1 }
 0x9f5   : > { %v12949_v42 = vadd.f32 %v12948_v11, %v12947_v31 }
 0x9f7   : > { %v18094_v57 = vpack.c.bf16 %v12949_v42, %v12946_v44 }
 0x9f9   : > { %v12950_v53 = vpop.f32.mrb[76].mxu1  ;;  %14257 = vmatmul.mubr.bf16.gmra.mrb[116].mxu0 %v18094_v57 }
 0x9fa   : > { %v12951_v4 = vpop.f32.mrb[77].mxu1 }
 0x9fb   : > { %v12952_v7 = vadd.f32 %v12951_v4, %v12950_v53  ;;  %v12953_v62 = vpop.f32.mrb[78].mxu1  ;;  %v16059_v53 = vld [vmem:[%s18584_s9 + $0x88] sm:$0xff]  }
 0x9fc   : > { %v12954_v63 = vpop.f32.mrb[79].mxu1 }
 0x9fd   : > { %v12955_v24 = vadd.f32 %v12954_v63, %v12953_v62  ;;  %v16060_v62 = vld [vmem:[%s18584_s9 + $0x90] sm:$0xff]  }
 0x9ff   : > { %v18103_v37 = vpack.c.bf16 %v12955_v24, %v12952_v7 }
 0xa01   : > { %v12956_v46 = vpop.f32.mrb[80].mxu1  ;;  %14260 = vmatprep.mubr.bf16.mxu0 %v18103_v37 }
 0xa02   : > { %v12957_v41 = vpop.f32.mrb[81].mxu1 }
 0xa03   : > { %v12958_v10 = vadd.f32 %v12957_v41, %v12956_v46  ;;  %v12959_v28 = vpop.f32.mrb[82].mxu1 }
 0xa04   : > { %v12960_v0 = vpop.f32.mrb[83].mxu1 }
 0xa05   : > { %v12961_v25 = vadd.f32 %v12960_v0, %v12959_v28 }
 0xa07   : > { %v18106_v20 = vpack.c.bf16 %v12961_v25, %v12958_v10  ;;  %v16061_v10 = vld [vmem:[%s18584_s9 + $0x98] sm:$0xff]   ;;  %v16062_v25 = vld [vmem:[%s18584_s9 + $0xa0] sm:$0xff]  }
 0xa09   : > { %v12962_v60 = vpop.f32.mrb[84].mxu1  ;;  %14261 = vmatmul.mubr.bf16.gmra.mrb[120].mxu0 %v18106_v20 }
 0xa0a   : > { %v12963_v58 = vpop.f32.mrb[85].mxu1 }
 0xa0b   : > { %v12964_v45 = vadd.f32 %v12963_v58, %v12962_v60  ;;  %v12965_v35 = vpop.f32.mrb[86].mxu1 }
 0xa0c   : > { %v12966_v34 = vpop.f32.mrb[87].mxu1 }
 0xa0d   : > { %v12967_v36 = vadd.f32 %v12966_v34, %v12965_v35  ;;  %v16063_v34 = vld [vmem:[%s18584_s9 + $0xa8] sm:$0xff]  }
 0xa0f   : > { %v18109_v32 = vpack.c.bf16 %v12967_v36, %v12964_v45 }
 0xa11   : > { %v12968_v43 = vpop.f32.mrb[88].mxu1  ;;  %14264 = vmatprep.mubr.bf16.mxu0 %v18109_v32 }
 0xa12   : > { %v12969_v8 = vpop.f32.mrb[89].mxu1 }
 0xa13   : > { %v12970_v27 = vadd.f32 %v12969_v8, %v12968_v43  ;;  %v12971_v1 = vpop.f32.mrb[90].mxu1 }
 0xa14   : > { %v12972_v14 = vpop.f32.mrb[91].mxu1 }
 0xa15   : > { %v12973_v26 = vadd.f32 %v12972_v14, %v12971_v1 }
 0xa17   : > { %v18112_v19 = vpack.c.bf16 %v12973_v26, %v12970_v27  ;;  %v16064_v27 = vld [vmem:[%s18584_s9 + $0xb0] sm:$0xff]  }
 0xa19   : > { %14265 = vmatmul.mubr.bf16.gmra.mrb[124].mxu0 %v18112_v19  ;;  %v12974_v51 = vpop.f32.mrb[92].mxu1 }
 0xa1a   : > { %14284 = vmatprep.mubr.bf16.mxu0 %v18625_v47  ;;  %v12975_v44 = vpop.f32.mrb[93].mxu1 }
 0xa1b   : > { %v12976_v31 = vadd.f32 %v12975_v44, %v12974_v51  ;;  %v12977_v11 = vpop.f32.mrb[94].mxu1  ;;  %v16065_v44 = vld [vmem:[%s18584_s9 + $0xb8] sm:$0xff]  }
 0xa1c   : > { %v12978_v42 = vpop.f32.mrb[95].mxu1 }
 0xa1d   : > { %v12979_v40 = vadd.f32 %v12978_v42, %v12977_v11 }
 0xa1f   : > { %v18119_v39 = vpack.c.bf16 %v12979_v40, %v12976_v31 }
 0xa21   : > { %14285 = vmatmul.mubr.bf16.vlgmr.msra.gmra.mrb[96].mxu0 %v17737_v17  ;;  %v12996_v4 = vpop.f32.mrb[96].mxu1 }
 0xa22   : > { %14288 = vmatprep.mubr.bf16.mxu0 %v17735_v2  ;;  %14317 = vmatpush3.bf16.msra.mxu0 %v18073_v3  ;;  %v12997_v7 = vpop.f32.mrb[97].mxu1 }
 0xa23   : > { %14318 = vmatprep.subr.bf16.mxu0 %v16059_v53  ;;  %v12998_v63 = vadd.f32 %v12997_v7, %v12996_v4  ;;  %v12999_v24 = vpop.f32.mrb[98].mxu1  ;;  %v16069_v4 = vld [vmem:[%s18584_s9 + $0xc0] sm:$0xff]  }
 0xa24   : > { %v13000_v46 = vpop.f32.mrb[99].mxu1 }
 0xa25   : > { %v13001_v41 = vadd.f32 %v13000_v46, %v12999_v24 }
 0xa26   : > { %14319 = vmatpush3.bf16.msra.mxu0 %v16059_v53 }
 0xa27   : > { %14320 = vmatprep.subr.bf16.mxu0 %v16060_v62  ;;  %v18130_v28 = vpack.c.bf16 %v13001_v41, %v12998_v63 }
 0xa29   : > { %14289 = vmatmul.mubr.bf16.gmra.mrb[100].mxu0 %v17745_v18  ;;  %v13002_v3 = vpop.f32.mrb[100].mxu1 }
 0xa2a   : > { %14292 = vmatprep.mubr.bf16.mxu0 %v17743_v29  ;;  %14321 = vmatpush3.bf16.msra.mxu0 %v16060_v62  ;;  %v13003_v0 = vpop.f32.mrb[101].mxu1 }
 0xa2b   : > { %14322 = vmatprep.subr.bf16.mxu0 %v16061_v10  ;;  %v13004_v60 = vadd.f32 %v13003_v0, %v13002_v3  ;;  %v13005_v58 = vpop.f32.mrb[102].mxu1 }
 0xa2c   : > { %v13006_v45 = vpop.f32.mrb[103].mxu1 }
 0xa2d   : > { %v13007_v35 = vadd.f32 %v13006_v45, %v13005_v58 }
 0xa2e   : > { %14323 = vmatpush3.bf16.msra.mxu0 %v16061_v10 }
 0xa2f   : > { %14324 = vmatprep.subr.bf16.mxu0 %v16062_v25  ;;  %v18140_v36 = vpack.c.bf16 %v13007_v35, %v13004_v60 }
 0xa31   : > { %14293 = vmatmul.mubr.bf16.gmra.mrb[104].mxu0 %v17753_v52  ;;  %v13008_v43 = vpop.f32.mrb[104].mxu1 }
 0xa32   : > { %14296 = vmatprep.mubr.bf16.mxu0 %v17751_v61  ;;  %14325 = vmatpush3.bf16.msra.mxu0 %v16062_v25  ;;  %v13009_v8 = vpop.f32.mrb[105].mxu1 }
 0xa33   : > { %14326 = vmatprep.subr.bf16.mxu0 %v16063_v34  ;;  %v13010_v1 = vadd.f32 %v13009_v8, %v13008_v43  ;;  %v13011_v14 = vpop.f32.mrb[106].mxu1 }
 0xa34   : > { %v13012_v26 = vpop.f32.mrb[107].mxu1 }
 0xa35   : > { %v13013_v51 = vadd.f32 %v13012_v26, %v13011_v14 }
 0xa36   : > { %14327 = vmatpush3.bf16.msra.mxu0 %v16063_v34 }
 0xa37   : > { %14328 = vmatprep.subr.bf16.mxu0 %v16064_v27  ;;  %v18150_v31 = vpack.c.bf16 %v13013_v51, %v13010_v1 }
 0xa39   : > { %14297 = vmatmul.mubr.bf16.gmra.mrb[108].mxu0 %v17761_v54  ;;  %v13014_v11 = vpop.f32.mrb[108].mxu1 }
 0xa3a   : > { %14300 = vmatprep.mubr.bf16.mxu0 %v17759_v22  ;;  %14329 = vmatpush3.bf16.msra.mxu0 %v16064_v27  ;;  %v13015_v42 = vpop.f32.mrb[109].mxu1 }
 0xa3b   : > { %14330 = vmatprep.subr.bf16.mxu0 %v16065_v44  ;;  %v13016_v40 = vadd.f32 %v13015_v42, %v13014_v11  ;;  %v13017_v53 = vpop.f32.mrb[110].mxu1 }
 0xa3c   : > { %v13018_v7 = vpop.f32.mrb[111].mxu1 }
 0xa3d   : > { %v13019_v62 = vadd.f32 %v13018_v7, %v13017_v53 }
 0xa3e   : > { %14331 = vmatpush3.bf16.msra.mxu0 %v16065_v44 }
 0xa3f   : > { %v18157_v63 = vpack.c.bf16 %v13019_v62, %v13016_v40  ;;  %14364 = vmatprep.subr.bf16.mxu0 %v16069_v4 }
 0xa41   : > { %14301 = vmatmul.mubr.bf16.gmra.mrb[112].mxu0 %v17769_v55  ;;  %v13020_v24 = vpop.f32.mrb[112].mxu1 }
 0xa42   : > { %14304 = vmatprep.mubr.bf16.mxu0 %v17767_v16  ;;  %v13021_v46 = vpop.f32.mrb[113].mxu1 }
 0xa43   : > { %v13022_v41 = vadd.f32 %v13021_v46, %v13020_v24  ;;  %v13023_v10 = vpop.f32.mrb[114].mxu1 }
 0xa44   : > { %v13024_v3 = vpop.f32.mrb[115].mxu1 }
 0xa45   : > { %v13025_v0 = vadd.f32 %v13024_v3, %v13023_v10 }
 0xa47   : > { %v18161_v25 = vpack.c.bf16 %v13025_v0, %v13022_v41  ;;  %v16070_v41 = vld [vmem:[%s18584_s9 + $0xc8] sm:$0xff]  }
 0xa49   : > { %14305 = vmatmul.mubr.bf16.gmra.mrb[116].mxu0 %v17781_v5  ;;  %v13026_v60 = vpop.f32.mrb[116].mxu1 }
 0xa4a   : > { %14308 = vmatprep.mubr.bf16.mxu0 %v17778_v15  ;;  %v13027_v58 = vpop.f32.mrb[117].mxu1 }
 0xa4b   : > { %v13028_v45 = vadd.f32 %v13027_v58, %v13026_v60  ;;  %v13029_v35 = vpop.f32.mrb[118].mxu1  ;;  %v16071_v58 = vld [vmem:[%s18584_s9 + $0xd0] sm:$0xff]  }
 0xa4c   : > { %v13030_v34 = vpop.f32.mrb[119].mxu1 }
 0xa4d   : > { %v13031_v43 = vadd.f32 %v13030_v34, %v13029_v35 }
 0xa4f   : > { %v18165_v8 = vpack.c.bf16 %v13031_v43, %v13028_v45  ;;  %v16072_v43 = vld [vmem:[%s18584_s9 + $0xd8] sm:$0xff]  }
 0xa51   : > { %14309 = vmatmul.mubr.bf16.gmra.mrb[120].mxu0 %v17793_v30  ;;  %v13032_v27 = vpop.f32.mrb[120].mxu1 }
 0xa52   : > { %14312 = vmatprep.mubr.bf16.mxu0 %v17790_v38  ;;  %v13033_v1 = vpop.f32.mrb[121].mxu1 }
 0xa53   : > { %v13034_v14 = vadd.f32 %v13033_v1, %v13032_v27  ;;  %v13035_v26 = vpop.f32.mrb[122].mxu1 }
 0xa54   : > { %v13036_v51 = vpop.f32.mrb[123].mxu1 }
 0xa55   : > { %v13037_v44 = vadd.f32 %v13036_v51, %v13035_v26  ;;  %v16073_v26 = vld [vmem:[%s18584_s9 + $0xe0] sm:$0xff]  }
 0xa57   : > { %v18169_v11 = vpack.c.bf16 %v13037_v44, %v13034_v14 }
 0xa59   : > { %14313 = vmatmul.mubr.bf16.gmra.mrb[124].mxu0 %v17805_v50  ;;  %v13038_v42 = vpop.f32.mrb[124].mxu1 }
 0xa5a   : > { %14332 = vmatprep.mubr.bf16.mxu0 %v18625_v47  ;;  %v13039_v40 = vpop.f32.mrb[125].mxu1 }
 0xa5b   : > { %v13040_v53 = vadd.f32 %v13039_v40, %v13038_v42  ;;  %v13041_v7 = vpop.f32.mrb[126].mxu1  ;;  %v16074_v40 = vld [vmem:[%s18584_s9 + $0xe8] sm:$0xff]  }
 0xa5c   : > { %v13042_v62 = vpop.f32.mrb[127].mxu1 }
 0xa5d   : > { %v13043_v24 = vadd.f32 %v13042_v62, %v13041_v7 }
 0xa5f   : > { %v18173_v46 = vpack.c.bf16 %v13043_v24, %v13040_v53 }
 0xa61   : > { %14333 = vmatmul.mubr.bf16.vlgmr.msra.gmra.mrb[96].mxu0 %v18130_v28  ;;  %v13044_v10 = vpop.f32.mrb[128].mxu1 }
 0xa62   : > { %14336 = vmatprep.mubr.bf16.mxu0 %v18140_v36  ;;  %v13045_v3 = vpop.f32.mrb[129].mxu1  ;;  %14365 = vmatpush3.bf16.msra.mxu0 %v16069_v4 }
 0xa63   : > { %v13046_v0 = vadd.f32 %v13045_v3, %v13044_v10  ;;  %v13047_v60 = vpop.f32.mrb[130].mxu1  ;;  %14366 = vmatprep.subr.bf16.mxu0 %v16070_v41 }
 0xa64   : > { %v13048_v45 = vpop.f32.mrb[131].mxu1 }
 0xa65   : > { %v13049_v35 = vadd.f32 %v13048_v45, %v13047_v60  ;;  %v16076_v60 = vld [vmem:[%s18584_s9 + $0xf8] sm:$0xff]  }
 0xa66   : > { %14367 = vmatpush3.bf16.msra.mxu0 %v16070_v41  ;;  %v16075_v41 = vld [vmem:[%s18584_s9 + $0xf0] sm:$0xff]  }
 0xa67   : > { %v18183_v34 = vpack.c.bf16 %v13049_v35, %v13046_v0  ;;  %14368 = vmatprep.subr.bf16.mxu0 %v16071_v58 }
 0xa69   : > { %14337 = vmatmul.mubr.bf16.gmra.mrb[100].mxu0 %v18150_v31  ;;  %v13050_v4 = vpop.f32.mrb[132].mxu1 }
 0xa6a   : > { %14340 = vmatprep.mubr.bf16.mxu0 %v18157_v63  ;;  %v13051_v27 = vpop.f32.mrb[133].mxu1  ;;  %14369 = vmatpush3.bf16.msra.mxu0 %v16071_v58 }
 0xa6b   : > { %v13052_v1 = vadd.f32 %v13051_v27, %v13050_v4  ;;  %v13053_v14 = vpop.f32.mrb[134].mxu1  ;;  %14370 = vmatprep.subr.bf16.mxu0 %v16072_v43  ;;  %v16077_v4 = vld [vmem:[%s18584_s9 + $0x100] sm:$0xff]  }
 0xa6c   : > { %v13054_v51 = vpop.f32.mrb[135].mxu1 }
 0xa6d   : > { %v13055_v44 = vadd.f32 %v13054_v51, %v13053_v14 }
 0xa6e   : > { %14371 = vmatpush3.bf16.msra.mxu0 %v16072_v43 }
 0xa6f   : > { %v18193_v42 = vpack.c.bf16 %v13055_v44, %v13052_v1  ;;  %14372 = vmatprep.subr.bf16.mxu0 %v16073_v26 }
 0xa71   : > { %14341 = vmatmul.mubr.bf16.gmra.mrb[104].mxu0 %v18161_v25  ;;  %v13056_v53 = vpop.f32.mrb[136].mxu1 }
 0xa72   : > { %14344 = vmatprep.mubr.bf16.mxu0 %v18165_v8  ;;  %v13057_v7 = vpop.f32.mrb[137].mxu1  ;;  %14373 = vmatpush3.bf16.msra.mxu0 %v16073_v26 }
 0xa73   : > { %v13058_v62 = vadd.f32 %v13057_v7, %v13056_v53  ;;  %v13059_v24 = vpop.f32.mrb[138].mxu1  ;;  %14374 = vmatprep.subr.bf16.mxu0 %v16074_v40 }
 0xa74   : > { %v13060_v10 = vpop.f32.mrb[139].mxu1 }
 0xa75   : > { %v13061_v3 = vadd.f32 %v13060_v10, %v13059_v24 }
 0xa76   : > { %14375 = vmatpush3.bf16.msra.mxu0 %v16074_v40 }
 0xa77   : > { %v18203_v0 = vpack.c.bf16 %v13061_v3, %v13058_v62  ;;  %14376 = vmatprep.subr.bf16.mxu0 %v16075_v41 }
 0xa79   : > { %14345 = vmatmul.mubr.bf16.gmra.mrb[108].mxu0 %v18169_v11  ;;  %v13062_v58 = vpop.f32.mrb[140].mxu1 }
 0xa7a   : > { %14348 = vmatprep.mubr.bf16.mxu0 %v18173_v46  ;;  %v13063_v45 = vpop.f32.mrb[141].mxu1  ;;  %14377 = vmatpush3.bf16.msra.mxu0 %v16075_v41 }
 0xa7b   : > { %v13064_v35 = vadd.f32 %v13063_v45, %v13062_v58  ;;  %v13065_v43 = vpop.f32.mrb[142].mxu1  ;;  %14378 = vmatprep.subr.bf16.mxu0 %v16076_v60 }
 0xa7c   : > { %v13066_v27 = vpop.f32.mrb[143].mxu1 }
 0xa7d   : > { %v13067_v1 = vadd.f32 %v13066_v27, %v13065_v43 }
 0xa7e   : > { %14379 = vmatpush3.bf16.msra.mxu0 %v16076_v60 }
 0xa7f   : > { %v18213_v14 = vpack.c.bf16 %v13067_v1, %v13064_v35  ;;  %14412 = vmatprep.subr.bf16.mxu0 %v16077_v4 }
 0xa81   : > { %14349 = vmatmul.mubr.bf16.gmra.mrb[112].mxu0 %v18183_v34  ;;  %v13068_v26 = vpop.f32.mrb[144].mxu1 }
 0xa82   : > { %14352 = vmatprep.mubr.bf16.mxu0 %v18193_v42  ;;  %v13069_v51 = vpop.f32.mrb[145].mxu1 }
 0xa83   : > { %v13070_v44 = vadd.f32 %v13069_v51, %v13068_v26  ;;  %v13071_v40 = vpop.f32.mrb[146].mxu1 }
 0xa84   : > { %v13072_v53 = vpop.f32.mrb[147].mxu1 }
 0xa85   : > { %v13073_v7 = vadd.f32 %v13072_v53, %v13071_v40  ;;  %v16078_v40 = vld [vmem:[%s18584_s9 + $0x108] sm:$0xff]   ;;  %v16079_v53 = vld [vmem:[%s18584_s9 + $0x110] sm:$0xff]  }
 0xa87   : > { %v18217_v62 = vpack.c.bf16 %v13073_v7, %v13070_v44  ;;  %v16082_v7 = vld [vmem:[%s18584_s9 + $0x128] sm:$0xff]  }
 0xa89   : > { %14353 = vmatmul.mubr.bf16.gmra.mrb[116].mxu0 %v18203_v0  ;;  %v13074_v24 = vpop.f32.mrb[148].mxu1 }
 0xa8a   : > { %v13075_v41 = vpop.f32.mrb[149].mxu1  ;;  %14356 = vmatprep.mubr.bf16.mxu0 %v18213_v14 }
 0xa8b   : > { %v13076_v10 = vadd.f32 %v13075_v41, %v13074_v24  ;;  %v13077_v3 = vpop.f32.mrb[150].mxu1  ;;  %v16083_v24 = vld [vmem:[%s18584_s9 + $0x130] sm:$0xff]   ;;  %v16084_v41 = vld [vmem:[%s18584_s9 + $0x138] sm:$0xff]  }
 0xa8c   : > { %v13078_v60 = vpop.f32.mrb[151].mxu1 }
 0xa8d   : > { %v13079_v58 = vadd.f32 %v13078_v60, %v13077_v3 }
 0xa8f   : > { %v18221_v45 = vpack.c.bf16 %v13079_v58, %v13076_v10  ;;  %v16085_v10 = vld [vmem:[%s18584_s9 + $0x140] sm:$0xff]  }
 0xa91   : > { %v13080_v35 = vpop.f32.mrb[152].mxu1  ;;  %14357 = vmatmul.mubr.bf16.gmra.mrb[120].mxu0 %v18217_v62 }
 0xa92   : > { %v13081_v43 = vpop.f32.mrb[153].mxu1  ;;  %14360 = vmatprep.mubr.bf16.mxu0 %v18221_v45 }
 0xa93   : > { %v13082_v27 = vadd.f32 %v13081_v43, %v13080_v35  ;;  %v13083_v1 = vpop.f32.mrb[154].mxu1 }
 0xa94   : > { %v13084_v26 = vpop.f32.mrb[155].mxu1 }
 0xa95   : > { %v13085_v51 = vadd.f32 %v13084_v26, %v13083_v1  ;;  %v16086_v26 = vld [vmem:[%s18584_s9 + $0x148] sm:$0xff]  }
 0xa97   : > { %v18225_v44 = vpack.c.bf16 %v13085_v51, %v13082_v27  ;;  %v16087_v51 = vld [vmem:[%s18584_s9 + $0x150] sm:$0xff]  }
 0xa99   : > { %14361 = vmatmul.mubr.bf16.gmra.mrb[124].mxu0 %v18225_v44 }
 0xa9a   : > { %14380 = vmatprep.mubr.bf16.mxu0 %v18022_v9  ;;  %v16080_v9 = vld [vmem:[%s18584_s9 + $0x118] sm:$0xff]  }
 0xaa1   : > { %14381 = vmatmul.mubr.bf16.vlgmr.msra.gmra.mrb[96].mxu0 %v18037_v59  ;;  %v13086_v3 = vpop.f32.mrb[156].mxu1 }
 0xaa2   : > { %14384 = vmatprep.mubr.bf16.mxu0 %v18052_v48  ;;  %14413 = vmatpush3.bf16.msra.mxu0 %v16077_v4  ;;  %v16081_v4 = vld [vmem:[%s18584_s9 + $0x120] sm:$0xff]   ;;  %v13087_v60 = vpop.f32.mrb[157].mxu1 }
 0xaa3   : > { %14414 = vmatprep.subr.bf16.mxu0 %v16078_v40  ;;  %v13089_v58 = vpop.f32.mrb[158].mxu1  ;;  %v13088_v35 = vadd.f32 %v13087_v60, %v13086_v3  ;;  %v16098_v3 = vld [vmem:[%s18584_s9 + $0x1a8] sm:$0xff]   ;;  %v16099_v60 = vld [vmem:[%s18584_s9 + $0x1b0] sm:$0xff]  }
 0xaa4   : > { %v13090_v43 = vpop.f32.mrb[159].mxu1 }
 0xaa5   : > { %v13091_v27 = vadd.f32 %v13090_v43, %v13089_v58  ;;  %v16100_v58 = vld [vmem:[%s18584_s9 + $0x1b8] sm:$0xff]   ;;  %v16102_v43 = vld [vmem:[%s18584_s9 + $0x1c8] sm:$0xff]  }
 0xaa6   : > { %14415 = vmatpush3.bf16.msra.mxu0 %v16078_v40  ;;  %v16089_v40 = vld [vmem:[%s18584_s9 + $0x160] sm:$0xff]  }
 0xaa7   : > { %14416 = vmatprep.subr.bf16.mxu0 %v16079_v53  ;;  %v18267_v1 = vpack.c.bf16 %v13091_v27, %v13088_v35  ;;  %v16101_v35 = vld [vmem:[%s18584_s9 + $0x1c0] sm:$0xff]   ;;  %v16103_v27 = vld [vmem:[%s18584_s9 + $0x1d0] sm:$0xff]  }
 0xaa9   : > { %14385 = vmatmul.mubr.bf16.gmra.mrb[100].mxu0 %v18064_v21 }
 0xaaa   : > { %14388 = vmatprep.mubr.bf16.mxu0 %v18075_v23  ;;  %14417 = vmatpush3.bf16.msra.mxu0 %v16079_v53  ;;  %v16090_v53 = vld [vmem:[%s18584_s9 + $0x168] sm:$0xff]  }
 0xaab   : > { %14418 = vmatprep.subr.bf16.mxu0 %v16080_v9 }
 0xaae   : > { %14419 = vmatpush3.bf16.msra.mxu0 %v16080_v9  ;;  %v16091_v9 = vld [vmem:[%s18584_s9 + $0x170] sm:$0xff]  }
 0xaaf   : > { %14420 = vmatprep.subr.bf16.mxu0 %v16081_v4 }
 0xab1   : > { %14389 = vmatmul.mubr.bf16.gmra.mrb[104].mxu0 %v18079_v6 }
 0xab2   : > { %14392 = vmatprep.mubr.bf16.mxu0 %v18082_v49  ;;  %14421 = vmatpush3.bf16.msra.mxu0 %v16081_v4  ;;  %v16092_v4 = vld [vmem:[%s18584_s9 + $0x178] sm:$0xff]  }
 0xab3   : > { %14422 = vmatprep.subr.bf16.mxu0 %v16082_v7 }
 0xab6   : > { %14423 = vmatpush3.bf16.msra.mxu0 %v16082_v7  ;;  %v16093_v7 = vld [vmem:[%s18584_s9 + $0x180] sm:$0xff]  }
 0xab7   : > { %14424 = vmatprep.subr.bf16.mxu0 %v16083_v24 }
 0xab9   : > { %14393 = vmatmul.mubr.bf16.gmra.mrb[108].mxu0 %v18085_v56 }
 0xaba   : > { %14396 = vmatprep.mubr.bf16.mxu0 %v18088_v33  ;;  %14425 = vmatpush3.bf16.msra.mxu0 %v16083_v24  ;;  %v16094_v24 = vld [vmem:[%s18584_s9 + $0x188] sm:$0xff]  }
 0xabb   : > { %14426 = vmatprep.subr.bf16.mxu0 %v16084_v41 }
 0xabe   : > { %14427 = vmatpush3.bf16.msra.mxu0 %v16084_v41  ;;  %v16095_v41 = vld [vmem:[%s18584_s9 + $0x190] sm:$0xff]  }
 0xabf   : > { %14460 = vmatprep.subr.bf16.mxu0 %v16085_v10 }
 0xac1   : > { %14397 = vmatmul.mubr.bf16.gmra.mrb[112].mxu0 %v18091_v13 }
 0xac2   : > { %14400 = vmatprep.mubr.bf16.mxu0 %v18094_v57 }
 0xac9   : > { %14401 = vmatmul.mubr.bf16.gmra.mrb[116].mxu0 %v18103_v37 }
 0xaca   : > { %14404 = vmatprep.mubr.bf16.mxu0 %v18106_v20 }
 0xad1   : > { %14405 = vmatmul.mubr.bf16.gmra.mrb[120].mxu0 %v18109_v32 }
 0xad2   : > { %14408 = vmatprep.mubr.bf16.mxu0 %v18112_v19 }
 0xad9   : > { %14409 = vmatmul.mubr.bf16.gmra.mrb[124].mxu0 %v18119_v39 }
 0xada   : > { %14428 = vmatprep.mubr.bf16.mxu0 %v17737_v17  ;;  %v16088_v17 = vld [vmem:[%s18584_s9 + $0x158] sm:$0xff]  }
 0xae1   : > { %14429 = vmatmul.mubr.bf16.vlgmr.msra.gmra.mrb[96].mxu0 %v17735_v2 }
 0xae2   : > { %14432 = vmatprep.mubr.bf16.mxu0 %v17745_v18  ;;  %14461 = vmatpush3.bf16.msra.mxu0 %v16085_v10  ;;  %v16097_v10 = vld [vmem:[%s18584_s9 + $0x1a0] sm:$0xff]  }
 0xae3   : > { %14462 = vmatprep.subr.bf16.mxu0 %v16086_v26 }
 0xae6   : > { %14463 = vmatpush3.bf16.msra.mxu0 %v16086_v26 }
 0xae7   : > { %14464 = vmatprep.subr.bf16.mxu0 %v16087_v51 }
 0xae9   : > { %14433 = vmatmul.mubr.bf16.gmra.mrb[100].mxu0 %v17743_v29 }
 0xaea   : > { %14436 = vmatprep.mubr.bf16.mxu0 %v17753_v52  ;;  %14465 = vmatpush3.bf16.msra.mxu0 %v16087_v51 }
 0xaeb   : > { %14466 = vmatprep.subr.bf16.mxu0 %v16088_v17 }
 0xaee   : > { %14467 = vmatpush3.bf16.msra.mxu0 %v16088_v17 }
 0xaef   : > { %14468 = vmatprep.subr.bf16.mxu0 %v16089_v40 }
 0xaf1   : > { %14437 = vmatmul.mubr.bf16.gmra.mrb[104].mxu0 %v17751_v61 }
 0xaf2   : > { %14440 = vmatprep.mubr.bf16.mxu0 %v17761_v54  ;;  %14469 = vmatpush3.bf16.msra.mxu0 %v16089_v40 }
 0xaf3   : > { %14470 = vmatprep.subr.bf16.mxu0 %v16090_v53 }
 0xaf6   : > { %14471 = vmatpush3.bf16.msra.mxu0 %v16090_v53 }
 0xaf7   : > { %14472 = vmatprep.subr.bf16.mxu0 %v16091_v9 }
 0xaf9   : > { %14441 = vmatmul.mubr.bf16.gmra.mrb[108].mxu0 %v17759_v22 }
 0xafa   : > { %14444 = vmatprep.mubr.bf16.mxu0 %v17769_v55  ;;  %14473 = vmatpush3.bf16.msra.mxu0 %v16091_v9 }
 0xafb   : > { %14474 = vmatprep.subr.bf16.mxu0 %v16092_v4 }
 0xafe   : > { %14475 = vmatpush3.bf16.msra.mxu0 %v16092_v4 }
 0xaff   : > { %14508 = vmatprep.subr.bf16.mxu0 %v16093_v7 }
 0xb01   : > { %14445 = vmatmul.mubr.bf16.gmra.mrb[112].mxu0 %v17767_v16 }
 0xb02   : > { %14448 = vmatprep.mubr.bf16.mxu0 %v17781_v5 }
 0xb09   : > { %14449 = vmatmul.mubr.bf16.gmra.mrb[116].mxu0 %v17778_v15 }
 0xb0a   : > { %14452 = vmatprep.mubr.bf16.mxu0 %v17793_v30 }
 0xb11   : > { %14453 = vmatmul.mubr.bf16.gmra.mrb[120].mxu0 %v17790_v38 }
 0xb12   : > { %14456 = vmatprep.mubr.bf16.mxu0 %v17805_v50 }
 0xb19   : > { %14457 = vmatmul.mubr.bf16.gmra.mrb[124].mxu0 %v17802_v12 }
 0xb1a   : > { %14476 = vmatprep.mubr.bf16.mxu0 %v18130_v28  ;;  %v16096_v28 = vld [vmem:[%s18584_s9 + $0x198] sm:$0xff]  }
 0xb21   : > { %14477 = vmatmul.mubr.bf16.vlgmr.msra.gmra.mrb[96].mxu0 %v18140_v36 }
 0xb22   : > { %14480 = vmatprep.mubr.bf16.mxu0 %v18150_v31  ;;  %14509 = vmatpush3.bf16.msra.mxu0 %v16093_v7 }
 0xb23   : > { %14510 = vmatprep.subr.bf16.mxu0 %v16094_v24 }
 0xb26   : > { %14511 = vmatpush3.bf16.msra.mxu0 %v16094_v24 }
 0xb27   : > { %14512 = vmatprep.subr.bf16.mxu0 %v16095_v41 }
 0xb29   : > { %14481 = vmatmul.mubr.bf16.gmra.mrb[100].mxu0 %v18157_v63 }
 0xb2a   : > { %14484 = vmatprep.mubr.bf16.mxu0 %v18161_v25  ;;  %14513 = vmatpush3.bf16.msra.mxu0 %v16095_v41 }
 0xb2b   : > { %14514 = vmatprep.subr.bf16.mxu0 %v16096_v28 }
 0xb2e   : > { %14515 = vmatpush3.bf16.msra.mxu0 %v16096_v28 }
 0xb2f   : > { %14516 = vmatprep.subr.bf16.mxu0 %v16097_v10 }
 0xb31   : > { %14485 = vmatmul.mubr.bf16.gmra.mrb[104].mxu0 %v18165_v8 }
 0xb32   : > { %14488 = vmatprep.mubr.bf16.mxu0 %v18169_v11  ;;  %14517 = vmatpush3.bf16.msra.mxu0 %v16097_v10 }
 0xb33   : > { %14518 = vmatprep.subr.bf16.mxu0 %v16098_v3 }
 0xb36   : > { %14519 = vmatpush3.bf16.msra.mxu0 %v16098_v3  ;;  %v18638_v3 = vld [vmem:[#allocation14_spill] sm:$0xff] }
 0xb37   : > { %14520 = vmatprep.subr.bf16.mxu0 %v16099_v60 }
 0xb39   : > { %14489 = vmatmul.mubr.bf16.gmra.mrb[108].mxu0 %v18173_v46 }
 0xb3a   : > { %14492 = vmatprep.mubr.bf16.mxu0 %v18183_v34  ;;  %14521 = vmatpush3.bf16.msra.mxu0 %v16099_v60 }
 0xb3b   : > { %14522 = vmatprep.subr.bf16.mxu0 %v16100_v58 }
 0xb3e   : > { %14523 = vmatpush3.bf16.msra.mxu0 %v16100_v58 }
 0xb3f   : > { %14556 = vmatprep.subr.bf16.mxu0 %v16101_v35 }
 0xb41   : > { %14493 = vmatmul.mubr.bf16.gmra.mrb[112].mxu0 %v18193_v42 }
 0xb42   : > { %14496 = vmatprep.mubr.bf16.mxu0 %v18203_v0 }
 0xb49   : > { %14497 = vmatmul.mubr.bf16.gmra.mrb[116].mxu0 %v18213_v14 }
 0xb4a   : > { %14500 = vmatprep.mubr.bf16.mxu0 %v18217_v62 }
 0xb51   : > { %14501 = vmatmul.mubr.bf16.gmra.mrb[120].mxu0 %v18221_v45 }
 0xb52   : > { %14504 = vmatprep.mubr.bf16.mxu0 %v18225_v44 }
 0xb59   : > { %14505 = vmatmul.mubr.bf16.gmra.mrb[124].mxu0 %v18267_v1 }
 0xb5a   : > { %14524 = vmatprep.mubr.bf16.mxu0 %v18037_v59  ;;  %v16104_v59 = vld [vmem:[%s18584_s9 + $0x1d8] sm:$0xff]  }
 0xb61   : > { %14525 = vmatmul.mubr.bf16.vlgmr.msra.gmra.mrb[96].mxu0 %v18052_v48  ;;  %v16105_v48 = vld [vmem:[%s18584_s9 + $0x1e0] sm:$0xff]  }
 0xb62   : > { %14528 = vmatprep.mubr.bf16.mxu0 %v18064_v21  ;;  %14557 = vmatpush3.bf16.msra.mxu0 %v16101_v35  ;;  %v16106_v21 = vld [vmem:[%s18584_s9 + $0x1e8] sm:$0xff]  }
 0xb63   : > { %14558 = vmatprep.subr.bf16.mxu0 %v16102_v43 }
 0xb66   : > { %14559 = vmatpush3.bf16.msra.mxu0 %v16102_v43  ;;  %v18639_v43 = vld [vmem:[#allocation15_spill] sm:$0xff] }
 0xb67   : > { %14560 = vmatprep.subr.bf16.mxu0 %v16103_v27 }
 0xb69   : > { %14529 = vmatmul.mubr.bf16.gmra.mrb[100].mxu0 %v18075_v23  ;;  %v16107_v23 = vld [vmem:[%s18584_s9 + $0x1f0] sm:$0xff]  }
 0xb6a   : > { %14532 = vmatprep.mubr.bf16.mxu0 %v18079_v6  ;;  %14561 = vmatpush3.bf16.msra.mxu0 %v16103_v27  ;;  %v16108_v6 = vld [vmem:[%s18584_s9 + $0x1f8] sm:$0xff]  }
 0xb6b   : > { %14562 = vmatprep.subr.bf16.mxu0 %v16104_v59 }
 0xb6e   : > { %14563 = vmatpush3.bf16.msra.mxu0 %v16104_v59 }
 0xb6f   : > { %14564 = vmatprep.subr.bf16.mxu0 %v16105_v48 }
 0xb71   : > { %14533 = vmatmul.mubr.bf16.gmra.mrb[104].mxu0 %v18082_v49  ;;  %v16109_v49 = vld [vmem:[%s18584_s9 + $0x200] sm:$0xff]  }
 0xb72   : > { %14536 = vmatprep.mubr.bf16.mxu0 %v18085_v56  ;;  %14565 = vmatpush3.bf16.msra.mxu0 %v16105_v48  ;;  %v16110_v56 = vld [vmem:[%s18584_s9 + $0x208] sm:$0xff]   ;;  %v18640_v48 = vld [vmem:[#allocation16_spill] sm:$0xff] }
 0xb73   : > { %14566 = vmatprep.subr.bf16.mxu0 %v16106_v21 }
 0xb76   : > { %14567 = vmatpush3.bf16.msra.mxu0 %v16106_v21 }
 0xb77   : > { %14568 = vmatprep.subr.bf16.mxu0 %v16107_v23 }
 0xb79   : > { %14537 = vmatmul.mubr.bf16.gmra.mrb[108].mxu0 %v18088_v33  ;;  %v16111_v33 = vld [vmem:[%s18584_s9 + $0x210] sm:$0xff]  }
 0xb7a   : > { %14540 = vmatprep.mubr.bf16.mxu0 %v18091_v13  ;;  %14569 = vmatpush3.bf16.msra.mxu0 %v16107_v23 }
 0xb7b   : > { %14570 = vmatprep.subr.bf16.mxu0 %v16108_v6 }
 0xb7e   : > { %14571 = vmatpush3.bf16.msra.mxu0 %v16108_v6 }
 0xb7f   : > { %14604 = vmatprep.subr.bf16.mxu0 %v16109_v49 }
 0xb81   : > { %14541 = vmatmul.mubr.bf16.gmra.mrb[112].mxu0 %v18094_v57 }
 0xb82   : > { %14544 = vmatprep.mubr.bf16.mxu0 %v18103_v37 }
 0xb89   : > { %14545 = vmatmul.mubr.bf16.gmra.mrb[116].mxu0 %v18106_v20 }
 0xb8a   : > { %14548 = vmatprep.mubr.bf16.mxu0 %v18109_v32 }
 0xb91   : > { %14549 = vmatmul.mubr.bf16.gmra.mrb[120].mxu0 %v18112_v19 }
 0xb92   : > { %14552 = vmatprep.mubr.bf16.mxu0 %v18119_v39 }
 0xb99   : > { %14553 = vmatmul.mubr.bf16.gmra.mrb[124].mxu0 %v18625_v47 }
 0xb9a   : > { %14572 = vmatprep.mubr.bf16.mxu0 %v17735_v2  ;;  %v16112_v2 = vld [vmem:[%s18584_s9 + $0x218] sm:$0xff]  }
 0xba1   : > { %14573 = vmatmul.mubr.bf16.vlgmr.msra.gmra.mrb[96].mxu0 %v17745_v18  ;;  %v16114_v18 = vld [vmem:[%s18584_s9 + $0x228] sm:$0xff]  }
 0xba2   : > { %14576 = vmatprep.mubr.bf16.mxu0 %v17743_v29  ;;  %14605 = vmatpush3.bf16.msra.mxu0 %v16109_v49  ;;  %v16113_v29 = vld [vmem:[%s18584_s9 + $0x220] sm:$0xff]   ;;  %v18641_v49 = vld [vmem:[#allocation17_spill] sm:$0xff] }
 0xba3   : > { %14606 = vmatprep.subr.bf16.mxu0 %v16110_v56 }
 0xba6   : > { %14607 = vmatpush3.bf16.msra.mxu0 %v16110_v56 }
 0xba7   : > { %14608 = vmatprep.subr.bf16.mxu0 %v16111_v33 }
 0xba9   : > { %14577 = vmatmul.mubr.bf16.gmra.mrb[100].mxu0 %v17753_v52  ;;  %v16116_v52 = vld [vmem:[%s18584_s9 + $0x238] sm:$0xff]  }
 0xbaa   : > { %14580 = vmatprep.mubr.bf16.mxu0 %v17751_v61  ;;  %14609 = vmatpush3.bf16.msra.mxu0 %v16111_v33  ;;  %v16115_v61 = vld [vmem:[%s18584_s9 + $0x230] sm:$0xff]  }
 0xbab   : > { %14610 = vmatprep.subr.bf16.mxu0 %v16112_v2 }
 0xbae   : > { %14611 = vmatpush3.bf16.msra.mxu0 %v16112_v2 }
 0xbaf   : > { %14612 = vmatprep.subr.bf16.mxu0 %v16113_v29 }
 0xbb1   : > { %14581 = vmatmul.mubr.bf16.gmra.mrb[104].mxu0 %v17761_v54  ;;  %v18630_v54 = vld [vmem:[#allocation6_spill] sm:$0xff] }
 0xbb2   : > { %14584 = vmatprep.mubr.bf16.mxu0 %v17759_v22  ;;  %14613 = vmatpush3.bf16.msra.mxu0 %v16113_v29  ;;  %v18446_v22 = vld [vmem:[%s18579_s4] ss:$0 sm:$0xff] }
 0xbb3   : > { %14614 = vmatprep.subr.bf16.mxu0 %v16114_v18  ;;  %v671_v60 = vadd.f32 %v18638_v3, %v18446_v22  ;;  %v663_v27 = vadd.f32 %v18446_v22, %v18639_v43  ;;  %v674_v21 = vadd.f32 %v18640_v48, %v18446_v22  ;;  %v666_v56 = vadd.f32 %v18446_v22, %v18641_v49 }
 0xbb6   : > { %14615 = vmatpush3.bf16.msra.mxu0 %v16114_v18 }
 0xbb7   : > { %14616 = vmatprep.subr.bf16.mxu0 %v16115_v61 }
 0xbb9   : > { %14585 = vmatmul.mubr.bf16.gmra.mrb[108].mxu0 %v17769_v55  ;;  %v18631_v55 = vld [vmem:[#allocation7_spill] sm:$0xff] }
 0xbba   : > { %14588 = vmatprep.mubr.bf16.mxu0 %v17767_v16  ;;  %14617 = vmatpush3.bf16.msra.mxu0 %v16115_v61  ;;  %v639_v16 = vadd.f32 %v18630_v54, %v18446_v22 }
 0xbbb   : > { %14618 = vmatprep.subr.bf16.mxu0 %v16116_v52 }
 0xbbe   : > { %14619 = vmatpush3.bf16.msra.mxu0 %v16116_v52 }
 0xbc1   : > { %14589 = vmatmul.mubr.bf16.gmra.mrb[112].mxu0 %v17781_v5  ;;  %v18455_v5 = vld [vmem:[%s18585_s10] ss:$0 sm:$0xff] }
 0xbc2   : > { %14592 = vmatprep.mubr.bf16.mxu0 %v17778_v15  ;;  %v631_v15 = vadd.f32 %v18446_v22, %v18631_v55  ;;  %v14677_v18 = vadd.f32 %v18455_v5, %v671_v60  ;;  %v14680_v54 = vadd.f32 %v18455_v5, %v663_v27  ;;  %v18649_v60 = vld [vmem:[#allocation25_spill] sm:$0xff] }
 0xbc4   : > { %v14656_v57 = vadd.f32 %v18455_v5, %v631_v15  ;;  %v14683_v15 = vadd.f32 %v18455_v5, %v674_v21 }
 0xbc9   : > { %14593 = vmatmul.mubr.bf16.gmra.mrb[116].mxu0 %v17793_v30 }
 0xbca   : > { %14596 = vmatprep.mubr.bf16.mxu0 %v17790_v38  ;;  %v18632_v38 = vld [vmem:[#allocation8_spill] sm:$0xff] }
 0xbcb   : > { %v642_v30 = vadd.f32 %v18632_v38, %v18446_v22 }
 0xbcd   : > { %v14659_v32 = vadd.f32 %v18455_v5, %v642_v30 }
 0xbd1   : > { %14597 = vmatmul.mubr.bf16.gmra.mrb[120].mxu0 %v17805_v50  ;;  %v14653_v50 = vadd.f32 %v18455_v5, %v639_v16 }
 0xbd2   : > { %14600 = vmatprep.mubr.bf16.mxu0 %v17802_v12 }
 0xbd9   : > { %14601 = vmatmul.mubr.bf16.gmra.mrb[124].mxu0 %v18625_v47 }
 0xbda   : > { %14620 = vmatprep.mubr.bf16.mxu0 %v18140_v36 }
 0xbe1   : > { %14621 = vmatmul.mubr.bf16.vlgmr.msra.gmra.mrb[96].mxu0 %v18150_v31  ;;  %v18634_v31 = vld [vmem:[#allocation10_spill] sm:$0xff] }
 0xbe2   : > { %14624 = vmatprep.mubr.bf16.mxu0 %v18157_v63  ;;  %v655_v63 = vadd.f32 %v18634_v31, %v18446_v22 }
 0xbe4   : > { %v14665_v17 = vadd.f32 %v18455_v5, %v655_v63  ;;  %v18645_v63 = vld [vmem:[#allocation21_spill] sm:$0xff] }
 0xbe9   : > { %14625 = vmatmul.mubr.bf16.gmra.mrb[100].mxu0 %v18161_v25 }
 0xbea   : > { %14628 = vmatprep.mubr.bf16.mxu0 %v18165_v8 }
 0xbf1   : > { %14629 = vmatmul.mubr.bf16.gmra.mrb[104].mxu0 %v18169_v11  ;;  %v18635_v11 = vld [vmem:[#allocation11_spill] sm:$0xff] }
 0xbf2   : > { %14632 = vmatprep.mubr.bf16.mxu0 %v18173_v46  ;;  %v647_v46 = vadd.f32 %v18446_v22, %v18635_v11 }
 0xbf4   : > { %v14668_v9 = vadd.f32 %v18455_v5, %v647_v46 }
 0xbf9   : > { %14633 = vmatmul.mubr.bf16.gmra.mrb[108].mxu0 %v18183_v34 }
 0xbfa   : > { %14636 = vmatprep.mubr.bf16.mxu0 %v18193_v42  ;;  %v18636_v42 = vld [vmem:[#allocation12_spill] sm:$0xff] }
 0xc01   : > { %14637 = vmatmul.mubr.bf16.gmra.mrb[112].mxu0 %v18203_v0  ;;  %v658_v0 = vadd.f32 %v18636_v42, %v18446_v22 }
 0xc02   : > { %14640 = vmatprep.mubr.bf16.mxu0 %v18213_v14 }
 0xc03   : > { %v14671_v24 = vadd.f32 %v18455_v5, %v658_v0 }
 0xc09   : > { %14641 = vmatmul.mubr.bf16.gmra.mrb[116].mxu0 %v18217_v62 }
 0xc0a   : > { %14644 = vmatprep.mubr.bf16.mxu0 %v18221_v45  ;;  %v18637_v45 = vld [vmem:[#allocation13_spill] sm:$0xff] }
 0xc11   : > { %14645 = vmatmul.mubr.bf16.gmra.mrb[120].mxu0 %v18225_v44  ;;  %v650_v44 = vadd.f32 %v18446_v22, %v18637_v45 }
 0xc12   : > { %14648 = vmatprep.mubr.bf16.mxu0 %v18267_v1 }
 0xc13   : > { %v14674_v10 = vadd.f32 %v18455_v5, %v650_v44 }
 0xc19   : > { %14649 = vmatmul.mubr.bf16.gmra.mrb[124].mxu0 %v18625_v47  ;;  %v18633_v47 = vld [vmem:[#allocation9_spill] sm:$0xff] }
 0xc1a   : > { %v634_v12 = vadd.f32 %v18446_v22, %v18633_v47  ;;  %v14686_v47 = vadd.f32 %v18455_v5, %v666_v56 }
 0xc1c   : > { %v14662_v36 = vadd.f32 %v18455_v5, %v634_v12  ;;  %v18642_v12 = vld [vmem:[#allocation18_spill] sm:$0xff] }
 0xcb4   : > { %v14622_v13 = vpop.f32.mrb[96].mxu0 }
 0xcb5   : > { %v14654_v37 = vadd.f32 %v14653_v50, %v14622_v13  ;;  %v10503_v20 = vpop.f32.mrb[97].mxu0  ;;  %v687_v50 = vadd.f32 %v18642_v12, %v18446_v22 }
 0xcb6   : > { %v14657_v19 = vadd.f32 %v14656_v57, %v10503_v20  ;;  %v14623_v39 = vpop.f32.mrb[98].mxu0 }
 0xcb7   : > { %v14660_v25 = vadd.f32 %v14659_v32, %v14623_v39  ;;  %v10506_v8 = vpop.f32.mrb[99].mxu0  ;;  %v10728_v14 = vmax.f32 %v14654_v37, 0.0  ;;  %v18643_v37 = vld [vmem:[#allocation19_spill] sm:$0xff] }
 0xcb8   : > { %v14663_v34 = vadd.f32 %v14662_v36, %v10506_v8  ;;  %v10726_v1 = vmax.f32 %v14657_v19, 0.0  ;;  %v679_v20 = vadd.f32 %v18446_v22, %v18643_v37  ;;  %v18644_v19 = vld [vmem:[#allocation20_spill] sm:$0xff] }
 0xcb9   : > { %v10729_v62 = vmax.f32 %v14660_v25, 0.0  ;;  %v690_v39 = vadd.f32 %v18644_v19, %v18446_v22  ;;  %v682_v25 = vadd.f32 %v18446_v22, %v18645_v63 }
 0xcba   : > { %v10727_v26 = vmax.f32 %v14663_v34, 0.0  ;;  %v14689_v34 = vadd.f32 %v18455_v5, %v687_v50  ;;  %v18653_v50 = vld [vmem:[#allocation29_spill] sm:$0xff] }
 0xcbb   : > { %v11877_v51 = vpack.c.bf16 %v10729_v62, %v10728_v14  ;;  %v14692_v14 = vadd.f32 %v18455_v5, %v679_v20  ;;  %v14695_v44 = vadd.f32 %v18455_v5, %v690_v39 }
 0xcbc   : > { %v11872_v40 = vpack.c.bf16 %v10727_v26, %v10726_v1  ;;  %v14626_v53 = vpop.f32.mrb[100].mxu0 }
 0xcbd   : > { %11949 = vst [vmem:[%s18478_s14 + $0x8] sm:$0xff] %v11877_v51   ;;  %v14666_v4 = vadd.f32 %v14665_v17, %v14626_v53  ;;  %v10519_v7 = vpop.f32.mrb[101].mxu0  ;;  %v14698_v51 = vadd.f32 %v18455_v5, %v682_v25  ;;  %v18646_v17 = vld [vmem:[#allocation22_spill] sm:$0xff] }
 0xcbe   : > { %11873 = vst [vmem:[%s18478_s14] sm:$0xff] %v11872_v40   ;;  %v14669_v41 = vadd.f32 %v14668_v9, %v10519_v7  ;;  %v14627_v28 = vpop.f32.mrb[102].mxu0  ;;  %v703_v40 = vadd.f32 %v18646_v17, %v18446_v22 }
 0xcbf   : > { %v14672_v58 = vadd.f32 %v14671_v24, %v14627_v28  ;;  %v10522_v35 = vpop.f32.mrb[103].mxu0  ;;  %v10732_v23 = vmax.f32 %v14666_v4, 0.0  ;;  %v18647_v4 = vld [vmem:[#allocation23_spill] sm:$0xff] }
 0xcc0   : > { %v14675_v59 = vadd.f32 %v14674_v10, %v10522_v35  ;;  %v10730_v33 = vmax.f32 %v14669_v41, 0.0  ;;  %v695_v7 = vadd.f32 %v18446_v22, %v18647_v4  ;;  %v18648_v41 = vld [vmem:[#allocation24_spill] sm:$0xff] }
 0xcc1   : > { %v10733_v6 = vmax.f32 %v14672_v58, 0.0  ;;  %v706_v28 = vadd.f32 %v18648_v41, %v18446_v22  ;;  %v698_v58 = vadd.f32 %v18446_v22, %v18649_v60 }
 0xcc2   : > { %v10731_v2 = vmax.f32 %v14675_v59, 0.0  ;;  %v14701_v59 = vadd.f32 %v18455_v5, %v703_v40  ;;  %v18657_v40 = vld [vmem:[#allocation33_spill] sm:$0xff] }
 0xcc3   : > { %v11887_v29 = vpack.c.bf16 %v10733_v6, %v10732_v23  ;;  %v14704_v23 = vadd.f32 %v18455_v5, %v695_v7  ;;  %v14707_v56 = vadd.f32 %v18455_v5, %v706_v28 }
 0xcc4   : > { %v11882_v61 = vpack.c.bf16 %v10731_v2, %v10730_v33  ;;  %v14630_v52 = vpop.f32.mrb[104].mxu0 }
 0xcc5   : > { %11951 = vst [vmem:[%s18478_s14 + $0x18] sm:$0xff] %v11887_v29   ;;  %v14678_v16 = vadd.f32 %v14677_v18, %v14630_v52  ;;  %v10535_v55 = vpop.f32.mrb[105].mxu0  ;;  %v14710_v29 = vadd.f32 %v18455_v5, %v698_v58  ;;  %v18650_v18 = vld [vmem:[#allocation26_spill] sm:$0xff] }
 0xcc6   : > { %11950 = vst [vmem:[%s18478_s14 + $0x10] sm:$0xff] %v11882_v61   ;;  %v14681_v38 = vadd.f32 %v14680_v54, %v10535_v55  ;;  %v14631_v30 = vpop.f32.mrb[106].mxu0  ;;  %v719_v61 = vadd.f32 %v18650_v18, %v18446_v22 }
 0xcc7   : > { %v14684_v13 = vadd.f32 %v14683_v15, %v14631_v30  ;;  %v10538_v57 = vpop.f32.mrb[107].mxu0  ;;  %v10736_v36 = vmax.f32 %v14678_v16, 0.0  ;;  %v18651_v16 = vld [vmem:[#allocation27_spill] sm:$0xff] }
 0xcc8   : > { %v14687_v32 = vadd.f32 %v14686_v47, %v10538_v57  ;;  %v10734_v8 = vmax.f32 %v14681_v38, 0.0  ;;  %v711_v55 = vadd.f32 %v18446_v22, %v18651_v16  ;;  %v18652_v38 = vld [vmem:[#allocation28_spill] sm:$0xff] }
 0xcc9   : > { %v10737_v31 = vmax.f32 %v14684_v13, 0.0  ;;  %v722_v30 = vadd.f32 %v18652_v38, %v18446_v22  ;;  %v714_v13 = vadd.f32 %v18446_v22, %v18653_v50 }
 0xcca   : > { %v10735_v11 = vmax.f32 %v14687_v32, 0.0  ;;  %v14713_v32 = vadd.f32 %v18455_v5, %v719_v61  ;;  %v18661_v61 = vld [vmem:[#allocation37_spill] sm:$0xff] }
 0xccb   : > { %v11897_v46 = vpack.c.bf16 %v10737_v31, %v10736_v36  ;;  %v14716_v36 = vadd.f32 %v18455_v5, %v711_v55  ;;  %v14719_v25 = vadd.f32 %v18455_v5, %v722_v30 }
 0xccc   : > { %v11892_v42 = vpack.c.bf16 %v10735_v11, %v10734_v8  ;;  %v14634_v0 = vpop.f32.mrb[108].mxu0 }
 0xccd   : > { %11953 = vst [vmem:[%s18478_s14 + $0x28] sm:$0xff] %v11897_v46   ;;  %v14690_v62 = vadd.f32 %v14689_v34, %v14634_v0  ;;  %v10551_v45 = vpop.f32.mrb[109].mxu0  ;;  %v14722_v46 = vadd.f32 %v18455_v5, %v714_v13  ;;  %v18654_v34 = vld [vmem:[#allocation30_spill] sm:$0xff] }
 0xcce   : > { %11952 = vst [vmem:[%s18478_s14 + $0x20] sm:$0xff] %v11892_v42   ;;  %v14693_v1 = vadd.f32 %v14692_v14, %v10551_v45  ;;  %v14635_v26 = vpop.f32.mrb[110].mxu0  ;;  %v735_v42 = vadd.f32 %v18654_v34, %v18446_v22 }
 0xccf   : > { %v14696_v53 = vadd.f32 %v14695_v44, %v14635_v26  ;;  %v10554_v9 = vpop.f32.mrb[111].mxu0  ;;  %v10740_v10 = vmax.f32 %v14690_v62, 0.0  ;;  %v18655_v62 = vld [vmem:[#allocation31_spill] sm:$0xff] }
 0xcd0   : > { %v14699_v24 = vadd.f32 %v14698_v51, %v10554_v9  ;;  %v10738_v35 = vmax.f32 %v14693_v1, 0.0  ;;  %v727_v45 = vadd.f32 %v18446_v22, %v18655_v62  ;;  %v18656_v1 = vld [vmem:[#allocation32_spill] sm:$0xff] }
 0xcd1   : > { %v10741_v3 = vmax.f32 %v14696_v53, 0.0  ;;  %v738_v26 = vadd.f32 %v18656_v1, %v18446_v22  ;;  %v730_v53 = vadd.f32 %v18446_v22, %v18657_v40 }
 0xcd2   : > { %v10739_v43 = vmax.f32 %v14699_v24, 0.0  ;;  %v14725_v24 = vadd.f32 %v18455_v5, %v735_v42 }
 0xcd3   : > { %v11907_v27 = vpack.c.bf16 %v10741_v3, %v10740_v10  ;;  %v14728_v10 = vadd.f32 %v18455_v5, %v727_v45  ;;  %v14731_v58 = vadd.f32 %v18455_v5, %v738_v26 }
 0xcd4   : > { %v11902_v48 = vpack.c.bf16 %v10739_v43, %v10738_v35  ;;  %v14638_v21 = vpop.f32.mrb[112].mxu0 }
 0xcd5   : > { %11955 = vst [vmem:[%s18478_s14 + $0x38] sm:$0xff] %v11907_v27   ;;  %v14702_v6 = vadd.f32 %v14701_v59, %v14638_v21  ;;  %v10567_v49 = vpop.f32.mrb[113].mxu0  ;;  %v14734_v27 = vadd.f32 %v18455_v5, %v730_v53  ;;  %v18658_v59 = vld [vmem:[#allocation34_spill] sm:$0xff] }
 0xcd6   : > { %11954 = vst [vmem:[%s18478_s14 + $0x30] sm:$0xff] %v11902_v48   ;;  %v14705_v33 = vadd.f32 %v14704_v23, %v10567_v49  ;;  %v14639_v2 = vpop.f32.mrb[114].mxu0  ;;  %v751_v48 = vadd.f32 %v18658_v59, %v18446_v22 }
 0xcd7   : > { %v14708_v52 = vadd.f32 %v14707_v56, %v14639_v2  ;;  %v10570_v54 = vpop.f32.mrb[115].mxu0  ;;  %v10744_v47 = vmax.f32 %v14702_v6, 0.0  ;;  %v18659_v6 = vld [vmem:[#allocation35_spill] sm:$0xff] }
 0xcd8   : > { %v14711_v15 = vadd.f32 %v14710_v29, %v10570_v54  ;;  %v10742_v57 = vmax.f32 %v14705_v33, 0.0  ;;  %v743_v49 = vadd.f32 %v18446_v22, %v18659_v6  ;;  %v18660_v33 = vld [vmem:[#allocation36_spill] sm:$0xff] }
 0xcd9   : > { %v10745_v12 = vmax.f32 %v14708_v52, 0.0  ;;  %v754_v2 = vadd.f32 %v18660_v33, %v18446_v22  ;;  %v746_v52 = vadd.f32 %v18446_v22, %v18661_v61 }
 0xcda   : > { %v10743_v37 = vmax.f32 %v14711_v15, 0.0  ;;  %v14737_v15 = vadd.f32 %v18455_v5, %v751_v48 }
 0xcdb   : > { %v11917_v20 = vpack.c.bf16 %v10745_v12, %v10744_v47  ;;  %v14740_v47 = vadd.f32 %v18455_v5, %v743_v49  ;;  %v14743_v13 = vadd.f32 %v18455_v5, %v754_v2  ;;  %v14746_v22 = vadd.f32 %v18455_v5, %v746_v52 }
 0xcdc   : > { %v11912_v19 = vpack.c.bf16 %v10743_v37, %v10742_v57  ;;  %v14642_v39 = vpop.f32.mrb[116].mxu0 }
 0xcdd   : > { %11957 = vst [vmem:[%s18478_s14 + $0x48] sm:$0xff] %v11917_v20   ;;  %v14714_v31 = vadd.f32 %v14713_v32, %v14642_v39  ;;  %v10583_v63 = vpop.f32.mrb[117].mxu0 }
 0xcde   : > { %11956 = vst [vmem:[%s18478_s14 + $0x40] sm:$0xff] %v11912_v19   ;;  %v14717_v8 = vadd.f32 %v14716_v36, %v10583_v63  ;;  %v14643_v11 = vpop.f32.mrb[118].mxu0 }
 0xcdf   : > { %v14720_v0 = vadd.f32 %v14719_v25, %v14643_v11  ;;  %v10586_v14 = vpop.f32.mrb[119].mxu0  ;;  %v10748_v51 = vmax.f32 %v14714_v31, 0.0 }
 0xce0   : > { %v14723_v44 = vadd.f32 %v14722_v46, %v10586_v14  ;;  %v10746_v9 = vmax.f32 %v14717_v8, 0.0 }
 0xce1   : > { %v10749_v17 = vmax.f32 %v14720_v0, 0.0 }
 0xce2   : > { %v10747_v4 = vmax.f32 %v14723_v44, 0.0 }
 0xce3   : > { %v11927_v7 = vpack.c.bf16 %v10749_v17, %v10748_v51 }
 0xce4   : > { %v11922_v41 = vpack.c.bf16 %v10747_v4, %v10746_v9  ;;  %v14646_v28 = vpop.f32.mrb[120].mxu0 }
 0xce5   : > { %11959 = vst [vmem:[%s18478_s14 + $0x58] sm:$0xff] %v11927_v7   ;;  %v14726_v3 = vadd.f32 %v14725_v24, %v14646_v28  ;;  %v10599_v60 = vpop.f32.mrb[121].mxu0 }
 0xce6   : > { %11958 = vst [vmem:[%s18478_s14 + $0x50] sm:$0xff] %v11922_v41   ;;  %v14729_v35 = vadd.f32 %v14728_v10, %v10599_v60  ;;  %v14647_v43 = vpop.f32.mrb[122].mxu0 }
 0xce7   : > { %v14732_v21 = vadd.f32 %v14731_v58, %v14647_v43  ;;  %v10602_v23 = vpop.f32.mrb[123].mxu0  ;;  %v10752_v29 = vmax.f32 %v14726_v3, 0.0 }
 0xce8   : > { %v14735_v56 = vadd.f32 %v14734_v27, %v10602_v23  ;;  %v10750_v54 = vmax.f32 %v14729_v35, 0.0 }
 0xce9   : > { %v10753_v18 = vmax.f32 %v14732_v21, 0.0 }
 0xcea   : > { %v10751_v16 = vmax.f32 %v14735_v56, 0.0 }
 0xceb   : > { %v11937_v55 = vpack.c.bf16 %v10753_v18, %v10752_v29 }
 0xcec   : > { %v11932_v38 = vpack.c.bf16 %v10751_v16, %v10750_v54  ;;  %v14650_v30 = vpop.f32.mrb[124].mxu0 }
 0xced   : > { %11961 = vst [vmem:[%s18478_s14 + $0x68] sm:$0xff] %v11937_v55   ;;  %v14738_v12 = vadd.f32 %v14737_v15, %v14650_v30  ;;  %v10615_v50 = vpop.f32.mrb[125].mxu0 }
 0xcee   : > { %11960 = vst [vmem:[%s18478_s14 + $0x60] sm:$0xff] %v11932_v38   ;;  %v14741_v57 = vadd.f32 %v14740_v47, %v10615_v50  ;;  %v14651_v37 = vpop.f32.mrb[126].mxu0 }
 0xcef   : > { %v14744_v20 = vadd.f32 %v14743_v13, %v14651_v37  ;;  %v10618_v32 = vpop.f32.mrb[127].mxu0  ;;  %v10756_v39 = vmax.f32 %v14738_v12, 0.0 }
 0xcf0   : > { %v14747_v19 = vadd.f32 %v14746_v22, %v10618_v32  ;;  %v10754_v31 = vmax.f32 %v14741_v57, 0.0 }
 0xcf1   : > { %v10757_v36 = vmax.f32 %v14744_v20, 0.0 }
 0xcf2   : > { %v10755_v63 = vmax.f32 %v14747_v19, 0.0 }
 0xcf3   : > { %v11947_v25 = vpack.c.bf16 %v10757_v36, %v10756_v39 }
 0xcf4   : > { %v11942_v8 = vpack.c.bf16 %v10755_v63, %v10754_v31 }
 0xcf5   : > { %11963 = vst [vmem:[%s18478_s14 + $0x78] sm:$0xff] %v11947_v25  }
 0xcf6   : > { %11962 = vst [vmem:[%s18478_s14 + $0x70] sm:$0xff] %v11942_v8  }
 0xcf7 PF: > { %s21_s17 = sadd.s32 1, %s16139_s17  }
 0xcf8   : > { %p18_p4 = scmp.ge.s32.totalorder %s21_s17, 4  }
 0xcfa   :  { %20 = sbr.rel (!%p18_p4) target bundleno = 1 (0x1), region = 118 }

</bundles_post_ra>
